<compile_context>
chip_gen: v5e
topology: v5e:2x2
jax: 0.10.0
libtpu: 0.0.40
codegen_flags: <defaults>
</compile_context>

<pallas_src>
import jax
import jax.numpy as jnp
from jax import lax
from jax.experimental import pallas as pl
from jax.experimental.pallas import tpu as pltpu


# ---------------------------------------------------------------------------
# One-time parameter preparation (hoisted out of the jitted forward)
# ---------------------------------------------------------------------------

def _banded_weight(w_hwio, in_width, out_width, in_stride, pad_w):
    """(ksh, ksw, Cin, Cout) conv weight -> (ksh, in_width*Cin, out_width*Cout)
    banded matmul weight for the rows=(n, h), lanes=(w, c) activation layout.

    Horizontal zero-padding is folded in: taps addressing a column outside
    [0, in_width) never match and are dropped, so the activation is consumed
    UNPADDED along width (review item: no jnp.pad, K stays exactly W*Cin)."""
    ksh, ksw, cin, cout = w_hwio.shape
    wp = jnp.arange(in_width)[None, :, None]
    wo = jnp.arange(out_width)[None, None, :]
    kw = jnp.arange(ksw)[:, None, None]
    sel = (wp == in_stride * wo + kw - pad_w).astype(jnp.float32)       # (ksw, Wp, Wo)
    band = jnp.einsum("kpo,hkic->hpioc", sel, w_hwio.astype(jnp.float32))
    return band.reshape(ksh, in_width * cin, out_width * cout).astype(jnp.bfloat16)


def _lane_tile(v, width):
    """Per-channel (C,) vector -> (1, width*C) row tiled onto the (w, c) lane axis."""
    return jnp.tile(v.astype(jnp.float32), width).reshape(1, width * v.shape[0])


# ---------------------------------------------------------------------------
# Fused encoder: one pallas_call for the whole forward pass
# ---------------------------------------------------------------------------

def make_fused_encoder(n, cin, h, w, hidden, kernel_size, padding, n_resblocks,
                       eps=1e-5):
    ks, pad = kernel_size, padding
    nst = len(hidden)
    assert ks == 2 * pad + 1, "residual blocks require 'same' convolutions"
    hs = [h // (2 ** s) for s in range(nst)]
    ws = [w // (2 ** s) for s in range(nst)]
    cs = list(hidden)
    for s in range(nst - 1):
        assert hs[s] % 2 == 0 and ws[s] % 2 == 0, "MaxPool2d(2) needs even H, W"
    for s in range(nst):
        assert ws[s] & (ws[s] - 1) == 0, "roll-tree BN reduction needs power-of-2 width"
    n_rb = [n_resblocks if s < nst - 1 else 0 for s in range(nst)]
    n_wops = 2 + 4 * (nst - 1) + 8 * sum(n_rb)

    # --- VMEM scratch plan: vertically padded activation buffers, per-stage temp
    #     buffer for the residual-block intermediate, and pooled maps. ---
    scratch_shapes = []

    def _alloc(shape):
        scratch_shapes.append(pltpu.VMEM(shape, jnp.float32))
        return len(scratch_shapes) - 1

    idx_in = _alloc((n, h + 2 * pad, w * cin))
    idx_act, idx_tmp, idx_pool = {}, {}, {}
    for s in range(nst):
        if s < nst - 1 or n_rb[s] > 0:
            idx_act[s] = _alloc((n, hs[s] + 2 * pad, ws[s] * cs[s]))
        if n_rb[s] > 0:
            idx_tmp[s] = _alloc((n, hs[s] + 2 * pad, ws[s] * cs[s]))
    for s in range(1, nst):
        idx_pool[s] = _alloc((n, hs[s], ws[s - 1] * cs[s - 1]))

    def kernel(*refs):
        assert len(refs) == 1 + n_wops + nst + len(scratch_shapes)
        x_ref = refs[0]
        w_refs = refs[1:1 + n_wops]
        skip_refs = refs[1 + n_wops:1 + n_wops + nst]
        scr = refs[1 + n_wops + nst:]
        wit = iter(w_refs)

        # ---------------- in-kernel helpers (all indices are static) ----------------

        def zero_pad_rows(buf, h_int):
            if pad == 0:
                return
            z = jnp.zeros((pad, buf.shape[2]), jnp.float32)
            for nn in range(n):
                buf[nn, 0:pad, :] = z
                buf[nn, pad + h_int:pad + h_int + pad, :] = z

        def conv(src, band_ref, bias_ref, h_out):
            """K-tap banded conv: out[r] = sum_kh src[r + kh] @ band[kh] + bias.
            `src` is a vertically padded VMEM buffer (n, h_out + ksh - 1, K);
            bf16 MXU operands, f32 accumulation (no im2col, no HBM traffic)."""
            ksh = band_ref.shape[0]
            taps = [band_ref[kh] for kh in range(ksh)]            # bf16 (K, M)
            bias = bias_ref[...]                                  # (1, M) f32
            outs = []
            for nn in range(n):
                acc = jnp.dot(src[nn, 0:h_out, :].astype(jnp.bfloat16), taps[0],
                              preferred_element_type=jnp.float32)
                for kh in range(1, ksh):
                    acc = acc + jnp.dot(
                        src[nn, kh:kh + h_out, :].astype(jnp.bfloat16), taps[kh],
                        preferred_element_type=jnp.float32)
                outs.append(acc + bias)
            return outs                                           # n x (h_out, M) f32

        def bn_relu(ys, gamma_ref, beta_ref, c, w_blocks, h_rows):
            """Training-mode BatchNorm (biased batch variance) + ReLU, fully
            in-kernel.  Per-channel sums are replicated across the W lane-blocks
            with a log2(W) circular pltpu.roll tree (XLU slot, ~free)."""
            wc = w_blocks * c
            s1 = jnp.zeros((1, wc), jnp.float32)
            s2 = jnp.zeros((1, wc), jnp.float32)
            for y in ys:
                s1 = s1 + jnp.sum(y, axis=0, keepdims=True)
                s2 = s2 + jnp.sum(y * y, axis=0, keepdims=True)
            shift = c
            while shift < wc:
                s1 = s1 + pltpu.roll(s1, shift, 1)
                s2 = s2 + pltpu.roll(s2, shift, 1)
                shift *= 2
            inv_cnt = 1.0 / float(n * h_rows * w_blocks)
            mean = s1 * inv_cnt
            var = jnp.maximum(s2 * inv_cnt - mean * mean, 0.0)    # guard cancellation
            a = gamma_ref[...] * lax.rsqrt(var + eps)
            b = beta_ref[...] - mean * a
            return [jnp.maximum(y * a + b, 0.0) for y in ys]

        def store_interior(buf, vals, h_rows):
            for nn in range(n):
                buf[nn, pad:pad + h_rows, :] = vals[nn]

        # --- init: zero the vertical padding rows of every padded buffer (once) ---
        zero_pad_rows(scr[idx_in], h)
        for s_i, b_i in idx_act.items():
            zero_pad_rows(scr[b_i], hs[s_i])
        for s_i, b_i in idx_tmp.items():
            zero_pad_rows(scr[b_i], hs[s_i])

        # --- stem conv (no BN/ReLU before the first residual block) ---
        for nn in range(n):
            scr[idx_in][nn, pad:pad + h, :] = x_ref[nn]
        cur = conv(scr[idx_in], next(wit), next(wit), hs[0])

        # --- stages ---
        for s in range(nst):
            if s > 0:
                band_p, bias_p = next(wit), next(wit)
                gam_p, bet_p = next(wit), next(wit)
                # MaxPool2d(2), fused: vertical pair-max (static row indexing) ...
                a_prev = scr[idx_act[s - 1]]
                pool_buf = scr[idx_pool[s]]
                wc_prev = ws[s - 1] * cs[s - 1]
                for nn in range(n):
                    for r in range(hs[s]):
                        top = a_prev[nn, pad + 2 * r:pad + 2 * r + 1, :]
                        bot = a_prev[nn, pad + 2 * r + 1:pad + 2 * r + 2, :]
                        pool_buf[nn, r:r + 1, :] = jnp.maximum(top, bot)
                # ... horizontal pair-max via a C-lane roll, then the stride-2
                # banded 1x1 projection.  Valid pooled values sit in the even
                # C-blocks; odd blocks are don't-care and hit all-zero weight
                # columns of the band (coupling internal to this kernel).
                proj_tap = band_p[0]                              # (wc_prev, M) bf16
                bias_v = bias_p[...]
                ys = []
                for nn in range(n):
                    v = pool_buf[nn]
                    v = jnp.maximum(v, pltpu.roll(v, wc_prev - cs[s - 1], 1))
                    ys.append(jnp.dot(v.astype(jnp.bfloat16), proj_tap,
                                      preferred_element_type=jnp.float32) + bias_v)
                cur = bn_relu(ys, gam_p, bet_p, cs[s], ws[s], hs[s])

            if s in idx_act:
                store_interior(scr[idx_act[s]], cur, hs[s])

            for _ in range(n_rb[s]):
                band1, bias1, g1, be1 = next(wit), next(wit), next(wit), next(wit)
                band2, bias2, g2, be2 = next(wit), next(wit), next(wit), next(wit)
                a_buf = scr[idx_act[s]]
                t_buf = scr[idx_tmp[s]]
                # NOTE: Dropout2d output is discarded in the reference forward -> no-op.
                y1 = conv(a_buf, band1, bias1, hs[s])
                h1 = bn_relu(y1, g1, be1, cs[s], ws[s], hs[s])
                store_interior(t_buf, h1, hs[s])
                y2 = conv(t_buf, band2, bias2, hs[s])
                y2 = [y2[nn] + a_buf[nn, pad:pad + hs[s], :]      # og_x + conv2(h)
                      for nn in range(n)]
                cur = bn_relu(y2, g2, be2, cs[s], ws[s], hs[s])
                store_interior(a_buf, cur, hs[s])

            # emit this stage's skip in the lane-dense (N, H, W*C) layout
            for nn in range(n):
                skip_refs[s][nn] = cur[nn]

    vmem_spec = pl.BlockSpec(memory_space=pltpu.MemorySpace.VMEM)
    fused_call = pl.pallas_call(
        kernel,
        out_shape=tuple(jax.ShapeDtypeStruct((n, hs[s], ws[s] * cs[s]), jnp.float32)
                        for s in range(nst)),
        in_specs=[vmem_spec] * (1 + n_wops),
        out_specs=tuple(vmem_spec for _ in range(nst)),
        scratch_shapes=scratch_shapes,
        compiler_params=pltpu.CompilerParams(vmem_limit_bytes=32 * 1024 * 1024),
    )

    def prepare_operands(params):
        """Banded bf16 weights + lane-tiled biases/gammas/betas, built ONCE
        (review item: hoisted out of the jitted forward)."""
        ops = [_banded_weight(params["stem_w"], w, ws[0], 1, pad),
               _lane_tile(params["stem_b"], ws[0])]
        for s in range(nst):
            st = params["stages"][s]
            if s > 0:
                ops += [_banded_weight(st["proj_w"], ws[s - 1], ws[s], 2, 0),
                        _lane_tile(st["proj_b"], ws[s]),
                        _lane_tile(st["proj_g"], ws[s]),
                        _lane_tile(st["proj_beta"], ws[s])]
            for r in range(n_rb[s]):
                rb = st["resblocks"][r]
                ops += [_banded_weight(rb["w1"], ws[s], ws[s], 1, pad),
                        _lane_tile(rb["b1"], ws[s]),
                        _lane_tile(rb["g1"], ws[s]),
                        _lane_tile(rb["beta1"], ws[s]),
                        _banded_weight(rb["w2"], ws[s], ws[s], 1, pad),
                        _lane_tile(rb["b2"], ws[s]),
                        _lane_tile(rb["g2"], ws[s]),
                        _lane_tile(rb["beta2"], ws[s])]
        assert len(ops) == n_wops
        return ops

    @jax.jit
    def forward(x_nchw, operands):
        x3 = jnp.transpose(x_nchw, (0, 2, 3, 1)).astype(jnp.float32)
        x3 = x3.reshape(n, h, w * cin)
        packed = fused_call(x3, *operands)
        skips = [jnp.transpose(packed[s].reshape(n, hs[s], ws[s], cs[s]), (0, 3, 1, 2))
                 for s in range(nst)]
        return skips[-1], skips

    return forward, prepare_operands


# ---------------------------------------------------------------------------
# Pure-JAX (XLA) reference of the same forward, for verification
# ---------------------------------------------------------------------------

def reference_forward(x_nchw, params, padding):
    pad = padding

    def conv(x, w_hwio, b, p):
        y = lax.conv_general_dilated(x, w_hwio, window_strides=(1, 1),
                                     padding=[(p, p), (p, p)],
                                     dimension_numbers=("NHWC", "HWIO", "NHWC"))
        return y + b

    def bn_relu(x, g, be, eps=1e-5):
        mean = jnp.mean(x, axis=(0, 1, 2))
        var = jnp.var(x, axis=(0, 1, 2))
        return jax.nn.relu((x - mean) * (g / jnp.sqrt(var + eps)) + be)

    def pool(x):
        return lax.reduce_window(x, -jnp.inf, lax.max, (1, 2, 2, 1), (1, 2, 2, 1), "VALID")

    x = jnp.transpose(x_nchw, (0, 2, 3, 1)).astype(jnp.float32)
    x = conv(x, params["stem_w"], params["stem_b"], pad)
    skips = []
    for si, st in enumerate(params["stages"]):
        if si > 0:
            x = pool(x)
            x = conv(x, st["proj_w"], st["proj_b"], 0)
            x = bn_relu(x, st["proj_g"], st["proj_beta"])
        for rb in st["resblocks"]:
            hh = conv(x, rb["w1"], rb["b1"], pad)
            hh = bn_relu(hh, rb["g1"], rb["beta1"])
            x = bn_relu(conv(hh, rb["w2"], rb["b2"], pad) + x, rb["g2"], rb["beta2"])
        skips.append(jnp.transpose(x, (0, 3, 1, 2)))
    return skips[-1], skips


# ---------------------------------------------------------------------------
# Parameters
# ---------------------------------------------------------------------------

def init_params(key, n_features_input, num_hidden_features, kernel_size, n_resblocks):
    def conv_p(k, ksz, cin, cout):
        k1, k2 = jax.random.split(k)
        w = jax.random.normal(k1, (ksz, ksz, cin, cout), jnp.float32) * 0.1
        b = jax.random.normal(k2, (cout,), jnp.float32) * 0.01
        return w, b

    def bn_p(k, c):
        k1, k2 = jax.random.split(k)
        return (1.0 + 0.1 * jax.random.normal(k1, (c,), jnp.float32),
                0.1 * jax.random.normal(k2, (c,), jnp.float32))

    def resblock_p(k, c):
        k1, k2, k3, k4 = jax.random.split(k, 4)
        w1, b1 = conv_p(k1, kernel_size, c, c)
        w2, b2 = conv_p(k2, kernel_size, c, c)
        g1, be1 = bn_p(k3, c)
        g2, be2 = bn_p(k4, c)
        return dict(w1=w1, b1=b1, w2=w2, b2=b2, g1=g1, beta1=be1, g2=g2, beta2=be2)

    keys = iter(jax.random.split(key, 64))
    params = {}
    params["stem_w"], params["stem_b"] = conv_p(next(keys), kernel_size,
                                                n_features_input, num_hidden_features[0])
    stages = []
    nst = len(num_hidden_features)
    for s in range(nst):
        st = {}
        if s > 0:
            cin, cout = num_hidden_features[s - 1], num_hidden_features[s]
            st["proj_w"], st["proj_b"] = conv_p(next(keys), 1, cin, cout)
            st["proj_g"], st["proj_beta"] = bn_p(next(keys), cout)
        st["resblocks"] = ([resblock_p(next(keys), num_hidden_features[s])
                            for _ in range(n_resblocks)] if s < nst - 1 else [])
        stages.append(st)
    params["stages"] = stages
    return params


# ---------------------------------------------------------------------------
# Main
# ---------------------------------------------------------------------------

if __name__ == "__main__":
    key = jax.random.PRNGKey(0)
    kx, kp = jax.random.split(key)

    N, Cin, H, W = 2, 4, 16, 16
    num_hidden_features = [8, 16, 32]
    kernel_size, padding, n_resblocks = 3, 1, 1

    x = jax.random.normal(kx, (N, Cin, H, W), jnp.float32)
    params = init_params(kp, Cin, num_hidden_features, kernel_size, n_resblocks)

    forward, prepare_operands = make_fused_encoder(
        N, Cin, H, W, num_hidden_features, kernel_size, padding, n_resblocks)
    operands = prepare_operands(params)          # built once, outside the jitted forward

    out, skips = forward(x, operands)
    out = jax.block_until_ready(out)
    for sk in skips:
        jax.block_until_ready(sk)

    assert out.shape == (N, num_hidden_features[-1], H // 4, W // 4)
    assert [tuple(sk.shape) for sk in skips] == [
        (N, 8, 16, 16), (N, 16, 8, 8), (N, 32, 4, 4)]
    assert bool(jnp.all(jnp.isfinite(out)))

    # Cross-check against a pure-JAX (XLA) implementation of the same forward.
    # The Pallas path uses bf16 MXU operands, so the check is scale-relative
    # (review item: relative rather than fixed-absolute tolerance).
    ref_out, ref_skips = reference_forward(x, params, padding)
    for got, ref in zip(skips, ref_skips):
        err = float(jnp.max(jnp.abs(got - ref)))
        scale = float(jnp.max(jnp.abs(ref)))
        assert err <= 5e-2 * scale + 5e-2, (
            f"Pallas/XLA mismatch: max abs err {err} (ref scale {scale})")
    print("KERNEL_OK")
</pallas_src>

<mosaic_0001>
module attributes {stable_mosaic.version = 11 : i64} {
  func.func @kernel(%arg0: memref<2x16x64xf32, #tpu.memory_space<vmem>>, %arg1: memref<3x64x128xbf16, #tpu.memory_space<vmem>>, %arg2: memref<1x128xf32, #tpu.memory_space<vmem>>, %arg3: memref<3x128x128xbf16, #tpu.memory_space<vmem>>, %arg4: memref<1x128xf32, #tpu.memory_space<vmem>>, %arg5: memref<1x128xf32, #tpu.memory_space<vmem>>, %arg6: memref<1x128xf32, #tpu.memory_space<vmem>>, %arg7: memref<3x128x128xbf16, #tpu.memory_space<vmem>>, %arg8: memref<1x128xf32, #tpu.memory_space<vmem>>, %arg9: memref<1x128xf32, #tpu.memory_space<vmem>>, %arg10: memref<1x128xf32, #tpu.memory_space<vmem>>, %arg11: memref<1x128x128xbf16, #tpu.memory_space<vmem>>, %arg12: memref<1x128xf32, #tpu.memory_space<vmem>>, %arg13: memref<1x128xf32, #tpu.memory_space<vmem>>, %arg14: memref<1x128xf32, #tpu.memory_space<vmem>>, %arg15: memref<3x128x128xbf16, #tpu.memory_space<vmem>>, %arg16: memref<1x128xf32, #tpu.memory_space<vmem>>, %arg17: memref<1x128xf32, #tpu.memory_space<vmem>>, %arg18: memref<1x128xf32, #tpu.memory_space<vmem>>, %arg19: memref<3x128x128xbf16, #tpu.memory_space<vmem>>, %arg20: memref<1x128xf32, #tpu.memory_space<vmem>>, %arg21: memref<1x128xf32, #tpu.memory_space<vmem>>, %arg22: memref<1x128xf32, #tpu.memory_space<vmem>>, %arg23: memref<1x128x128xbf16, #tpu.memory_space<vmem>>, %arg24: memref<1x128xf32, #tpu.memory_space<vmem>>, %arg25: memref<1x128xf32, #tpu.memory_space<vmem>>, %arg26: memref<1x128xf32, #tpu.memory_space<vmem>>, %arg27: memref<2x16x128xf32, #tpu.memory_space<vmem>>, %arg28: memref<2x8x128xf32, #tpu.memory_space<vmem>>, %arg29: memref<2x4x128xf32, #tpu.memory_space<vmem>>, %arg30: memref<2x18x64xf32, #tpu.memory_space<vmem>>, %arg31: memref<2x18x128xf32, #tpu.memory_space<vmem>>, %arg32: memref<2x18x128xf32, #tpu.memory_space<vmem>>, %arg33: memref<2x10x128xf32, #tpu.memory_space<vmem>>, %arg34: memref<2x10x128xf32, #tpu.memory_space<vmem>>, %arg35: memref<2x8x128xf32, #tpu.memory_space<vmem>>, %arg36: memref<2x4x128xf32, #tpu.memory_space<vmem>>) attributes {dimension_semantics = [], scalar_prefetch = 0 : i64, scratch_operands = 7 : i64, tpu.core_type = #tpu.core_type<tc>} {
    %cst = arith.constant 0.000000e+00 : f32
    %0 = vector.broadcast %cst : f32 to vector<1x64xf32>
    %c0 = arith.constant 0 : index
    %c0_0 = arith.constant 0 : index
    %c0_1 = arith.constant 0 : index
    %1 = vector.load %arg30[%c0, %c0_0, %c0_1] : memref<2x18x64xf32, #tpu.memory_space<vmem>>, vector<1x1x64xf32>
    %2 = vector.shape_cast %1 : vector<1x1x64xf32> to vector<1x64xf32>
    %3 = vector.shape_cast %0 : vector<1x64xf32> to vector<1x1x64xf32>
    tpu.vector_store %arg30[%c0, %c0_0, %c0_1], %3 {strides = array<i32>} : memref<2x18x64xf32, #tpu.memory_space<vmem>>, vector<1x1x64xf32>,
    %c0_2 = arith.constant 0 : index
    %c17 = arith.constant 17 : index
    %c0_3 = arith.constant 0 : index
    %4 = vector.load %arg30[%c0_2, %c17, %c0_3] : memref<2x18x64xf32, #tpu.memory_space<vmem>>, vector<1x1x64xf32>
    %5 = vector.shape_cast %4 : vector<1x1x64xf32> to vector<1x64xf32>
    %6 = vector.shape_cast %0 : vector<1x64xf32> to vector<1x1x64xf32>
    tpu.vector_store %arg30[%c0_2, %c17, %c0_3], %6 {strides = array<i32>} : memref<2x18x64xf32, #tpu.memory_space<vmem>>, vector<1x1x64xf32>,
    %c1 = arith.constant 1 : index
    %c0_4 = arith.constant 0 : index
    %c0_5 = arith.constant 0 : index
    %7 = vector.load %arg30[%c1, %c0_4, %c0_5] : memref<2x18x64xf32, #tpu.memory_space<vmem>>, vector<1x1x64xf32>
    %8 = vector.shape_cast %7 : vector<1x1x64xf32> to vector<1x64xf32>
    %9 = vector.shape_cast %0 : vector<1x64xf32> to vector<1x1x64xf32>
    tpu.vector_store %arg30[%c1, %c0_4, %c0_5], %9 {strides = array<i32>} : memref<2x18x64xf32, #tpu.memory_space<vmem>>, vector<1x1x64xf32>,
    %c1_6 = arith.constant 1 : index
    %c17_7 = arith.constant 17 : index
    %c0_8 = arith.constant 0 : index
    %10 = vector.load %arg30[%c1_6, %c17_7, %c0_8] : memref<2x18x64xf32, #tpu.memory_space<vmem>>, vector<1x1x64xf32>
    %11 = vector.shape_cast %10 : vector<1x1x64xf32> to vector<1x64xf32>
    %12 = vector.shape_cast %0 : vector<1x64xf32> to vector<1x1x64xf32>
    tpu.vector_store %arg30[%c1_6, %c17_7, %c0_8], %12 {strides = array<i32>} : memref<2x18x64xf32, #tpu.memory_space<vmem>>, vector<1x1x64xf32>,
    %cst_9 = arith.constant 0.000000e+00 : f32
    %13 = vector.broadcast %cst_9 : f32 to vector<1x128xf32>
    %c0_10 = arith.constant 0 : index
    %c0_11 = arith.constant 0 : index
    %c0_12 = arith.constant 0 : index
    %14 = vector.load %arg31[%c0_10, %c0_11, %c0_12] : memref<2x18x128xf32, #tpu.memory_space<vmem>>, vector<1x1x128xf32>
    %15 = vector.shape_cast %14 : vector<1x1x128xf32> to vector<1x128xf32>
    %16 = vector.shape_cast %13 : vector<1x128xf32> to vector<1x1x128xf32>
    tpu.vector_store %arg31[%c0_10, %c0_11, %c0_12], %16 {strides = array<i32>} : memref<2x18x128xf32, #tpu.memory_space<vmem>>, vector<1x1x128xf32>,
    %c0_13 = arith.constant 0 : index
    %c17_14 = arith.constant 17 : index
    %c0_15 = arith.constant 0 : index
    %17 = vector.load %arg31[%c0_13, %c17_14, %c0_15] : memref<2x18x128xf32, #tpu.memory_space<vmem>>, vector<1x1x128xf32>
    %18 = vector.shape_cast %17 : vector<1x1x128xf32> to vector<1x128xf32>
    %19 = vector.shape_cast %13 : vector<1x128xf32> to vector<1x1x128xf32>
    tpu.vector_store %arg31[%c0_13, %c17_14, %c0_15], %19 {strides = array<i32>} : memref<2x18x128xf32, #tpu.memory_space<vmem>>, vector<1x1x128xf32>,
    %c1_16 = arith.constant 1 : index
    %c0_17 = arith.constant 0 : index
    %c0_18 = arith.constant 0 : index
    %20 = vector.load %arg31[%c1_16, %c0_17, %c0_18] : memref<2x18x128xf32, #tpu.memory_space<vmem>>, vector<1x1x128xf32>
    %21 = vector.shape_cast %20 : vector<1x1x128xf32> to vector<1x128xf32>
    %22 = vector.shape_cast %13 : vector<1x128xf32> to vector<1x1x128xf32>
    tpu.vector_store %arg31[%c1_16, %c0_17, %c0_18], %22 {strides = array<i32>} : memref<2x18x128xf32, #tpu.memory_space<vmem>>, vector<1x1x128xf32>,
    %c1_19 = arith.constant 1 : index
    %c17_20 = arith.constant 17 : index
    %c0_21 = arith.constant 0 : index
    %23 = vector.load %arg31[%c1_19, %c17_20, %c0_21] : memref<2x18x128xf32, #tpu.memory_space<vmem>>, vector<1x1x128xf32>
    %24 = vector.shape_cast %23 : vector<1x1x128xf32> to vector<1x128xf32>
    %25 = vector.shape_cast %13 : vector<1x128xf32> to vector<1x1x128xf32>
    tpu.vector_store %arg31[%c1_19, %c17_20, %c0_21], %25 {strides = array<i32>} : memref<2x18x128xf32, #tpu.memory_space<vmem>>, vector<1x1x128xf32>,
    %cst_22 = arith.constant 0.000000e+00 : f32
    %26 = vector.broadcast %cst_22 : f32 to vector<1x128xf32>
    %c0_23 = arith.constant 0 : index
    %c0_24 = arith.constant 0 : index
    %c0_25 = arith.constant 0 : index
    %27 = vector.load %arg33[%c0_23, %c0_24, %c0_25] : memref<2x10x128xf32, #tpu.memory_space<vmem>>, vector<1x1x128xf32>
    %28 = vector.shape_cast %27 : vector<1x1x128xf32> to vector<1x128xf32>
    %29 = vector.shape_cast %26 : vector<1x128xf32> to vector<1x1x128xf32>
    tpu.vector_store %arg33[%c0_23, %c0_24, %c0_25], %29 {strides = array<i32>} : memref<2x10x128xf32, #tpu.memory_space<vmem>>, vector<1x1x128xf32>,
    %c0_26 = arith.constant 0 : index
    %c9 = arith.constant 9 : index
    %c0_27 = arith.constant 0 : index
    %30 = vector.load %arg33[%c0_26, %c9, %c0_27] : memref<2x10x128xf32, #tpu.memory_space<vmem>>, vector<1x1x128xf32>
    %31 = vector.shape_cast %30 : vector<1x1x128xf32> to vector<1x128xf32>
    %32 = vector.shape_cast %26 : vector<1x128xf32> to vector<1x1x128xf32>
    tpu.vector_store %arg33[%c0_26, %c9, %c0_27], %32 {strides = array<i32>} : memref<2x10x128xf32, #tpu.memory_space<vmem>>, vector<1x1x128xf32>,
    %c1_28 = arith.constant 1 : index
    %c0_29 = arith.constant 0 : index
    %c0_30 = arith.constant 0 : index
    %33 = vector.load %arg33[%c1_28, %c0_29, %c0_30] : memref<2x10x128xf32, #tpu.memory_space<vmem>>, vector<1x1x128xf32>
    %34 = vector.shape_cast %33 : vector<1x1x128xf32> to vector<1x128xf32>
    %35 = vector.shape_cast %26 : vector<1x128xf32> to vector<1x1x128xf32>
    tpu.vector_store %arg33[%c1_28, %c0_29, %c0_30], %35 {strides = array<i32>} : memref<2x10x128xf32, #tpu.memory_space<vmem>>, vector<1x1x128xf32>,
    %c1_31 = arith.constant 1 : index
    %c9_32 = arith.constant 9 : index
    %c0_33 = arith.constant 0 : index
    %36 = vector.load %arg33[%c1_31, %c9_32, %c0_33] : memref<2x10x128xf32, #tpu.memory_space<vmem>>, vector<1x1x128xf32>
    %37 = vector.shape_cast %36 : vector<1x1x128xf32> to vector<1x128xf32>
    %38 = vector.shape_cast %26 : vector<1x128xf32> to vector<1x1x128xf32>
    tpu.vector_store %arg33[%c1_31, %c9_32, %c0_33], %38 {strides = array<i32>} : memref<2x10x128xf32, #tpu.memory_space<vmem>>, vector<1x1x128xf32>,
    %cst_34 = arith.constant 0.000000e+00 : f32
    %39 = vector.broadcast %cst_34 : f32 to vector<1x128xf32>
    %c0_35 = arith.constant 0 : index
    %c0_36 = arith.constant 0 : index
    %c0_37 = arith.constant 0 : index
    %40 = vector.load %arg32[%c0_35, %c0_36, %c0_37] : memref<2x18x128xf32, #tpu.memory_space<vmem>>, vector<1x1x128xf32>
    %41 = vector.shape_cast %40 : vector<1x1x128xf32> to vector<1x128xf32>
    %42 = vector.shape_cast %39 : vector<1x128xf32> to vector<1x1x128xf32>
    tpu.vector_store %arg32[%c0_35, %c0_36, %c0_37], %42 {strides = array<i32>} : memref<2x18x128xf32, #tpu.memory_space<vmem>>, vector<1x1x128xf32>,
    %c0_38 = arith.constant 0 : index
    %c17_39 = arith.constant 17 : index
    %c0_40 = arith.constant 0 : index
    %43 = vector.load %arg32[%c0_38, %c17_39, %c0_40] : memref<2x18x128xf32, #tpu.memory_space<vmem>>, vector<1x1x128xf32>
    %44 = vector.shape_cast %43 : vector<1x1x128xf32> to vector<1x128xf32>
    %45 = vector.shape_cast %39 : vector<1x128xf32> to vector<1x1x128xf32>
    tpu.vector_store %arg32[%c0_38, %c17_39, %c0_40], %45 {strides = array<i32>} : memref<2x18x128xf32, #tpu.memory_space<vmem>>, vector<1x1x128xf32>,
    %c1_41 = arith.constant 1 : index
    %c0_42 = arith.constant 0 : index
    %c0_43 = arith.constant 0 : index
    %46 = vector.load %arg32[%c1_41, %c0_42, %c0_43] : memref<2x18x128xf32, #tpu.memory_space<vmem>>, vector<1x1x128xf32>
    %47 = vector.shape_cast %46 : vector<1x1x128xf32> to vector<1x128xf32>
    %48 = vector.shape_cast %39 : vector<1x128xf32> to vector<1x1x128xf32>
    tpu.vector_store %arg32[%c1_41, %c0_42, %c0_43], %48 {strides = array<i32>} : memref<2x18x128xf32, #tpu.memory_space<vmem>>, vector<1x1x128xf32>,
    %c1_44 = arith.constant 1 : index
    %c17_45 = arith.constant 17 : index
    %c0_46 = arith.constant 0 : index
    %49 = vector.load %arg32[%c1_44, %c17_45, %c0_46] : memref<2x18x128xf32, #tpu.memory_space<vmem>>, vector<1x1x128xf32>
    %50 = vector.shape_cast %49 : vector<1x1x128xf32> to vector<1x128xf32>
    %51 = vector.shape_cast %39 : vector<1x128xf32> to vector<1x1x128xf32>
    tpu.vector_store %arg32[%c1_44, %c17_45, %c0_46], %51 {strides = array<i32>} : memref<2x18x128xf32, #tpu.memory_space<vmem>>, vector<1x1x128xf32>,
    %cst_47 = arith.constant 0.000000e+00 : f32
    %52 = vector.broadcast %cst_47 : f32 to vector<1x128xf32>
    %c0_48 = arith.constant 0 : index
    %c0_49 = arith.constant 0 : index
    %c0_50 = arith.constant 0 : index
    %53 = vector.load %arg34[%c0_48, %c0_49, %c0_50] : memref<2x10x128xf32, #tpu.memory_space<vmem>>, vector<1x1x128xf32>
    %54 = vector.shape_cast %53 : vector<1x1x128xf32> to vector<1x128xf32>
    %55 = vector.shape_cast %52 : vector<1x128xf32> to vector<1x1x128xf32>
    tpu.vector_store %arg34[%c0_48, %c0_49, %c0_50], %55 {strides = array<i32>} : memref<2x10x128xf32, #tpu.memory_space<vmem>>, vector<1x1x128xf32>,
    %c0_51 = arith.constant 0 : index
    %c9_52 = arith.constant 9 : index
    %c0_53 = arith.constant 0 : index
    %56 = vector.load %arg34[%c0_51, %c9_52, %c0_53] : memref<2x10x128xf32, #tpu.memory_space<vmem>>, vector<1x1x128xf32>
    %57 = vector.shape_cast %56 : vector<1x1x128xf32> to vector<1x128xf32>
    %58 = vector.shape_cast %52 : vector<1x128xf32> to vector<1x1x128xf32>
    tpu.vector_store %arg34[%c0_51, %c9_52, %c0_53], %58 {strides = array<i32>} : memref<2x10x128xf32, #tpu.memory_space<vmem>>, vector<1x1x128xf32>,
    %c1_54 = arith.constant 1 : index
    %c0_55 = arith.constant 0 : index
    %c0_56 = arith.constant 0 : index
    %59 = vector.load %arg34[%c1_54, %c0_55, %c0_56] : memref<2x10x128xf32, #tpu.memory_space<vmem>>, vector<1x1x128xf32>
    %60 = vector.shape_cast %59 : vector<1x1x128xf32> to vector<1x128xf32>
    %61 = vector.shape_cast %52 : vector<1x128xf32> to vector<1x1x128xf32>
    tpu.vector_store %arg34[%c1_54, %c0_55, %c0_56], %61 {strides = array<i32>} : memref<2x10x128xf32, #tpu.memory_space<vmem>>, vector<1x1x128xf32>,
    %c1_57 = arith.constant 1 : index
    %c9_58 = arith.constant 9 : index
    %c0_59 = arith.constant 0 : index
    %62 = vector.load %arg34[%c1_57, %c9_58, %c0_59] : memref<2x10x128xf32, #tpu.memory_space<vmem>>, vector<1x1x128xf32>
    %63 = vector.shape_cast %62 : vector<1x1x128xf32> to vector<1x128xf32>
    %64 = vector.shape_cast %52 : vector<1x128xf32> to vector<1x1x128xf32>
    tpu.vector_store %arg34[%c1_57, %c9_58, %c0_59], %64 {strides = array<i32>} : memref<2x10x128xf32, #tpu.memory_space<vmem>>, vector<1x1x128xf32>,
    %c0_60 = arith.constant 0 : index
    %c0_61 = arith.constant 0 : index
    %c0_62 = arith.constant 0 : index
    %65 = vector.load %arg0[%c0_60, %c0_61, %c0_62] : memref<2x16x64xf32, #tpu.memory_space<vmem>>, vector<1x16x64xf32>
    %66 = vector.shape_cast %65 : vector<1x16x64xf32> to vector<16x64xf32>
    %c0_63 = arith.constant 0 : index
    %c1_64 = arith.constant 1 : index
    %c0_65 = arith.constant 0 : index
    %67 = vector.load %arg30[%c0_63, %c1_64, %c0_65] : memref<2x18x64xf32, #tpu.memory_space<vmem>>, vector<1x16x64xf32>
    %68 = vector.shape_cast %67 : vector<1x16x64xf32> to vector<16x64xf32>
    %69 = vector.shape_cast %66 : vector<16x64xf32> to vector<1x16x64xf32>
    tpu.vector_store %arg30[%c0_63, %c1_64, %c0_65], %69 {strides = array<i32>} : memref<2x18x64xf32, #tpu.memory_space<vmem>>, vector<1x16x64xf32>,
    %c1_66 = arith.constant 1 : index
    %c0_67 = arith.constant 0 : index
    %c0_68 = arith.constant 0 : index
    %70 = vector.load %arg0[%c1_66, %c0_67, %c0_68] : memref<2x16x64xf32, #tpu.memory_space<vmem>>, vector<1x16x64xf32>
    %71 = vector.shape_cast %70 : vector<1x16x64xf32> to vector<16x64xf32>
    %c1_69 = arith.constant 1 : index
    %c1_70 = arith.constant 1 : index
    %c0_71 = arith.constant 0 : index
    %72 = vector.load %arg30[%c1_69, %c1_70, %c0_71] : memref<2x18x64xf32, #tpu.memory_space<vmem>>, vector<1x16x64xf32>
    %73 = vector.shape_cast %72 : vector<1x16x64xf32> to vector<16x64xf32>
    %74 = vector.shape_cast %71 : vector<16x64xf32> to vector<1x16x64xf32>
    tpu.vector_store %arg30[%c1_69, %c1_70, %c0_71], %74 {strides = array<i32>} : memref<2x18x64xf32, #tpu.memory_space<vmem>>, vector<1x16x64xf32>,
    %c0_72 = arith.constant 0 : index
    %c0_73 = arith.constant 0 : index
    %c0_74 = arith.constant 0 : index
    %75 = vector.load %arg1[%c0_72, %c0_73, %c0_74] : memref<3x64x128xbf16, #tpu.memory_space<vmem>>, vector<1x64x128xbf16>
    %76 = vector.shape_cast %75 : vector<1x64x128xbf16> to vector<64x128xbf16>
    %c1_75 = arith.constant 1 : index
    %c0_76 = arith.constant 0 : index
    %c0_77 = arith.constant 0 : index
    %77 = vector.load %arg1[%c1_75, %c0_76, %c0_77] : memref<3x64x128xbf16, #tpu.memory_space<vmem>>, vector<1x64x128xbf16>
    %78 = vector.shape_cast %77 : vector<1x64x128xbf16> to vector<64x128xbf16>
    %c2 = arith.constant 2 : index
    %c0_78 = arith.constant 0 : index
    %c0_79 = arith.constant 0 : index
    %79 = vector.load %arg1[%c2, %c0_78, %c0_79] : memref<3x64x128xbf16, #tpu.memory_space<vmem>>, vector<1x64x128xbf16>
    %80 = vector.shape_cast %79 : vector<1x64x128xbf16> to vector<64x128xbf16>
    %c0_80 = arith.constant 0 : index
    %c0_81 = arith.constant 0 : index
    %81 = vector.load %arg2[%c0_80, %c0_81] : memref<1x128xf32, #tpu.memory_space<vmem>>, vector<1x128xf32>
    %c0_82 = arith.constant 0 : index
    %c0_83 = arith.constant 0 : index
    %c0_84 = arith.constant 0 : index
    %82 = vector.load %arg30[%c0_82, %c0_83, %c0_84] : memref<2x18x64xf32, #tpu.memory_space<vmem>>, vector<1x16x64xf32>
    %83 = vector.shape_cast %82 : vector<1x16x64xf32> to vector<16x64xf32>
    %84 = arith.truncf %83 : vector<16x64xf32> to vector<16x64xbf16>
    %cst_85 = arith.constant dense<0.000000e+00> : vector<16x128xf32>
    %85 = tpu.matmul %84, %76, %cst_85 {dimension_numbers = #tpu.dot_dimension_numbers<[1], [0], [0], [1], [0, 0, 1, 1], [], []>} : vector<16x64xbf16>, vector<64x128xbf16>, vector<16x128xf32> -> vector<16x128xf32>
    %c0_86 = arith.constant 0 : index
    %c1_87 = arith.constant 1 : index
    %c0_88 = arith.constant 0 : index
    %86 = vector.load %arg30[%c0_86, %c1_87, %c0_88] : memref<2x18x64xf32, #tpu.memory_space<vmem>>, vector<1x16x64xf32>
    %87 = vector.shape_cast %86 : vector<1x16x64xf32> to vector<16x64xf32>
    %88 = arith.truncf %87 : vector<16x64xf32> to vector<16x64xbf16>
    %cst_89 = arith.constant dense<0.000000e+00> : vector<16x128xf32>
    %89 = tpu.matmul %88, %78, %cst_89 {dimension_numbers = #tpu.dot_dimension_numbers<[1], [0], [0], [1], [0, 0, 1, 1], [], []>} : vector<16x64xbf16>, vector<64x128xbf16>, vector<16x128xf32> -> vector<16x128xf32>
    %90 = arith.addf %85, %89 : vector<16x128xf32>
    %c0_90 = arith.constant 0 : index
    %c2_91 = arith.constant 2 : index
    %c0_92 = arith.constant 0 : index
    %91 = vector.load %arg30[%c0_90, %c2_91, %c0_92] : memref<2x18x64xf32, #tpu.memory_space<vmem>>, vector<1x16x64xf32>
    %92 = vector.shape_cast %91 : vector<1x16x64xf32> to vector<16x64xf32>
    %93 = arith.truncf %92 : vector<16x64xf32> to vector<16x64xbf16>
    %cst_93 = arith.constant dense<0.000000e+00> : vector<16x128xf32>
    %94 = tpu.matmul %93, %80, %cst_93 {dimension_numbers = #tpu.dot_dimension_numbers<[1], [0], [0], [1], [0, 0, 1, 1], [], []>} : vector<16x64xbf16>, vector<64x128xbf16>, vector<16x128xf32> -> vector<16x128xf32>
    %95 = arith.addf %90, %94 : vector<16x128xf32>
    %96 = vector.broadcast %81 : vector<1x128xf32> to vector<16x128xf32>
    %97 = arith.addf %95, %96 : vector<16x128xf32>
    %c1_94 = arith.constant 1 : index
    %c0_95 = arith.constant 0 : index
    %c0_96 = arith.constant 0 : index
    %98 = vector.load %arg30[%c1_94, %c0_95, %c0_96] : memref<2x18x64xf32, #tpu.memory_space<vmem>>, vector<1x16x64xf32>
    %99 = vector.shape_cast %98 : vector<1x16x64xf32> to vector<16x64xf32>
    %100 = arith.truncf %99 : vector<16x64xf32> to vector<16x64xbf16>
    %cst_97 = arith.constant dense<0.000000e+00> : vector<16x128xf32>
    %101 = tpu.matmul %100, %76, %cst_97 {dimension_numbers = #tpu.dot_dimension_numbers<[1], [0], [0], [1], [0, 0, 1, 1], [], []>} : vector<16x64xbf16>, vector<64x128xbf16>, vector<16x128xf32> -> vector<16x128xf32>
    %c1_98 = arith.constant 1 : index
    %c1_99 = arith.constant 1 : index
    %c0_100 = arith.constant 0 : index
    %102 = vector.load %arg30[%c1_98, %c1_99, %c0_100] : memref<2x18x64xf32, #tpu.memory_space<vmem>>, vector<1x16x64xf32>
    %103 = vector.shape_cast %102 : vector<1x16x64xf32> to vector<16x64xf32>
    %104 = arith.truncf %103 : vector<16x64xf32> to vector<16x64xbf16>
    %cst_101 = arith.constant dense<0.000000e+00> : vector<16x128xf32>
    %105 = tpu.matmul %104, %78, %cst_101 {dimension_numbers = #tpu.dot_dimension_numbers<[1], [0], [0], [1], [0, 0, 1, 1], [], []>} : vector<16x64xbf16>, vector<64x128xbf16>, vector<16x128xf32> -> vector<16x128xf32>
    %106 = arith.addf %101, %105 : vector<16x128xf32>
    %c1_102 = arith.constant 1 : index
    %c2_103 = arith.constant 2 : index
    %c0_104 = arith.constant 0 : index
    %107 = vector.load %arg30[%c1_102, %c2_103, %c0_104] : memref<2x18x64xf32, #tpu.memory_space<vmem>>, vector<1x16x64xf32>
    %108 = vector.shape_cast %107 : vector<1x16x64xf32> to vector<16x64xf32>
    %109 = arith.truncf %108 : vector<16x64xf32> to vector<16x64xbf16>
    %cst_105 = arith.constant dense<0.000000e+00> : vector<16x128xf32>
    %110 = tpu.matmul %109, %80, %cst_105 {dimension_numbers = #tpu.dot_dimension_numbers<[1], [0], [0], [1], [0, 0, 1, 1], [], []>} : vector<16x64xbf16>, vector<64x128xbf16>, vector<16x128xf32> -> vector<16x128xf32>
    %111 = arith.addf %106, %110 : vector<16x128xf32>
    %112 = vector.broadcast %81 : vector<1x128xf32> to vector<16x128xf32>
    %113 = arith.addf %111, %112 : vector<16x128xf32>
    %c0_106 = arith.constant 0 : index
    %c1_107 = arith.constant 1 : index
    %c0_108 = arith.constant 0 : index
    %114 = vector.load %arg31[%c0_106, %c1_107, %c0_108] : memref<2x18x128xf32, #tpu.memory_space<vmem>>, vector<1x16x128xf32>
    %115 = vector.shape_cast %114 : vector<1x16x128xf32> to vector<16x128xf32>
    %116 = vector.shape_cast %97 : vector<16x128xf32> to vector<1x16x128xf32>
    tpu.vector_store %arg31[%c0_106, %c1_107, %c0_108], %116 {strides = array<i32>} : memref<2x18x128xf32, #tpu.memory_space<vmem>>, vector<1x16x128xf32>,
    %c1_109 = arith.constant 1 : index
    %c1_110 = arith.constant 1 : index
    %c0_111 = arith.constant 0 : index
    %117 = vector.load %arg31[%c1_109, %c1_110, %c0_111] : memref<2x18x128xf32, #tpu.memory_space<vmem>>, vector<1x16x128xf32>
    %118 = vector.shape_cast %117 : vector<1x16x128xf32> to vector<16x128xf32>
    %119 = vector.shape_cast %113 : vector<16x128xf32> to vector<1x16x128xf32>
    tpu.vector_store %arg31[%c1_109, %c1_110, %c0_111], %119 {strides = array<i32>} : memref<2x18x128xf32, #tpu.memory_space<vmem>>, vector<1x16x128xf32>,
    %c0_112 = arith.constant 0 : index
    %c0_113 = arith.constant 0 : index
    %c0_114 = arith.constant 0 : index
    %120 = vector.load %arg3[%c0_112, %c0_113, %c0_114] : memref<3x128x128xbf16, #tpu.memory_space<vmem>>, vector<1x128x128xbf16>
    %121 = vector.shape_cast %120 : vector<1x128x128xbf16> to vector<128x128xbf16>
    %c1_115 = arith.constant 1 : index
    %c0_116 = arith.constant 0 : index
    %c0_117 = arith.constant 0 : index
    %122 = vector.load %arg3[%c1_115, %c0_116, %c0_117] : memref<3x128x128xbf16, #tpu.memory_space<vmem>>, vector<1x128x128xbf16>
    %123 = vector.shape_cast %122 : vector<1x128x128xbf16> to vector<128x128xbf16>
    %c2_118 = arith.constant 2 : index
    %c0_119 = arith.constant 0 : index
    %c0_120 = arith.constant 0 : index
    %124 = vector.load %arg3[%c2_118, %c0_119, %c0_120] : memref<3x128x128xbf16, #tpu.memory_space<vmem>>, vector<1x128x128xbf16>
    %125 = vector.shape_cast %124 : vector<1x128x128xbf16> to vector<128x128xbf16>
    %c0_121 = arith.constant 0 : index
    %c0_122 = arith.constant 0 : index
    %126 = vector.load %arg4[%c0_121, %c0_122] : memref<1x128xf32, #tpu.memory_space<vmem>>, vector<1x128xf32>
    %c0_123 = arith.constant 0 : index
    %c0_124 = arith.constant 0 : index
    %c0_125 = arith.constant 0 : index
    %127 = vector.load %arg31[%c0_123, %c0_124, %c0_125] : memref<2x18x128xf32, #tpu.memory_space<vmem>>, vector<1x16x128xf32>
    %128 = vector.shape_cast %127 : vector<1x16x128xf32> to vector<16x128xf32>
    %129 = arith.truncf %128 : vector<16x128xf32> to vector<16x128xbf16>
    %cst_126 = arith.constant dense<0.000000e+00> : vector<16x128xf32>
    %130 = tpu.matmul %129, %121, %cst_126 {dimension_numbers = #tpu.dot_dimension_numbers<[1], [0], [0], [1], [0, 0, 1, 1], [], []>} : vector<16x128xbf16>, vector<128x128xbf16>, vector<16x128xf32> -> vector<16x128xf32>
    %c0_127 = arith.constant 0 : index
    %c1_128 = arith.constant 1 : index
    %c0_129 = arith.constant 0 : index
    %131 = vector.load %arg31[%c0_127, %c1_128, %c0_129] : memref<2x18x128xf32, #tpu.memory_space<vmem>>, vector<1x16x128xf32>
    %132 = vector.shape_cast %131 : vector<1x16x128xf32> to vector<16x128xf32>
    %133 = arith.truncf %132 : vector<16x128xf32> to vector<16x128xbf16>
    %cst_130 = arith.constant dense<0.000000e+00> : vector<16x128xf32>
    %134 = tpu.matmul %133, %123, %cst_130 {dimension_numbers = #tpu.dot_dimension_numbers<[1], [0], [0], [1], [0, 0, 1, 1], [], []>} : vector<16x128xbf16>, vector<128x128xbf16>, vector<16x128xf32> -> vector<16x128xf32>
    %135 = arith.addf %130, %134 : vector<16x128xf32>
    %c0_131 = arith.constant 0 : index
    %c2_132 = arith.constant 2 : index
    %c0_133 = arith.constant 0 : index
    %136 = vector.load %arg31[%c0_131, %c2_132, %c0_133] : memref<2x18x128xf32, #tpu.memory_space<vmem>>, vector<1x16x128xf32>
    %137 = vector.shape_cast %136 : vector<1x16x128xf32> to vector<16x128xf32>
    %138 = arith.truncf %137 : vector<16x128xf32> to vector<16x128xbf16>
    %cst_134 = arith.constant dense<0.000000e+00> : vector<16x128xf32>
    %139 = tpu.matmul %138, %125, %cst_134 {dimension_numbers = #tpu.dot_dimension_numbers<[1], [0], [0], [1], [0, 0, 1, 1], [], []>} : vector<16x128xbf16>, vector<128x128xbf16>, vector<16x128xf32> -> vector<16x128xf32>
    %140 = arith.addf %135, %139 : vector<16x128xf32>
    %141 = vector.broadcast %126 : vector<1x128xf32> to vector<16x128xf32>
    %142 = arith.addf %140, %141 : vector<16x128xf32>
    %c1_135 = arith.constant 1 : index
    %c0_136 = arith.constant 0 : index
    %c0_137 = arith.constant 0 : index
    %143 = vector.load %arg31[%c1_135, %c0_136, %c0_137] : memref<2x18x128xf32, #tpu.memory_space<vmem>>, vector<1x16x128xf32>
    %144 = vector.shape_cast %143 : vector<1x16x128xf32> to vector<16x128xf32>
    %145 = arith.truncf %144 : vector<16x128xf32> to vector<16x128xbf16>
    %cst_138 = arith.constant dense<0.000000e+00> : vector<16x128xf32>
    %146 = tpu.matmul %145, %121, %cst_138 {dimension_numbers = #tpu.dot_dimension_numbers<[1], [0], [0], [1], [0, 0, 1, 1], [], []>} : vector<16x128xbf16>, vector<128x128xbf16>, vector<16x128xf32> -> vector<16x128xf32>
    %c1_139 = arith.constant 1 : index
    %c1_140 = arith.constant 1 : index
    %c0_141 = arith.constant 0 : index
    %147 = vector.load %arg31[%c1_139, %c1_140, %c0_141] : memref<2x18x128xf32, #tpu.memory_space<vmem>>, vector<1x16x128xf32>
    %148 = vector.shape_cast %147 : vector<1x16x128xf32> to vector<16x128xf32>
    %149 = arith.truncf %148 : vector<16x128xf32> to vector<16x128xbf16>
    %cst_142 = arith.constant dense<0.000000e+00> : vector<16x128xf32>
    %150 = tpu.matmul %149, %123, %cst_142 {dimension_numbers = #tpu.dot_dimension_numbers<[1], [0], [0], [1], [0, 0, 1, 1], [], []>} : vector<16x128xbf16>, vector<128x128xbf16>, vector<16x128xf32> -> vector<16x128xf32>
    %151 = arith.addf %146, %150 : vector<16x128xf32>
    %c1_143 = arith.constant 1 : index
    %c2_144 = arith.constant 2 : index
    %c0_145 = arith.constant 0 : index
    %152 = vector.load %arg31[%c1_143, %c2_144, %c0_145] : memref<2x18x128xf32, #tpu.memory_space<vmem>>, vector<1x16x128xf32>
    %153 = vector.shape_cast %152 : vector<1x16x128xf32> to vector<16x128xf32>
    %154 = arith.truncf %153 : vector<16x128xf32> to vector<16x128xbf16>
    %cst_146 = arith.constant dense<0.000000e+00> : vector<16x128xf32>
    %155 = tpu.matmul %154, %125, %cst_146 {dimension_numbers = #tpu.dot_dimension_numbers<[1], [0], [0], [1], [0, 0, 1, 1], [], []>} : vector<16x128xbf16>, vector<128x128xbf16>, vector<16x128xf32> -> vector<16x128xf32>
    %156 = arith.addf %151, %155 : vector<16x128xf32>
    %157 = vector.broadcast %126 : vector<1x128xf32> to vector<16x128xf32>
    %158 = arith.addf %156, %157 : vector<16x128xf32>
    %cst_147 = arith.constant 0.000000e+00 : f32
    %159 = vector.broadcast %cst_147 : f32 to vector<1x128xf32>
    %cst_148 = arith.constant 0.000000e+00 : f32
    %160 = vector.broadcast %cst_148 : f32 to vector<1x128xf32>
    %cst_149 = arith.constant dense<0.000000e+00> : vector<128xf32>
    %161 = vector.multi_reduction <add>, %142, %cst_149 [0] : vector<16x128xf32> to vector<128xf32>
    %162 = vector.shape_cast %161 : vector<128xf32> to vector<1x128xf32>
    %163 = arith.addf %159, %162 : vector<1x128xf32>
    %164 = arith.mulf %142, %142 : vector<16x128xf32>
    %cst_150 = arith.constant dense<0.000000e+00> : vector<128xf32>
    %165 = vector.multi_reduction <add>, %164, %cst_150 [0] : vector<16x128xf32> to vector<128xf32>
    %166 = vector.shape_cast %165 : vector<128xf32> to vector<1x128xf32>
    %167 = arith.addf %160, %166 : vector<1x128xf32>
    %cst_151 = arith.constant dense<0.000000e+00> : vector<128xf32>
    %168 = vector.multi_reduction <add>, %158, %cst_151 [0] : vector<16x128xf32> to vector<128xf32>
    %169 = vector.shape_cast %168 : vector<128xf32> to vector<1x128xf32>
    %170 = arith.addf %163, %169 : vector<1x128xf32>
    %171 = arith.mulf %158, %158 : vector<16x128xf32>
    %cst_152 = arith.constant dense<0.000000e+00> : vector<128xf32>
    %172 = vector.multi_reduction <add>, %171, %cst_152 [0] : vector<16x128xf32> to vector<128xf32>
    %173 = vector.shape_cast %172 : vector<128xf32> to vector<1x128xf32>
    %174 = arith.addf %167, %173 : vector<1x128xf32>
    %c8_i32 = arith.constant 8 : i32
    %175 = tpu.dynamic_rotate %170 by %c8_i32 dim 1 : vector<1x128xf32>, i32 -> vector<1x128xf32>
    %176 = arith.addf %170, %175 : vector<1x128xf32>
    %c8_i32_153 = arith.constant 8 : i32
    %177 = tpu.dynamic_rotate %174 by %c8_i32_153 dim 1 : vector<1x128xf32>, i32 -> vector<1x128xf32>
    %178 = arith.addf %174, %177 : vector<1x128xf32>
    %c16_i32 = arith.constant 16 : i32
    %179 = tpu.dynamic_rotate %176 by %c16_i32 dim 1 : vector<1x128xf32>, i32 -> vector<1x128xf32>
    %180 = arith.addf %176, %179 : vector<1x128xf32>
    %c16_i32_154 = arith.constant 16 : i32
    %181 = tpu.dynamic_rotate %178 by %c16_i32_154 dim 1 : vector<1x128xf32>, i32 -> vector<1x128xf32>
    %182 = arith.addf %178, %181 : vector<1x128xf32>
    %c32_i32 = arith.constant 32 : i32
    %183 = tpu.dynamic_rotate %180 by %c32_i32 dim 1 : vector<1x128xf32>, i32 -> vector<1x128xf32>
    %184 = arith.addf %180, %183 : vector<1x128xf32>
    %c32_i32_155 = arith.constant 32 : i32
    %185 = tpu.dynamic_rotate %182 by %c32_i32_155 dim 1 : vector<1x128xf32>, i32 -> vector<1x128xf32>
    %186 = arith.addf %182, %185 : vector<1x128xf32>
    %c64_i32 = arith.constant 64 : i32
    %187 = tpu.dynamic_rotate %184 by %c64_i32 dim 1 : vector<1x128xf32>, i32 -> vector<1x128xf32>
    %188 = arith.addf %184, %187 : vector<1x128xf32>
    %c64_i32_156 = arith.constant 64 : i32
    %189 = tpu.dynamic_rotate %186 by %c64_i32_156 dim 1 : vector<1x128xf32>, i32 -> vector<1x128xf32>
    %190 = arith.addf %186, %189 : vector<1x128xf32>
    %cst_157 = arith.constant 0.001953125 : f32
    %191 = vector.broadcast %cst_157 : f32 to vector<1x128xf32>
    %192 = arith.mulf %188, %191 : vector<1x128xf32>
    %cst_158 = arith.constant 0.001953125 : f32
    %193 = vector.broadcast %cst_158 : f32 to vector<1x128xf32>
    %194 = arith.mulf %190, %193 : vector<1x128xf32>
    %195 = arith.mulf %192, %192 : vector<1x128xf32>
    %196 = arith.subf %194, %195 : vector<1x128xf32>
    %cst_159 = arith.constant 0.000000e+00 : f32
    %197 = vector.broadcast %cst_159 : f32 to vector<1x128xf32>
    %198 = arith.maximumf %196, %197 : vector<1x128xf32>
    %c0_160 = arith.constant 0 : index
    %c0_161 = arith.constant 0 : index
    %199 = vector.load %arg5[%c0_160, %c0_161] : memref<1x128xf32, #tpu.memory_space<vmem>>, vector<1x128xf32>
    %cst_162 = arith.constant 9.99999974E-6 : f32
    %200 = vector.broadcast %cst_162 : f32 to vector<1x128xf32>
    %201 = arith.addf %198, %200 : vector<1x128xf32>
    %202 = math.rsqrt %201 : vector<1x128xf32>
    %203 = arith.mulf %199, %202 : vector<1x128xf32>
    %c0_163 = arith.constant 0 : index
    %c0_164 = arith.constant 0 : index
    %204 = vector.load %arg6[%c0_163, %c0_164] : memref<1x128xf32, #tpu.memory_space<vmem>>, vector<1x128xf32>
    %205 = arith.mulf %192, %203 : vector<1x128xf32>
    %206 = arith.subf %204, %205 : vector<1x128xf32>
    %207 = vector.broadcast %203 : vector<1x128xf32> to vector<16x128xf32>
    %208 = arith.mulf %142, %207 : vector<16x128xf32>
    %209 = vector.broadcast %206 : vector<1x128xf32> to vector<16x128xf32>
    %210 = arith.addf %208, %209 : vector<16x128xf32>
    %cst_165 = arith.constant 0.000000e+00 : f32
    %211 = vector.broadcast %cst_165 : f32 to vector<16x128xf32>
    %212 = arith.maximumf %210, %211 : vector<16x128xf32>
    %213 = vector.broadcast %203 : vector<1x128xf32> to vector<16x128xf32>
    %214 = arith.mulf %158, %213 : vector<16x128xf32>
    %215 = vector.broadcast %206 : vector<1x128xf32> to vector<16x128xf32>
    %216 = arith.addf %214, %215 : vector<16x128xf32>
    %cst_166 = arith.constant 0.000000e+00 : f32
    %217 = vector.broadcast %cst_166 : f32 to vector<16x128xf32>
    %218 = arith.maximumf %216, %217 : vector<16x128xf32>
    %c0_167 = arith.constant 0 : index
    %c1_168 = arith.constant 1 : index
    %c0_169 = arith.constant 0 : index
    %219 = vector.load %arg32[%c0_167, %c1_168, %c0_169] : memref<2x18x128xf32, #tpu.memory_space<vmem>>, vector<1x16x128xf32>
    %220 = vector.shape_cast %219 : vector<1x16x128xf32> to vector<16x128xf32>
    %221 = vector.shape_cast %212 : vector<16x128xf32> to vector<1x16x128xf32>
    tpu.vector_store %arg32[%c0_167, %c1_168, %c0_169], %221 {strides = array<i32>} : memref<2x18x128xf32, #tpu.memory_space<vmem>>, vector<1x16x128xf32>,
    %c1_170 = arith.constant 1 : index
    %c1_171 = arith.constant 1 : index
    %c0_172 = arith.constant 0 : index
    %222 = vector.load %arg32[%c1_170, %c1_171, %c0_172] : memref<2x18x128xf32, #tpu.memory_space<vmem>>, vector<1x16x128xf32>
    %223 = vector.shape_cast %222 : vector<1x16x128xf32> to vector<16x128xf32>
    %224 = vector.shape_cast %218 : vector<16x128xf32> to vector<1x16x128xf32>
    tpu.vector_store %arg32[%c1_170, %c1_171, %c0_172], %224 {strides = array<i32>} : memref<2x18x128xf32, #tpu.memory_space<vmem>>, vector<1x16x128xf32>,
    %c0_173 = arith.constant 0 : index
    %c0_174 = arith.constant 0 : index
    %c0_175 = arith.constant 0 : index
    %225 = vector.load %arg7[%c0_173, %c0_174, %c0_175] : memref<3x128x128xbf16, #tpu.memory_space<vmem>>, vector<1x128x128xbf16>
    %226 = vector.shape_cast %225 : vector<1x128x128xbf16> to vector<128x128xbf16>
    %c1_176 = arith.constant 1 : index
    %c0_177 = arith.constant 0 : index
    %c0_178 = arith.constant 0 : index
    %227 = vector.load %arg7[%c1_176, %c0_177, %c0_178] : memref<3x128x128xbf16, #tpu.memory_space<vmem>>, vector<1x128x128xbf16>
    %228 = vector.shape_cast %227 : vector<1x128x128xbf16> to vector<128x128xbf16>
    %c2_179 = arith.constant 2 : index
    %c0_180 = arith.constant 0 : index
    %c0_181 = arith.constant 0 : index
    %229 = vector.load %arg7[%c2_179, %c0_180, %c0_181] : memref<3x128x128xbf16, #tpu.memory_space<vmem>>, vector<1x128x128xbf16>
    %230 = vector.shape_cast %229 : vector<1x128x128xbf16> to vector<128x128xbf16>
    %c0_182 = arith.constant 0 : index
    %c0_183 = arith.constant 0 : index
    %231 = vector.load %arg8[%c0_182, %c0_183] : memref<1x128xf32, #tpu.memory_space<vmem>>, vector<1x128xf32>
    %c0_184 = arith.constant 0 : index
    %c0_185 = arith.constant 0 : index
    %c0_186 = arith.constant 0 : index
    %232 = vector.load %arg32[%c0_184, %c0_185, %c0_186] : memref<2x18x128xf32, #tpu.memory_space<vmem>>, vector<1x16x128xf32>
    %233 = vector.shape_cast %232 : vector<1x16x128xf32> to vector<16x128xf32>
    %234 = arith.truncf %233 : vector<16x128xf32> to vector<16x128xbf16>
    %cst_187 = arith.constant dense<0.000000e+00> : vector<16x128xf32>
    %235 = tpu.matmul %234, %226, %cst_187 {dimension_numbers = #tpu.dot_dimension_numbers<[1], [0], [0], [1], [0, 0, 1, 1], [], []>} : vector<16x128xbf16>, vector<128x128xbf16>, vector<16x128xf32> -> vector<16x128xf32>
    %c0_188 = arith.constant 0 : index
    %c1_189 = arith.constant 1 : index
    %c0_190 = arith.constant 0 : index
    %236 = vector.load %arg32[%c0_188, %c1_189, %c0_190] : memref<2x18x128xf32, #tpu.memory_space<vmem>>, vector<1x16x128xf32>
    %237 = vector.shape_cast %236 : vector<1x16x128xf32> to vector<16x128xf32>
    %238 = arith.truncf %237 : vector<16x128xf32> to vector<16x128xbf16>
    %cst_191 = arith.constant dense<0.000000e+00> : vector<16x128xf32>
    %239 = tpu.matmul %238, %228, %cst_191 {dimension_numbers = #tpu.dot_dimension_numbers<[1], [0], [0], [1], [0, 0, 1, 1], [], []>} : vector<16x128xbf16>, vector<128x128xbf16>, vector<16x128xf32> -> vector<16x128xf32>
    %240 = arith.addf %235, %239 : vector<16x128xf32>
    %c0_192 = arith.constant 0 : index
    %c2_193 = arith.constant 2 : index
    %c0_194 = arith.constant 0 : index
    %241 = vector.load %arg32[%c0_192, %c2_193, %c0_194] : memref<2x18x128xf32, #tpu.memory_space<vmem>>, vector<1x16x128xf32>
    %242 = vector.shape_cast %241 : vector<1x16x128xf32> to vector<16x128xf32>
    %243 = arith.truncf %242 : vector<16x128xf32> to vector<16x128xbf16>
    %cst_195 = arith.constant dense<0.000000e+00> : vector<16x128xf32>
    %244 = tpu.matmul %243, %230, %cst_195 {dimension_numbers = #tpu.dot_dimension_numbers<[1], [0], [0], [1], [0, 0, 1, 1], [], []>} : vector<16x128xbf16>, vector<128x128xbf16>, vector<16x128xf32> -> vector<16x128xf32>
    %245 = arith.addf %240, %244 : vector<16x128xf32>
    %246 = vector.broadcast %231 : vector<1x128xf32> to vector<16x128xf32>
    %247 = arith.addf %245, %246 : vector<16x128xf32>
    %c1_196 = arith.constant 1 : index
    %c0_197 = arith.constant 0 : index
    %c0_198 = arith.constant 0 : index
    %248 = vector.load %arg32[%c1_196, %c0_197, %c0_198] : memref<2x18x128xf32, #tpu.memory_space<vmem>>, vector<1x16x128xf32>
    %249 = vector.shape_cast %248 : vector<1x16x128xf32> to vector<16x128xf32>
    %250 = arith.truncf %249 : vector<16x128xf32> to vector<16x128xbf16>
    %cst_199 = arith.constant dense<0.000000e+00> : vector<16x128xf32>
    %251 = tpu.matmul %250, %226, %cst_199 {dimension_numbers = #tpu.dot_dimension_numbers<[1], [0], [0], [1], [0, 0, 1, 1], [], []>} : vector<16x128xbf16>, vector<128x128xbf16>, vector<16x128xf32> -> vector<16x128xf32>
    %c1_200 = arith.constant 1 : index
    %c1_201 = arith.constant 1 : index
    %c0_202 = arith.constant 0 : index
    %252 = vector.load %arg32[%c1_200, %c1_201, %c0_202] : memref<2x18x128xf32, #tpu.memory_space<vmem>>, vector<1x16x128xf32>
    %253 = vector.shape_cast %252 : vector<1x16x128xf32> to vector<16x128xf32>
    %254 = arith.truncf %253 : vector<16x128xf32> to vector<16x128xbf16>
    %cst_203 = arith.constant dense<0.000000e+00> : vector<16x128xf32>
    %255 = tpu.matmul %254, %228, %cst_203 {dimension_numbers = #tpu.dot_dimension_numbers<[1], [0], [0], [1], [0, 0, 1, 1], [], []>} : vector<16x128xbf16>, vector<128x128xbf16>, vector<16x128xf32> -> vector<16x128xf32>
    %256 = arith.addf %251, %255 : vector<16x128xf32>
    %c1_204 = arith.constant 1 : index
    %c2_205 = arith.constant 2 : index
    %c0_206 = arith.constant 0 : index
    %257 = vector.load %arg32[%c1_204, %c2_205, %c0_206] : memref<2x18x128xf32, #tpu.memory_space<vmem>>, vector<1x16x128xf32>
    %258 = vector.shape_cast %257 : vector<1x16x128xf32> to vector<16x128xf32>
    %259 = arith.truncf %258 : vector<16x128xf32> to vector<16x128xbf16>
    %cst_207 = arith.constant dense<0.000000e+00> : vector<16x128xf32>
    %260 = tpu.matmul %259, %230, %cst_207 {dimension_numbers = #tpu.dot_dimension_numbers<[1], [0], [0], [1], [0, 0, 1, 1], [], []>} : vector<16x128xbf16>, vector<128x128xbf16>, vector<16x128xf32> -> vector<16x128xf32>
    %261 = arith.addf %256, %260 : vector<16x128xf32>
    %262 = vector.broadcast %231 : vector<1x128xf32> to vector<16x128xf32>
    %263 = arith.addf %261, %262 : vector<16x128xf32>
    %c0_208 = arith.constant 0 : index
    %c1_209 = arith.constant 1 : index
    %c0_210 = arith.constant 0 : index
    %264 = vector.load %arg31[%c0_208, %c1_209, %c0_210] : memref<2x18x128xf32, #tpu.memory_space<vmem>>, vector<1x16x128xf32>
    %265 = vector.shape_cast %264 : vector<1x16x128xf32> to vector<16x128xf32>
    %266 = arith.addf %247, %265 : vector<16x128xf32>
    %c1_211 = arith.constant 1 : index
    %c1_212 = arith.constant 1 : index
    %c0_213 = arith.constant 0 : index
    %267 = vector.load %arg31[%c1_211, %c1_212, %c0_213] : memref<2x18x128xf32, #tpu.memory_space<vmem>>, vector<1x16x128xf32>
    %268 = vector.shape_cast %267 : vector<1x16x128xf32> to vector<16x128xf32>
    %269 = arith.addf %263, %268 : vector<16x128xf32>
    %cst_214 = arith.constant 0.000000e+00 : f32
    %270 = vector.broadcast %cst_214 : f32 to vector<1x128xf32>
    %cst_215 = arith.constant 0.000000e+00 : f32
    %271 = vector.broadcast %cst_215 : f32 to vector<1x128xf32>
    %cst_216 = arith.constant dense<0.000000e+00> : vector<128xf32>
    %272 = vector.multi_reduction <add>, %266, %cst_216 [0] : vector<16x128xf32> to vector<128xf32>
    %273 = vector.shape_cast %272 : vector<128xf32> to vector<1x128xf32>
    %274 = arith.addf %270, %273 : vector<1x128xf32>
    %275 = arith.mulf %266, %266 : vector<16x128xf32>
    %cst_217 = arith.constant dense<0.000000e+00> : vector<128xf32>
    %276 = vector.multi_reduction <add>, %275, %cst_217 [0] : vector<16x128xf32> to vector<128xf32>
    %277 = vector.shape_cast %276 : vector<128xf32> to vector<1x128xf32>
    %278 = arith.addf %271, %277 : vector<1x128xf32>
    %cst_218 = arith.constant dense<0.000000e+00> : vector<128xf32>
    %279 = vector.multi_reduction <add>, %269, %cst_218 [0] : vector<16x128xf32> to vector<128xf32>
    %280 = vector.shape_cast %279 : vector<128xf32> to vector<1x128xf32>
    %281 = arith.addf %274, %280 : vector<1x128xf32>
    %282 = arith.mulf %269, %269 : vector<16x128xf32>
    %cst_219 = arith.constant dense<0.000000e+00> : vector<128xf32>
    %283 = vector.multi_reduction <add>, %282, %cst_219 [0] : vector<16x128xf32> to vector<128xf32>
    %284 = vector.shape_cast %283 : vector<128xf32> to vector<1x128xf32>
    %285 = arith.addf %278, %284 : vector<1x128xf32>
    %c8_i32_220 = arith.constant 8 : i32
    %286 = tpu.dynamic_rotate %281 by %c8_i32_220 dim 1 : vector<1x128xf32>, i32 -> vector<1x128xf32>
    %287 = arith.addf %281, %286 : vector<1x128xf32>
    %c8_i32_221 = arith.constant 8 : i32
    %288 = tpu.dynamic_rotate %285 by %c8_i32_221 dim 1 : vector<1x128xf32>, i32 -> vector<1x128xf32>
    %289 = arith.addf %285, %288 : vector<1x128xf32>
    %c16_i32_222 = arith.constant 16 : i32
    %290 = tpu.dynamic_rotate %287 by %c16_i32_222 dim 1 : vector<1x128xf32>, i32 -> vector<1x128xf32>
    %291 = arith.addf %287, %290 : vector<1x128xf32>
    %c16_i32_223 = arith.constant 16 : i32
    %292 = tpu.dynamic_rotate %289 by %c16_i32_223 dim 1 : vector<1x128xf32>, i32 -> vector<1x128xf32>
    %293 = arith.addf %289, %292 : vector<1x128xf32>
    %c32_i32_224 = arith.constant 32 : i32
    %294 = tpu.dynamic_rotate %291 by %c32_i32_224 dim 1 : vector<1x128xf32>, i32 -> vector<1x128xf32>
    %295 = arith.addf %291, %294 : vector<1x128xf32>
    %c32_i32_225 = arith.constant 32 : i32
    %296 = tpu.dynamic_rotate %293 by %c32_i32_225 dim 1 : vector<1x128xf32>, i32 -> vector<1x128xf32>
    %297 = arith.addf %293, %296 : vector<1x128xf32>
    %c64_i32_226 = arith.constant 64 : i32
    %298 = tpu.dynamic_rotate %295 by %c64_i32_226 dim 1 : vector<1x128xf32>, i32 -> vector<1x128xf32>
    %299 = arith.addf %295, %298 : vector<1x128xf32>
    %c64_i32_227 = arith.constant 64 : i32
    %300 = tpu.dynamic_rotate %297 by %c64_i32_227 dim 1 : vector<1x128xf32>, i32 -> vector<1x128xf32>
    %301 = arith.addf %297, %300 : vector<1x128xf32>
    %cst_228 = arith.constant 0.001953125 : f32
    %302 = vector.broadcast %cst_228 : f32 to vector<1x128xf32>
    %303 = arith.mulf %299, %302 : vector<1x128xf32>
    %cst_229 = arith.constant 0.001953125 : f32
    %304 = vector.broadcast %cst_229 : f32 to vector<1x128xf32>
    %305 = arith.mulf %301, %304 : vector<1x128xf32>
    %306 = arith.mulf %303, %303 : vector<1x128xf32>
    %307 = arith.subf %305, %306 : vector<1x128xf32>
    %cst_230 = arith.constant 0.000000e+00 : f32
    %308 = vector.broadcast %cst_230 : f32 to vector<1x128xf32>
    %309 = arith.maximumf %307, %308 : vector<1x128xf32>
    %c0_231 = arith.constant 0 : index
    %c0_232 = arith.constant 0 : index
    %310 = vector.load %arg9[%c0_231, %c0_232] : memref<1x128xf32, #tpu.memory_space<vmem>>, vector<1x128xf32>
    %cst_233 = arith.constant 9.99999974E-6 : f32
    %311 = vector.broadcast %cst_233 : f32 to vector<1x128xf32>
    %312 = arith.addf %309, %311 : vector<1x128xf32>
    %313 = math.rsqrt %312 : vector<1x128xf32>
    %314 = arith.mulf %310, %313 : vector<1x128xf32>
    %c0_234 = arith.constant 0 : index
    %c0_235 = arith.constant 0 : index
    %315 = vector.load %arg10[%c0_234, %c0_235] : memref<1x128xf32, #tpu.memory_space<vmem>>, vector<1x128xf32>
    %316 = arith.mulf %303, %314 : vector<1x128xf32>
    %317 = arith.subf %315, %316 : vector<1x128xf32>
    %318 = vector.broadcast %314 : vector<1x128xf32> to vector<16x128xf32>
    %319 = arith.mulf %266, %318 : vector<16x128xf32>
    %320 = vector.broadcast %317 : vector<1x128xf32> to vector<16x128xf32>
    %321 = arith.addf %319, %320 : vector<16x128xf32>
    %cst_236 = arith.constant 0.000000e+00 : f32
    %322 = vector.broadcast %cst_236 : f32 to vector<16x128xf32>
    %323 = arith.maximumf %321, %322 : vector<16x128xf32>
    %324 = vector.broadcast %314 : vector<1x128xf32> to vector<16x128xf32>
    %325 = arith.mulf %269, %324 : vector<16x128xf32>
    %326 = vector.broadcast %317 : vector<1x128xf32> to vector<16x128xf32>
    %327 = arith.addf %325, %326 : vector<16x128xf32>
    %cst_237 = arith.constant 0.000000e+00 : f32
    %328 = vector.broadcast %cst_237 : f32 to vector<16x128xf32>
    %329 = arith.maximumf %327, %328 : vector<16x128xf32>
    %c0_238 = arith.constant 0 : index
    %c1_239 = arith.constant 1 : index
    %c0_240 = arith.constant 0 : index
    %330 = vector.load %arg31[%c0_238, %c1_239, %c0_240] : memref<2x18x128xf32, #tpu.memory_space<vmem>>, vector<1x16x128xf32>
    %331 = vector.shape_cast %330 : vector<1x16x128xf32> to vector<16x128xf32>
    %332 = vector.shape_cast %323 : vector<16x128xf32> to vector<1x16x128xf32>
    tpu.vector_store %arg31[%c0_238, %c1_239, %c0_240], %332 {strides = array<i32>} : memref<2x18x128xf32, #tpu.memory_space<vmem>>, vector<1x16x128xf32>,
    %c1_241 = arith.constant 1 : index
    %c1_242 = arith.constant 1 : index
    %c0_243 = arith.constant 0 : index
    %333 = vector.load %arg31[%c1_241, %c1_242, %c0_243] : memref<2x18x128xf32, #tpu.memory_space<vmem>>, vector<1x16x128xf32>
    %334 = vector.shape_cast %333 : vector<1x16x128xf32> to vector<16x128xf32>
    %335 = vector.shape_cast %329 : vector<16x128xf32> to vector<1x16x128xf32>
    tpu.vector_store %arg31[%c1_241, %c1_242, %c0_243], %335 {strides = array<i32>} : memref<2x18x128xf32, #tpu.memory_space<vmem>>, vector<1x16x128xf32>,
    %c0_244 = arith.constant 0 : index
    %c0_245 = arith.constant 0 : index
    %c0_246 = arith.constant 0 : index
    %336 = vector.load %arg27[%c0_244, %c0_245, %c0_246] : memref<2x16x128xf32, #tpu.memory_space<vmem>>, vector<1x16x128xf32>
    %337 = vector.shape_cast %336 : vector<1x16x128xf32> to vector<16x128xf32>
    %338 = vector.shape_cast %323 : vector<16x128xf32> to vector<1x16x128xf32>
    tpu.vector_store %arg27[%c0_244, %c0_245, %c0_246], %338 {strides = array<i32>} : memref<2x16x128xf32, #tpu.memory_space<vmem>>, vector<1x16x128xf32>,
    %c1_247 = arith.constant 1 : index
    %c0_248 = arith.constant 0 : index
    %c0_249 = arith.constant 0 : index
    %339 = vector.load %arg27[%c1_247, %c0_248, %c0_249] : memref<2x16x128xf32, #tpu.memory_space<vmem>>, vector<1x16x128xf32>
    %340 = vector.shape_cast %339 : vector<1x16x128xf32> to vector<16x128xf32>
    %341 = vector.shape_cast %329 : vector<16x128xf32> to vector<1x16x128xf32>
    tpu.vector_store %arg27[%c1_247, %c0_248, %c0_249], %341 {strides = array<i32>} : memref<2x16x128xf32, #tpu.memory_space<vmem>>, vector<1x16x128xf32>,
    %c0_250 = arith.constant 0 : index
    %c1_251 = arith.constant 1 : index
    %c0_252 = arith.constant 0 : index
    %342 = vector.load %arg31[%c0_250, %c1_251, %c0_252] : memref<2x18x128xf32, #tpu.memory_space<vmem>>, vector<1x1x128xf32>
    %343 = vector.shape_cast %342 : vector<1x1x128xf32> to vector<1x128xf32>
    %c0_253 = arith.constant 0 : index
    %c2_254 = arith.constant 2 : index
    %c0_255 = arith.constant 0 : index
    %344 = vector.load %arg31[%c0_253, %c2_254, %c0_255] : memref<2x18x128xf32, #tpu.memory_space<vmem>>, vector<1x1x128xf32>
    %345 = vector.shape_cast %344 : vector<1x1x128xf32> to vector<1x128xf32>
    %346 = arith.maximumf %343, %345 : vector<1x128xf32>
    %c0_256 = arith.constant 0 : index
    %c0_257 = arith.constant 0 : index
    %c0_258 = arith.constant 0 : index
    %347 = vector.load %arg35[%c0_256, %c0_257, %c0_258] : memref<2x8x128xf32, #tpu.memory_space<vmem>>, vector<1x1x128xf32>
    %348 = vector.shape_cast %347 : vector<1x1x128xf32> to vector<1x128xf32>
    %349 = vector.shape_cast %346 : vector<1x128xf32> to vector<1x1x128xf32>
    tpu.vector_store %arg35[%c0_256, %c0_257, %c0_258], %349 {strides = array<i32>} : memref<2x8x128xf32, #tpu.memory_space<vmem>>, vector<1x1x128xf32>,
    %c0_259 = arith.constant 0 : index
    %c3 = arith.constant 3 : index
    %c0_260 = arith.constant 0 : index
    %350 = vector.load %arg31[%c0_259, %c3, %c0_260] : memref<2x18x128xf32, #tpu.memory_space<vmem>>, vector<1x1x128xf32>
    %351 = vector.shape_cast %350 : vector<1x1x128xf32> to vector<1x128xf32>
    %c0_261 = arith.constant 0 : index
    %c4 = arith.constant 4 : index
    %c0_262 = arith.constant 0 : index
    %352 = vector.load %arg31[%c0_261, %c4, %c0_262] : memref<2x18x128xf32, #tpu.memory_space<vmem>>, vector<1x1x128xf32>
    %353 = vector.shape_cast %352 : vector<1x1x128xf32> to vector<1x128xf32>
    %354 = arith.maximumf %351, %353 : vector<1x128xf32>
    %c0_263 = arith.constant 0 : index
    %c1_264 = arith.constant 1 : index
    %c0_265 = arith.constant 0 : index
    %355 = vector.load %arg35[%c0_263, %c1_264, %c0_265] : memref<2x8x128xf32, #tpu.memory_space<vmem>>, vector<1x1x128xf32>
    %356 = vector.shape_cast %355 : vector<1x1x128xf32> to vector<1x128xf32>
    %357 = vector.shape_cast %354 : vector<1x128xf32> to vector<1x1x128xf32>
    tpu.vector_store %arg35[%c0_263, %c1_264, %c0_265], %357 {strides = array<i32>} : memref<2x8x128xf32, #tpu.memory_space<vmem>>, vector<1x1x128xf32>,
    %c0_266 = arith.constant 0 : index
    %c5 = arith.constant 5 : index
    %c0_267 = arith.constant 0 : index
    %358 = vector.load %arg31[%c0_266, %c5, %c0_267] : memref<2x18x128xf32, #tpu.memory_space<vmem>>, vector<1x1x128xf32>
    %359 = vector.shape_cast %358 : vector<1x1x128xf32> to vector<1x128xf32>
    %c0_268 = arith.constant 0 : index
    %c6 = arith.constant 6 : index
    %c0_269 = arith.constant 0 : index
    %360 = vector.load %arg31[%c0_268, %c6, %c0_269] : memref<2x18x128xf32, #tpu.memory_space<vmem>>, vector<1x1x128xf32>
    %361 = vector.shape_cast %360 : vector<1x1x128xf32> to vector<1x128xf32>
    %362 = arith.maximumf %359, %361 : vector<1x128xf32>
    %c0_270 = arith.constant 0 : index
    %c2_271 = arith.constant 2 : index
    %c0_272 = arith.constant 0 : index
    %363 = vector.load %arg35[%c0_270, %c2_271, %c0_272] : memref<2x8x128xf32, #tpu.memory_space<vmem>>, vector<1x1x128xf32>
    %364 = vector.shape_cast %363 : vector<1x1x128xf32> to vector<1x128xf32>
    %365 = vector.shape_cast %362 : vector<1x128xf32> to vector<1x1x128xf32>
    tpu.vector_store %arg35[%c0_270, %c2_271, %c0_272], %365 {strides = array<i32>} : memref<2x8x128xf32, #tpu.memory_space<vmem>>, vector<1x1x128xf32>,
    %c0_273 = arith.constant 0 : index
    %c7 = arith.constant 7 : index
    %c0_274 = arith.constant 0 : index
    %366 = vector.load %arg31[%c0_273, %c7, %c0_274] : memref<2x18x128xf32, #tpu.memory_space<vmem>>, vector<1x1x128xf32>
    %367 = vector.shape_cast %366 : vector<1x1x128xf32> to vector<1x128xf32>
    %c0_275 = arith.constant 0 : index
    %c8 = arith.constant 8 : index
    %c0_276 = arith.constant 0 : index
    %368 = vector.load %arg31[%c0_275, %c8, %c0_276] : memref<2x18x128xf32, #tpu.memory_space<vmem>>, vector<1x1x128xf32>
    %369 = vector.shape_cast %368 : vector<1x1x128xf32> to vector<1x128xf32>
    %370 = arith.maximumf %367, %369 : vector<1x128xf32>
    %c0_277 = arith.constant 0 : index
    %c3_278 = arith.constant 3 : index
    %c0_279 = arith.constant 0 : index
    %371 = vector.load %arg35[%c0_277, %c3_278, %c0_279] : memref<2x8x128xf32, #tpu.memory_space<vmem>>, vector<1x1x128xf32>
    %372 = vector.shape_cast %371 : vector<1x1x128xf32> to vector<1x128xf32>
    %373 = vector.shape_cast %370 : vector<1x128xf32> to vector<1x1x128xf32>
    tpu.vector_store %arg35[%c0_277, %c3_278, %c0_279], %373 {strides = array<i32>} : memref<2x8x128xf32, #tpu.memory_space<vmem>>, vector<1x1x128xf32>,
    %c0_280 = arith.constant 0 : index
    %c9_281 = arith.constant 9 : index
    %c0_282 = arith.constant 0 : index
    %374 = vector.load %arg31[%c0_280, %c9_281, %c0_282] : memref<2x18x128xf32, #tpu.memory_space<vmem>>, vector<1x1x128xf32>
    %375 = vector.shape_cast %374 : vector<1x1x128xf32> to vector<1x128xf32>
    %c0_283 = arith.constant 0 : index
    %c10 = arith.constant 10 : index
    %c0_284 = arith.constant 0 : index
    %376 = vector.load %arg31[%c0_283, %c10, %c0_284] : memref<2x18x128xf32, #tpu.memory_space<vmem>>, vector<1x1x128xf32>
    %377 = vector.shape_cast %376 : vector<1x1x128xf32> to vector<1x128xf32>
    %378 = arith.maximumf %375, %377 : vector<1x128xf32>
    %c0_285 = arith.constant 0 : index
    %c4_286 = arith.constant 4 : index
    %c0_287 = arith.constant 0 : index
    %379 = vector.load %arg35[%c0_285, %c4_286, %c0_287] : memref<2x8x128xf32, #tpu.memory_space<vmem>>, vector<1x1x128xf32>
    %380 = vector.shape_cast %379 : vector<1x1x128xf32> to vector<1x128xf32>
    %381 = vector.shape_cast %378 : vector<1x128xf32> to vector<1x1x128xf32>
    tpu.vector_store %arg35[%c0_285, %c4_286, %c0_287], %381 {strides = array<i32>} : memref<2x8x128xf32, #tpu.memory_space<vmem>>, vector<1x1x128xf32>,
    %c0_288 = arith.constant 0 : index
    %c11 = arith.constant 11 : index
    %c0_289 = arith.constant 0 : index
    %382 = vector.load %arg31[%c0_288, %c11, %c0_289] : memref<2x18x128xf32, #tpu.memory_space<vmem>>, vector<1x1x128xf32>
    %383 = vector.shape_cast %382 : vector<1x1x128xf32> to vector<1x128xf32>
    %c0_290 = arith.constant 0 : index
    %c12 = arith.constant 12 : index
    %c0_291 = arith.constant 0 : index
    %384 = vector.load %arg31[%c0_290, %c12, %c0_291] : memref<2x18x128xf32, #tpu.memory_space<vmem>>, vector<1x1x128xf32>
    %385 = vector.shape_cast %384 : vector<1x1x128xf32> to vector<1x128xf32>
    %386 = arith.maximumf %383, %385 : vector<1x128xf32>
    %c0_292 = arith.constant 0 : index
    %c5_293 = arith.constant 5 : index
    %c0_294 = arith.constant 0 : index
    %387 = vector.load %arg35[%c0_292, %c5_293, %c0_294] : memref<2x8x128xf32, #tpu.memory_space<vmem>>, vector<1x1x128xf32>
    %388 = vector.shape_cast %387 : vector<1x1x128xf32> to vector<1x128xf32>
    %389 = vector.shape_cast %386 : vector<1x128xf32> to vector<1x1x128xf32>
    tpu.vector_store %arg35[%c0_292, %c5_293, %c0_294], %389 {strides = array<i32>} : memref<2x8x128xf32, #tpu.memory_space<vmem>>, vector<1x1x128xf32>,
    %c0_295 = arith.constant 0 : index
    %c13 = arith.constant 13 : index
    %c0_296 = arith.constant 0 : index
    %390 = vector.load %arg31[%c0_295, %c13, %c0_296] : memref<2x18x128xf32, #tpu.memory_space<vmem>>, vector<1x1x128xf32>
    %391 = vector.shape_cast %390 : vector<1x1x128xf32> to vector<1x128xf32>
    %c0_297 = arith.constant 0 : index
    %c14 = arith.constant 14 : index
    %c0_298 = arith.constant 0 : index
    %392 = vector.load %arg31[%c0_297, %c14, %c0_298] : memref<2x18x128xf32, #tpu.memory_space<vmem>>, vector<1x1x128xf32>
    %393 = vector.shape_cast %392 : vector<1x1x128xf32> to vector<1x128xf32>
    %394 = arith.maximumf %391, %393 : vector<1x128xf32>
    %c0_299 = arith.constant 0 : index
    %c6_300 = arith.constant 6 : index
    %c0_301 = arith.constant 0 : index
    %395 = vector.load %arg35[%c0_299, %c6_300, %c0_301] : memref<2x8x128xf32, #tpu.memory_space<vmem>>, vector<1x1x128xf32>
    %396 = vector.shape_cast %395 : vector<1x1x128xf32> to vector<1x128xf32>
    %397 = vector.shape_cast %394 : vector<1x128xf32> to vector<1x1x128xf32>
    tpu.vector_store %arg35[%c0_299, %c6_300, %c0_301], %397 {strides = array<i32>} : memref<2x8x128xf32, #tpu.memory_space<vmem>>, vector<1x1x128xf32>,
    %c0_302 = arith.constant 0 : index
    %c15 = arith.constant 15 : index
    %c0_303 = arith.constant 0 : index
    %398 = vector.load %arg31[%c0_302, %c15, %c0_303] : memref<2x18x128xf32, #tpu.memory_space<vmem>>, vector<1x1x128xf32>
    %399 = vector.shape_cast %398 : vector<1x1x128xf32> to vector<1x128xf32>
    %c0_304 = arith.constant 0 : index
    %c16 = arith.constant 16 : index
    %c0_305 = arith.constant 0 : index
    %400 = vector.load %arg31[%c0_304, %c16, %c0_305] : memref<2x18x128xf32, #tpu.memory_space<vmem>>, vector<1x1x128xf32>
    %401 = vector.shape_cast %400 : vector<1x1x128xf32> to vector<1x128xf32>
    %402 = arith.maximumf %399, %401 : vector<1x128xf32>
    %c0_306 = arith.constant 0 : index
    %c7_307 = arith.constant 7 : index
    %c0_308 = arith.constant 0 : index
    %403 = vector.load %arg35[%c0_306, %c7_307, %c0_308] : memref<2x8x128xf32, #tpu.memory_space<vmem>>, vector<1x1x128xf32>
    %404 = vector.shape_cast %403 : vector<1x1x128xf32> to vector<1x128xf32>
    %405 = vector.shape_cast %402 : vector<1x128xf32> to vector<1x1x128xf32>
    tpu.vector_store %arg35[%c0_306, %c7_307, %c0_308], %405 {strides = array<i32>} : memref<2x8x128xf32, #tpu.memory_space<vmem>>, vector<1x1x128xf32>,
    %c1_309 = arith.constant 1 : index
    %c1_310 = arith.constant 1 : index
    %c0_311 = arith.constant 0 : index
    %406 = vector.load %arg31[%c1_309, %c1_310, %c0_311] : memref<2x18x128xf32, #tpu.memory_space<vmem>>, vector<1x1x128xf32>
    %407 = vector.shape_cast %406 : vector<1x1x128xf32> to vector<1x128xf32>
    %c1_312 = arith.constant 1 : index
    %c2_313 = arith.constant 2 : index
    %c0_314 = arith.constant 0 : index
    %408 = vector.load %arg31[%c1_312, %c2_313, %c0_314] : memref<2x18x128xf32, #tpu.memory_space<vmem>>, vector<1x1x128xf32>
    %409 = vector.shape_cast %408 : vector<1x1x128xf32> to vector<1x128xf32>
    %410 = arith.maximumf %407, %409 : vector<1x128xf32>
    %c1_315 = arith.constant 1 : index
    %c0_316 = arith.constant 0 : index
    %c0_317 = arith.constant 0 : index
    %411 = vector.load %arg35[%c1_315, %c0_316, %c0_317] : memref<2x8x128xf32, #tpu.memory_space<vmem>>, vector<1x1x128xf32>
    %412 = vector.shape_cast %411 : vector<1x1x128xf32> to vector<1x128xf32>
    %413 = vector.shape_cast %410 : vector<1x128xf32> to vector<1x1x128xf32>
    tpu.vector_store %arg35[%c1_315, %c0_316, %c0_317], %413 {strides = array<i32>} : memref<2x8x128xf32, #tpu.memory_space<vmem>>, vector<1x1x128xf32>,
    %c1_318 = arith.constant 1 : index
    %c3_319 = arith.constant 3 : index
    %c0_320 = arith.constant 0 : index
    %414 = vector.load %arg31[%c1_318, %c3_319, %c0_320] : memref<2x18x128xf32, #tpu.memory_space<vmem>>, vector<1x1x128xf32>
    %415 = vector.shape_cast %414 : vector<1x1x128xf32> to vector<1x128xf32>
    %c1_321 = arith.constant 1 : index
    %c4_322 = arith.constant 4 : index
    %c0_323 = arith.constant 0 : index
    %416 = vector.load %arg31[%c1_321, %c4_322, %c0_323] : memref<2x18x128xf32, #tpu.memory_space<vmem>>, vector<1x1x128xf32>
    %417 = vector.shape_cast %416 : vector<1x1x128xf32> to vector<1x128xf32>
    %418 = arith.maximumf %415, %417 : vector<1x128xf32>
    %c1_324 = arith.constant 1 : index
    %c1_325 = arith.constant 1 : index
    %c0_326 = arith.constant 0 : index
    %419 = vector.load %arg35[%c1_324, %c1_325, %c0_326] : memref<2x8x128xf32, #tpu.memory_space<vmem>>, vector<1x1x128xf32>
    %420 = vector.shape_cast %419 : vector<1x1x128xf32> to vector<1x128xf32>
    %421 = vector.shape_cast %418 : vector<1x128xf32> to vector<1x1x128xf32>
    tpu.vector_store %arg35[%c1_324, %c1_325, %c0_326], %421 {strides = array<i32>} : memref<2x8x128xf32, #tpu.memory_space<vmem>>, vector<1x1x128xf32>,
    %c1_327 = arith.constant 1 : index
    %c5_328 = arith.constant 5 : index
    %c0_329 = arith.constant 0 : index
    %422 = vector.load %arg31[%c1_327, %c5_328, %c0_329] : memref<2x18x128xf32, #tpu.memory_space<vmem>>, vector<1x1x128xf32>
    %423 = vector.shape_cast %422 : vector<1x1x128xf32> to vector<1x128xf32>
    %c1_330 = arith.constant 1 : index
    %c6_331 = arith.constant 6 : index
    %c0_332 = arith.constant 0 : index
    %424 = vector.load %arg31[%c1_330, %c6_331, %c0_332] : memref<2x18x128xf32, #tpu.memory_space<vmem>>, vector<1x1x128xf32>
    %425 = vector.shape_cast %424 : vector<1x1x128xf32> to vector<1x128xf32>
    %426 = arith.maximumf %423, %425 : vector<1x128xf32>
    %c1_333 = arith.constant 1 : index
    %c2_334 = arith.constant 2 : index
    %c0_335 = arith.constant 0 : index
    %427 = vector.load %arg35[%c1_333, %c2_334, %c0_335] : memref<2x8x128xf32, #tpu.memory_space<vmem>>, vector<1x1x128xf32>
    %428 = vector.shape_cast %427 : vector<1x1x128xf32> to vector<1x128xf32>
    %429 = vector.shape_cast %426 : vector<1x128xf32> to vector<1x1x128xf32>
    tpu.vector_store %arg35[%c1_333, %c2_334, %c0_335], %429 {strides = array<i32>} : memref<2x8x128xf32, #tpu.memory_space<vmem>>, vector<1x1x128xf32>,
    %c1_336 = arith.constant 1 : index
    %c7_337 = arith.constant 7 : index
    %c0_338 = arith.constant 0 : index
    %430 = vector.load %arg31[%c1_336, %c7_337, %c0_338] : memref<2x18x128xf32, #tpu.memory_space<vmem>>, vector<1x1x128xf32>
    %431 = vector.shape_cast %430 : vector<1x1x128xf32> to vector<1x128xf32>
    %c1_339 = arith.constant 1 : index
    %c8_340 = arith.constant 8 : index
    %c0_341 = arith.constant 0 : index
    %432 = vector.load %arg31[%c1_339, %c8_340, %c0_341] : memref<2x18x128xf32, #tpu.memory_space<vmem>>, vector<1x1x128xf32>
    %433 = vector.shape_cast %432 : vector<1x1x128xf32> to vector<1x128xf32>
    %434 = arith.maximumf %431, %433 : vector<1x128xf32>
    %c1_342 = arith.constant 1 : index
    %c3_343 = arith.constant 3 : index
    %c0_344 = arith.constant 0 : index
    %435 = vector.load %arg35[%c1_342, %c3_343, %c0_344] : memref<2x8x128xf32, #tpu.memory_space<vmem>>, vector<1x1x128xf32>
    %436 = vector.shape_cast %435 : vector<1x1x128xf32> to vector<1x128xf32>
    %437 = vector.shape_cast %434 : vector<1x128xf32> to vector<1x1x128xf32>
    tpu.vector_store %arg35[%c1_342, %c3_343, %c0_344], %437 {strides = array<i32>} : memref<2x8x128xf32, #tpu.memory_space<vmem>>, vector<1x1x128xf32>,
    %c1_345 = arith.constant 1 : index
    %c9_346 = arith.constant 9 : index
    %c0_347 = arith.constant 0 : index
    %438 = vector.load %arg31[%c1_345, %c9_346, %c0_347] : memref<2x18x128xf32, #tpu.memory_space<vmem>>, vector<1x1x128xf32>
    %439 = vector.shape_cast %438 : vector<1x1x128xf32> to vector<1x128xf32>
    %c1_348 = arith.constant 1 : index
    %c10_349 = arith.constant 10 : index
    %c0_350 = arith.constant 0 : index
    %440 = vector.load %arg31[%c1_348, %c10_349, %c0_350] : memref<2x18x128xf32, #tpu.memory_space<vmem>>, vector<1x1x128xf32>
    %441 = vector.shape_cast %440 : vector<1x1x128xf32> to vector<1x128xf32>
    %442 = arith.maximumf %439, %441 : vector<1x128xf32>
    %c1_351 = arith.constant 1 : index
    %c4_352 = arith.constant 4 : index
    %c0_353 = arith.constant 0 : index
    %443 = vector.load %arg35[%c1_351, %c4_352, %c0_353] : memref<2x8x128xf32, #tpu.memory_space<vmem>>, vector<1x1x128xf32>
    %444 = vector.shape_cast %443 : vector<1x1x128xf32> to vector<1x128xf32>
    %445 = vector.shape_cast %442 : vector<1x128xf32> to vector<1x1x128xf32>
    tpu.vector_store %arg35[%c1_351, %c4_352, %c0_353], %445 {strides = array<i32>} : memref<2x8x128xf32, #tpu.memory_space<vmem>>, vector<1x1x128xf32>,
    %c1_354 = arith.constant 1 : index
    %c11_355 = arith.constant 11 : index
    %c0_356 = arith.constant 0 : index
    %446 = vector.load %arg31[%c1_354, %c11_355, %c0_356] : memref<2x18x128xf32, #tpu.memory_space<vmem>>, vector<1x1x128xf32>
    %447 = vector.shape_cast %446 : vector<1x1x128xf32> to vector<1x128xf32>
    %c1_357 = arith.constant 1 : index
    %c12_358 = arith.constant 12 : index
    %c0_359 = arith.constant 0 : index
    %448 = vector.load %arg31[%c1_357, %c12_358, %c0_359] : memref<2x18x128xf32, #tpu.memory_space<vmem>>, vector<1x1x128xf32>
    %449 = vector.shape_cast %448 : vector<1x1x128xf32> to vector<1x128xf32>
    %450 = arith.maximumf %447, %449 : vector<1x128xf32>
    %c1_360 = arith.constant 1 : index
    %c5_361 = arith.constant 5 : index
    %c0_362 = arith.constant 0 : index
    %451 = vector.load %arg35[%c1_360, %c5_361, %c0_362] : memref<2x8x128xf32, #tpu.memory_space<vmem>>, vector<1x1x128xf32>
    %452 = vector.shape_cast %451 : vector<1x1x128xf32> to vector<1x128xf32>
    %453 = vector.shape_cast %450 : vector<1x128xf32> to vector<1x1x128xf32>
    tpu.vector_store %arg35[%c1_360, %c5_361, %c0_362], %453 {strides = array<i32>} : memref<2x8x128xf32, #tpu.memory_space<vmem>>, vector<1x1x128xf32>,
    %c1_363 = arith.constant 1 : index
    %c13_364 = arith.constant 13 : index
    %c0_365 = arith.constant 0 : index
    %454 = vector.load %arg31[%c1_363, %c13_364, %c0_365] : memref<2x18x128xf32, #tpu.memory_space<vmem>>, vector<1x1x128xf32>
    %455 = vector.shape_cast %454 : vector<1x1x128xf32> to vector<1x128xf32>
    %c1_366 = arith.constant 1 : index
    %c14_367 = arith.constant 14 : index
    %c0_368 = arith.constant 0 : index
    %456 = vector.load %arg31[%c1_366, %c14_367, %c0_368] : memref<2x18x128xf32, #tpu.memory_space<vmem>>, vector<1x1x128xf32>
    %457 = vector.shape_cast %456 : vector<1x1x128xf32> to vector<1x128xf32>
    %458 = arith.maximumf %455, %457 : vector<1x128xf32>
    %c1_369 = arith.constant 1 : index
    %c6_370 = arith.constant 6 : index
    %c0_371 = arith.constant 0 : index
    %459 = vector.load %arg35[%c1_369, %c6_370, %c0_371] : memref<2x8x128xf32, #tpu.memory_space<vmem>>, vector<1x1x128xf32>
    %460 = vector.shape_cast %459 : vector<1x1x128xf32> to vector<1x128xf32>
    %461 = vector.shape_cast %458 : vector<1x128xf32> to vector<1x1x128xf32>
    tpu.vector_store %arg35[%c1_369, %c6_370, %c0_371], %461 {strides = array<i32>} : memref<2x8x128xf32, #tpu.memory_space<vmem>>, vector<1x1x128xf32>,
    %c1_372 = arith.constant 1 : index
    %c15_373 = arith.constant 15 : index
    %c0_374 = arith.constant 0 : index
    %462 = vector.load %arg31[%c1_372, %c15_373, %c0_374] : memref<2x18x128xf32, #tpu.memory_space<vmem>>, vector<1x1x128xf32>
    %463 = vector.shape_cast %462 : vector<1x1x128xf32> to vector<1x128xf32>
    %c1_375 = arith.constant 1 : index
    %c16_376 = arith.constant 16 : index
    %c0_377 = arith.constant 0 : index
    %464 = vector.load %arg31[%c1_375, %c16_376, %c0_377] : memref<2x18x128xf32, #tpu.memory_space<vmem>>, vector<1x1x128xf32>
    %465 = vector.shape_cast %464 : vector<1x1x128xf32> to vector<1x128xf32>
    %466 = arith.maximumf %463, %465 : vector<1x128xf32>
    %c1_378 = arith.constant 1 : index
    %c7_379 = arith.constant 7 : index
    %c0_380 = arith.constant 0 : index
    %467 = vector.load %arg35[%c1_378, %c7_379, %c0_380] : memref<2x8x128xf32, #tpu.memory_space<vmem>>, vector<1x1x128xf32>
    %468 = vector.shape_cast %467 : vector<1x1x128xf32> to vector<1x128xf32>
    %469 = vector.shape_cast %466 : vector<1x128xf32> to vector<1x1x128xf32>
    tpu.vector_store %arg35[%c1_378, %c7_379, %c0_380], %469 {strides = array<i32>} : memref<2x8x128xf32, #tpu.memory_space<vmem>>, vector<1x1x128xf32>,
    %c0_381 = arith.constant 0 : index
    %c0_382 = arith.constant 0 : index
    %c0_383 = arith.constant 0 : index
    %470 = vector.load %arg11[%c0_381, %c0_382, %c0_383] : memref<1x128x128xbf16, #tpu.memory_space<vmem>>, vector<1x128x128xbf16>
    %471 = vector.shape_cast %470 : vector<1x128x128xbf16> to vector<128x128xbf16>
    %c0_384 = arith.constant 0 : index
    %c0_385 = arith.constant 0 : index
    %472 = vector.load %arg12[%c0_384, %c0_385] : memref<1x128xf32, #tpu.memory_space<vmem>>, vector<1x128xf32>
    %c0_386 = arith.constant 0 : index
    %c0_387 = arith.constant 0 : index
    %c0_388 = arith.constant 0 : index
    %473 = vector.load %arg35[%c0_386, %c0_387, %c0_388] : memref<2x8x128xf32, #tpu.memory_space<vmem>>, vector<1x8x128xf32>
    %474 = vector.shape_cast %473 : vector<1x8x128xf32> to vector<8x128xf32>
    %c120_i32 = arith.constant 120 : i32
    %475 = tpu.dynamic_rotate %474 by %c120_i32 dim 1 : vector<8x128xf32>, i32 -> vector<8x128xf32>
    %476 = arith.maximumf %474, %475 : vector<8x128xf32>
    %477 = arith.truncf %476 : vector<8x128xf32> to vector<8x128xbf16>
    %cst_389 = arith.constant dense<0.000000e+00> : vector<8x128xf32>
    %478 = tpu.matmul %477, %471, %cst_389 {dimension_numbers = #tpu.dot_dimension_numbers<[1], [0], [0], [1], [0, 0, 1, 1], [], []>} : vector<8x128xbf16>, vector<128x128xbf16>, vector<8x128xf32> -> vector<8x128xf32>
    %479 = vector.broadcast %472 : vector<1x128xf32> to vector<8x128xf32>
    %480 = arith.addf %478, %479 : vector<8x128xf32>
    %c1_390 = arith.constant 1 : index
    %c0_391 = arith.constant 0 : index
    %c0_392 = arith.constant 0 : index
    %481 = vector.load %arg35[%c1_390, %c0_391, %c0_392] : memref<2x8x128xf32, #tpu.memory_space<vmem>>, vector<1x8x128xf32>
    %482 = vector.shape_cast %481 : vector<1x8x128xf32> to vector<8x128xf32>
    %c120_i32_393 = arith.constant 120 : i32
    %483 = tpu.dynamic_rotate %482 by %c120_i32_393 dim 1 : vector<8x128xf32>, i32 -> vector<8x128xf32>
    %484 = arith.maximumf %482, %483 : vector<8x128xf32>
    %485 = arith.truncf %484 : vector<8x128xf32> to vector<8x128xbf16>
    %cst_394 = arith.constant dense<0.000000e+00> : vector<8x128xf32>
    %486 = tpu.matmul %485, %471, %cst_394 {dimension_numbers = #tpu.dot_dimension_numbers<[1], [0], [0], [1], [0, 0, 1, 1], [], []>} : vector<8x128xbf16>, vector<128x128xbf16>, vector<8x128xf32> -> vector<8x128xf32>
    %487 = vector.broadcast %472 : vector<1x128xf32> to vector<8x128xf32>
    %488 = arith.addf %486, %487 : vector<8x128xf32>
    %cst_395 = arith.constant 0.000000e+00 : f32
    %489 = vector.broadcast %cst_395 : f32 to vector<1x128xf32>
    %cst_396 = arith.constant 0.000000e+00 : f32
    %490 = vector.broadcast %cst_396 : f32 to vector<1x128xf32>
    %cst_397 = arith.constant dense<0.000000e+00> : vector<128xf32>
    %491 = vector.multi_reduction <add>, %480, %cst_397 [0] : vector<8x128xf32> to vector<128xf32>
    %492 = vector.shape_cast %491 : vector<128xf32> to vector<1x128xf32>
    %493 = arith.addf %489, %492 : vector<1x128xf32>
    %494 = arith.mulf %480, %480 : vector<8x128xf32>
    %cst_398 = arith.constant dense<0.000000e+00> : vector<128xf32>
    %495 = vector.multi_reduction <add>, %494, %cst_398 [0] : vector<8x128xf32> to vector<128xf32>
    %496 = vector.shape_cast %495 : vector<128xf32> to vector<1x128xf32>
    %497 = arith.addf %490, %496 : vector<1x128xf32>
    %cst_399 = arith.constant dense<0.000000e+00> : vector<128xf32>
    %498 = vector.multi_reduction <add>, %488, %cst_399 [0] : vector<8x128xf32> to vector<128xf32>
    %499 = vector.shape_cast %498 : vector<128xf32> to vector<1x128xf32>
    %500 = arith.addf %493, %499 : vector<1x128xf32>
    %501 = arith.mulf %488, %488 : vector<8x128xf32>
    %cst_400 = arith.constant dense<0.000000e+00> : vector<128xf32>
    %502 = vector.multi_reduction <add>, %501, %cst_400 [0] : vector<8x128xf32> to vector<128xf32>
    %503 = vector.shape_cast %502 : vector<128xf32> to vector<1x128xf32>
    %504 = arith.addf %497, %503 : vector<1x128xf32>
    %c16_i32_401 = arith.constant 16 : i32
    %505 = tpu.dynamic_rotate %500 by %c16_i32_401 dim 1 : vector<1x128xf32>, i32 -> vector<1x128xf32>
    %506 = arith.addf %500, %505 : vector<1x128xf32>
    %c16_i32_402 = arith.constant 16 : i32
    %507 = tpu.dynamic_rotate %504 by %c16_i32_402 dim 1 : vector<1x128xf32>, i32 -> vector<1x128xf32>
    %508 = arith.addf %504, %507 : vector<1x128xf32>
    %c32_i32_403 = arith.constant 32 : i32
    %509 = tpu.dynamic_rotate %506 by %c32_i32_403 dim 1 : vector<1x128xf32>, i32 -> vector<1x128xf32>
    %510 = arith.addf %506, %509 : vector<1x128xf32>
    %c32_i32_404 = arith.constant 32 : i32
    %511 = tpu.dynamic_rotate %508 by %c32_i32_404 dim 1 : vector<1x128xf32>, i32 -> vector<1x128xf32>
    %512 = arith.addf %508, %511 : vector<1x128xf32>
    %c64_i32_405 = arith.constant 64 : i32
    %513 = tpu.dynamic_rotate %510 by %c64_i32_405 dim 1 : vector<1x128xf32>, i32 -> vector<1x128xf32>
    %514 = arith.addf %510, %513 : vector<1x128xf32>
    %c64_i32_406 = arith.constant 64 : i32
    %515 = tpu.dynamic_rotate %512 by %c64_i32_406 dim 1 : vector<1x128xf32>, i32 -> vector<1x128xf32>
    %516 = arith.addf %512, %515 : vector<1x128xf32>
    %cst_407 = arith.constant 7.812500e-03 : f32
    %517 = vector.broadcast %cst_407 : f32 to vector<1x128xf32>
    %518 = arith.mulf %514, %517 : vector<1x128xf32>
    %cst_408 = arith.constant 7.812500e-03 : f32
    %519 = vector.broadcast %cst_408 : f32 to vector<1x128xf32>
    %520 = arith.mulf %516, %519 : vector<1x128xf32>
    %521 = arith.mulf %518, %518 : vector<1x128xf32>
    %522 = arith.subf %520, %521 : vector<1x128xf32>
    %cst_409 = arith.constant 0.000000e+00 : f32
    %523 = vector.broadcast %cst_409 : f32 to vector<1x128xf32>
    %524 = arith.maximumf %522, %523 : vector<1x128xf32>
    %c0_410 = arith.constant 0 : index
    %c0_411 = arith.constant 0 : index
    %525 = vector.load %arg13[%c0_410, %c0_411] : memref<1x128xf32, #tpu.memory_space<vmem>>, vector<1x128xf32>
    %cst_412 = arith.constant 9.99999974E-6 : f32
    %526 = vector.broadcast %cst_412 : f32 to vector<1x128xf32>
    %527 = arith.addf %524, %526 : vector<1x128xf32>
    %528 = math.rsqrt %527 : vector<1x128xf32>
    %529 = arith.mulf %525, %528 : vector<1x128xf32>
    %c0_413 = arith.constant 0 : index
    %c0_414 = arith.constant 0 : index
    %530 = vector.load %arg14[%c0_413, %c0_414] : memref<1x128xf32, #tpu.memory_space<vmem>>, vector<1x128xf32>
    %531 = arith.mulf %518, %529 : vector<1x128xf32>
    %532 = arith.subf %530, %531 : vector<1x128xf32>
    %533 = vector.broadcast %529 : vector<1x128xf32> to vector<8x128xf32>
    %534 = arith.mulf %480, %533 : vector<8x128xf32>
    %535 = vector.broadcast %532 : vector<1x128xf32> to vector<8x128xf32>
    %536 = arith.addf %534, %535 : vector<8x128xf32>
    %cst_415 = arith.constant 0.000000e+00 : f32
    %537 = vector.broadcast %cst_415 : f32 to vector<8x128xf32>
    %538 = arith.maximumf %536, %537 : vector<8x128xf32>
    %539 = vector.broadcast %529 : vector<1x128xf32> to vector<8x128xf32>
    %540 = arith.mulf %488, %539 : vector<8x128xf32>
    %541 = vector.broadcast %532 : vector<1x128xf32> to vector<8x128xf32>
    %542 = arith.addf %540, %541 : vector<8x128xf32>
    %cst_416 = arith.constant 0.000000e+00 : f32
    %543 = vector.broadcast %cst_416 : f32 to vector<8x128xf32>
    %544 = arith.maximumf %542, %543 : vector<8x128xf32>
    %c0_417 = arith.constant 0 : index
    %c1_418 = arith.constant 1 : index
    %c0_419 = arith.constant 0 : index
    %545 = vector.load %arg33[%c0_417, %c1_418, %c0_419] : memref<2x10x128xf32, #tpu.memory_space<vmem>>, vector<1x8x128xf32>
    %546 = vector.shape_cast %545 : vector<1x8x128xf32> to vector<8x128xf32>
    %547 = vector.shape_cast %538 : vector<8x128xf32> to vector<1x8x128xf32>
    tpu.vector_store %arg33[%c0_417, %c1_418, %c0_419], %547 {strides = array<i32>} : memref<2x10x128xf32, #tpu.memory_space<vmem>>, vector<1x8x128xf32>,
    %c1_420 = arith.constant 1 : index
    %c1_421 = arith.constant 1 : index
    %c0_422 = arith.constant 0 : index
    %548 = vector.load %arg33[%c1_420, %c1_421, %c0_422] : memref<2x10x128xf32, #tpu.memory_space<vmem>>, vector<1x8x128xf32>
    %549 = vector.shape_cast %548 : vector<1x8x128xf32> to vector<8x128xf32>
    %550 = vector.shape_cast %544 : vector<8x128xf32> to vector<1x8x128xf32>
    tpu.vector_store %arg33[%c1_420, %c1_421, %c0_422], %550 {strides = array<i32>} : memref<2x10x128xf32, #tpu.memory_space<vmem>>, vector<1x8x128xf32>,
    %c0_423 = arith.constant 0 : index
    %c0_424 = arith.constant 0 : index
    %c0_425 = arith.constant 0 : index
    %551 = vector.load %arg15[%c0_423, %c0_424, %c0_425] : memref<3x128x128xbf16, #tpu.memory_space<vmem>>, vector<1x128x128xbf16>
    %552 = vector.shape_cast %551 : vector<1x128x128xbf16> to vector<128x128xbf16>
    %c1_426 = arith.constant 1 : index
    %c0_427 = arith.constant 0 : index
    %c0_428 = arith.constant 0 : index
    %553 = vector.load %arg15[%c1_426, %c0_427, %c0_428] : memref<3x128x128xbf16, #tpu.memory_space<vmem>>, vector<1x128x128xbf16>
    %554 = vector.shape_cast %553 : vector<1x128x128xbf16> to vector<128x128xbf16>
    %c2_429 = arith.constant 2 : index
    %c0_430 = arith.constant 0 : index
    %c0_431 = arith.constant 0 : index
    %555 = vector.load %arg15[%c2_429, %c0_430, %c0_431] : memref<3x128x128xbf16, #tpu.memory_space<vmem>>, vector<1x128x128xbf16>
    %556 = vector.shape_cast %555 : vector<1x128x128xbf16> to vector<128x128xbf16>
    %c0_432 = arith.constant 0 : index
    %c0_433 = arith.constant 0 : index
    %557 = vector.load %arg16[%c0_432, %c0_433] : memref<1x128xf32, #tpu.memory_space<vmem>>, vector<1x128xf32>
    %c0_434 = arith.constant 0 : index
    %c0_435 = arith.constant 0 : index
    %c0_436 = arith.constant 0 : index
    %558 = vector.load %arg33[%c0_434, %c0_435, %c0_436] : memref<2x10x128xf32, #tpu.memory_space<vmem>>, vector<1x8x128xf32>
    %559 = vector.shape_cast %558 : vector<1x8x128xf32> to vector<8x128xf32>
    %560 = arith.truncf %559 : vector<8x128xf32> to vector<8x128xbf16>
    %cst_437 = arith.constant dense<0.000000e+00> : vector<8x128xf32>
    %561 = tpu.matmul %560, %552, %cst_437 {dimension_numbers = #tpu.dot_dimension_numbers<[1], [0], [0], [1], [0, 0, 1, 1], [], []>} : vector<8x128xbf16>, vector<128x128xbf16>, vector<8x128xf32> -> vector<8x128xf32>
    %c0_438 = arith.constant 0 : index
    %c1_439 = arith.constant 1 : index
    %c0_440 = arith.constant 0 : index
    %562 = vector.load %arg33[%c0_438, %c1_439, %c0_440] : memref<2x10x128xf32, #tpu.memory_space<vmem>>, vector<1x8x128xf32>
    %563 = vector.shape_cast %562 : vector<1x8x128xf32> to vector<8x128xf32>
    %564 = arith.truncf %563 : vector<8x128xf32> to vector<8x128xbf16>
    %cst_441 = arith.constant dense<0.000000e+00> : vector<8x128xf32>
    %565 = tpu.matmul %564, %554, %cst_441 {dimension_numbers = #tpu.dot_dimension_numbers<[1], [0], [0], [1], [0, 0, 1, 1], [], []>} : vector<8x128xbf16>, vector<128x128xbf16>, vector<8x128xf32> -> vector<8x128xf32>
    %566 = arith.addf %561, %565 : vector<8x128xf32>
    %c0_442 = arith.constant 0 : index
    %c2_443 = arith.constant 2 : index
    %c0_444 = arith.constant 0 : index
    %567 = vector.load %arg33[%c0_442, %c2_443, %c0_444] : memref<2x10x128xf32, #tpu.memory_space<vmem>>, vector<1x8x128xf32>
    %568 = vector.shape_cast %567 : vector<1x8x128xf32> to vector<8x128xf32>
    %569 = arith.truncf %568 : vector<8x128xf32> to vector<8x128xbf16>
    %cst_445 = arith.constant dense<0.000000e+00> : vector<8x128xf32>
    %570 = tpu.matmul %569, %556, %cst_445 {dimension_numbers = #tpu.dot_dimension_numbers<[1], [0], [0], [1], [0, 0, 1, 1], [], []>} : vector<8x128xbf16>, vector<128x128xbf16>, vector<8x128xf32> -> vector<8x128xf32>
    %571 = arith.addf %566, %570 : vector<8x128xf32>
    %572 = vector.broadcast %557 : vector<1x128xf32> to vector<8x128xf32>
    %573 = arith.addf %571, %572 : vector<8x128xf32>
    %c1_446 = arith.constant 1 : index
    %c0_447 = arith.constant 0 : index
    %c0_448 = arith.constant 0 : index
    %574 = vector.load %arg33[%c1_446, %c0_447, %c0_448] : memref<2x10x128xf32, #tpu.memory_space<vmem>>, vector<1x8x128xf32>
    %575 = vector.shape_cast %574 : vector<1x8x128xf32> to vector<8x128xf32>
    %576 = arith.truncf %575 : vector<8x128xf32> to vector<8x128xbf16>
    %cst_449 = arith.constant dense<0.000000e+00> : vector<8x128xf32>
    %577 = tpu.matmul %576, %552, %cst_449 {dimension_numbers = #tpu.dot_dimension_numbers<[1], [0], [0], [1], [0, 0, 1, 1], [], []>} : vector<8x128xbf16>, vector<128x128xbf16>, vector<8x128xf32> -> vector<8x128xf32>
    %c1_450 = arith.constant 1 : index
    %c1_451 = arith.constant 1 : index
    %c0_452 = arith.constant 0 : index
    %578 = vector.load %arg33[%c1_450, %c1_451, %c0_452] : memref<2x10x128xf32, #tpu.memory_space<vmem>>, vector<1x8x128xf32>
    %579 = vector.shape_cast %578 : vector<1x8x128xf32> to vector<8x128xf32>
    %580 = arith.truncf %579 : vector<8x128xf32> to vector<8x128xbf16>
    %cst_453 = arith.constant dense<0.000000e+00> : vector<8x128xf32>
    %581 = tpu.matmul %580, %554, %cst_453 {dimension_numbers = #tpu.dot_dimension_numbers<[1], [0], [0], [1], [0, 0, 1, 1], [], []>} : vector<8x128xbf16>, vector<128x128xbf16>, vector<8x128xf32> -> vector<8x128xf32>
    %582 = arith.addf %577, %581 : vector<8x128xf32>
    %c1_454 = arith.constant 1 : index
    %c2_455 = arith.constant 2 : index
    %c0_456 = arith.constant 0 : index
    %583 = vector.load %arg33[%c1_454, %c2_455, %c0_456] : memref<2x10x128xf32, #tpu.memory_space<vmem>>, vector<1x8x128xf32>
    %584 = vector.shape_cast %583 : vector<1x8x128xf32> to vector<8x128xf32>
    %585 = arith.truncf %584 : vector<8x128xf32> to vector<8x128xbf16>
    %cst_457 = arith.constant dense<0.000000e+00> : vector<8x128xf32>
    %586 = tpu.matmul %585, %556, %cst_457 {dimension_numbers = #tpu.dot_dimension_numbers<[1], [0], [0], [1], [0, 0, 1, 1], [], []>} : vector<8x128xbf16>, vector<128x128xbf16>, vector<8x128xf32> -> vector<8x128xf32>
    %587 = arith.addf %582, %586 : vector<8x128xf32>
    %588 = vector.broadcast %557 : vector<1x128xf32> to vector<8x128xf32>
    %589 = arith.addf %587, %588 : vector<8x128xf32>
    %cst_458 = arith.constant 0.000000e+00 : f32
    %590 = vector.broadcast %cst_458 : f32 to vector<1x128xf32>
    %cst_459 = arith.constant 0.000000e+00 : f32
    %591 = vector.broadcast %cst_459 : f32 to vector<1x128xf32>
    %cst_460 = arith.constant dense<0.000000e+00> : vector<128xf32>
    %592 = vector.multi_reduction <add>, %573, %cst_460 [0] : vector<8x128xf32> to vector<128xf32>
    %593 = vector.shape_cast %592 : vector<128xf32> to vector<1x128xf32>
    %594 = arith.addf %590, %593 : vector<1x128xf32>
    %595 = arith.mulf %573, %573 : vector<8x128xf32>
    %cst_461 = arith.constant dense<0.000000e+00> : vector<128xf32>
    %596 = vector.multi_reduction <add>, %595, %cst_461 [0] : vector<8x128xf32> to vector<128xf32>
    %597 = vector.shape_cast %596 : vector<128xf32> to vector<1x128xf32>
    %598 = arith.addf %591, %597 : vector<1x128xf32>
    %cst_462 = arith.constant dense<0.000000e+00> : vector<128xf32>
    %599 = vector.multi_reduction <add>, %589, %cst_462 [0] : vector<8x128xf32> to vector<128xf32>
    %600 = vector.shape_cast %599 : vector<128xf32> to vector<1x128xf32>
    %601 = arith.addf %594, %600 : vector<1x128xf32>
    %602 = arith.mulf %589, %589 : vector<8x128xf32>
    %cst_463 = arith.constant dense<0.000000e+00> : vector<128xf32>
    %603 = vector.multi_reduction <add>, %602, %cst_463 [0] : vector<8x128xf32> to vector<128xf32>
    %604 = vector.shape_cast %603 : vector<128xf32> to vector<1x128xf32>
    %605 = arith.addf %598, %604 : vector<1x128xf32>
    %c16_i32_464 = arith.constant 16 : i32
    %606 = tpu.dynamic_rotate %601 by %c16_i32_464 dim 1 : vector<1x128xf32>, i32 -> vector<1x128xf32>
    %607 = arith.addf %601, %606 : vector<1x128xf32>
    %c16_i32_465 = arith.constant 16 : i32
    %608 = tpu.dynamic_rotate %605 by %c16_i32_465 dim 1 : vector<1x128xf32>, i32 -> vector<1x128xf32>
    %609 = arith.addf %605, %608 : vector<1x128xf32>
    %c32_i32_466 = arith.constant 32 : i32
    %610 = tpu.dynamic_rotate %607 by %c32_i32_466 dim 1 : vector<1x128xf32>, i32 -> vector<1x128xf32>
    %611 = arith.addf %607, %610 : vector<1x128xf32>
    %c32_i32_467 = arith.constant 32 : i32
    %612 = tpu.dynamic_rotate %609 by %c32_i32_467 dim 1 : vector<1x128xf32>, i32 -> vector<1x128xf32>
    %613 = arith.addf %609, %612 : vector<1x128xf32>
    %c64_i32_468 = arith.constant 64 : i32
    %614 = tpu.dynamic_rotate %611 by %c64_i32_468 dim 1 : vector<1x128xf32>, i32 -> vector<1x128xf32>
    %615 = arith.addf %611, %614 : vector<1x128xf32>
    %c64_i32_469 = arith.constant 64 : i32
    %616 = tpu.dynamic_rotate %613 by %c64_i32_469 dim 1 : vector<1x128xf32>, i32 -> vector<1x128xf32>
    %617 = arith.addf %613, %616 : vector<1x128xf32>
    %cst_470 = arith.constant 7.812500e-03 : f32
    %618 = vector.broadcast %cst_470 : f32 to vector<1x128xf32>
    %619 = arith.mulf %615, %618 : vector<1x128xf32>
    %cst_471 = arith.constant 7.812500e-03 : f32
    %620 = vector.broadcast %cst_471 : f32 to vector<1x128xf32>
    %621 = arith.mulf %617, %620 : vector<1x128xf32>
    %622 = arith.mulf %619, %619 : vector<1x128xf32>
    %623 = arith.subf %621, %622 : vector<1x128xf32>
    %cst_472 = arith.constant 0.000000e+00 : f32
    %624 = vector.broadcast %cst_472 : f32 to vector<1x128xf32>
    %625 = arith.maximumf %623, %624 : vector<1x128xf32>
    %c0_473 = arith.constant 0 : index
    %c0_474 = arith.constant 0 : index
    %626 = vector.load %arg17[%c0_473, %c0_474] : memref<1x128xf32, #tpu.memory_space<vmem>>, vector<1x128xf32>
    %cst_475 = arith.constant 9.99999974E-6 : f32
    %627 = vector.broadcast %cst_475 : f32 to vector<1x128xf32>
    %628 = arith.addf %625, %627 : vector<1x128xf32>
    %629 = math.rsqrt %628 : vector<1x128xf32>
    %630 = arith.mulf %626, %629 : vector<1x128xf32>
    %c0_476 = arith.constant 0 : index
    %c0_477 = arith.constant 0 : index
    %631 = vector.load %arg18[%c0_476, %c0_477] : memref<1x128xf32, #tpu.memory_space<vmem>>, vector<1x128xf32>
    %632 = arith.mulf %619, %630 : vector<1x128xf32>
    %633 = arith.subf %631, %632 : vector<1x128xf32>
    %634 = vector.broadcast %630 : vector<1x128xf32> to vector<8x128xf32>
    %635 = arith.mulf %573, %634 : vector<8x128xf32>
    %636 = vector.broadcast %633 : vector<1x128xf32> to vector<8x128xf32>
    %637 = arith.addf %635, %636 : vector<8x128xf32>
    %cst_478 = arith.constant 0.000000e+00 : f32
    %638 = vector.broadcast %cst_478 : f32 to vector<8x128xf32>
    %639 = arith.maximumf %637, %638 : vector<8x128xf32>
    %640 = vector.broadcast %630 : vector<1x128xf32> to vector<8x128xf32>
    %641 = arith.mulf %589, %640 : vector<8x128xf32>
    %642 = vector.broadcast %633 : vector<1x128xf32> to vector<8x128xf32>
    %643 = arith.addf %641, %642 : vector<8x128xf32>
    %cst_479 = arith.constant 0.000000e+00 : f32
    %644 = vector.broadcast %cst_479 : f32 to vector<8x128xf32>
    %645 = arith.maximumf %643, %644 : vector<8x128xf32>
    %c0_480 = arith.constant 0 : index
    %c1_481 = arith.constant 1 : index
    %c0_482 = arith.constant 0 : index
    %646 = vector.load %arg34[%c0_480, %c1_481, %c0_482] : memref<2x10x128xf32, #tpu.memory_space<vmem>>, vector<1x8x128xf32>
    %647 = vector.shape_cast %646 : vector<1x8x128xf32> to vector<8x128xf32>
    %648 = vector.shape_cast %639 : vector<8x128xf32> to vector<1x8x128xf32>
    tpu.vector_store %arg34[%c0_480, %c1_481, %c0_482], %648 {strides = array<i32>} : memref<2x10x128xf32, #tpu.memory_space<vmem>>, vector<1x8x128xf32>,
    %c1_483 = arith.constant 1 : index
    %c1_484 = arith.constant 1 : index
    %c0_485 = arith.constant 0 : index
    %649 = vector.load %arg34[%c1_483, %c1_484, %c0_485] : memref<2x10x128xf32, #tpu.memory_space<vmem>>, vector<1x8x128xf32>
    %650 = vector.shape_cast %649 : vector<1x8x128xf32> to vector<8x128xf32>
    %651 = vector.shape_cast %645 : vector<8x128xf32> to vector<1x8x128xf32>
    tpu.vector_store %arg34[%c1_483, %c1_484, %c0_485], %651 {strides = array<i32>} : memref<2x10x128xf32, #tpu.memory_space<vmem>>, vector<1x8x128xf32>,
    %c0_486 = arith.constant 0 : index
    %c0_487 = arith.constant 0 : index
    %c0_488 = arith.constant 0 : index
    %652 = vector.load %arg19[%c0_486, %c0_487, %c0_488] : memref<3x128x128xbf16, #tpu.memory_space<vmem>>, vector<1x128x128xbf16>
    %653 = vector.shape_cast %652 : vector<1x128x128xbf16> to vector<128x128xbf16>
    %c1_489 = arith.constant 1 : index
    %c0_490 = arith.constant 0 : index
    %c0_491 = arith.constant 0 : index
    %654 = vector.load %arg19[%c1_489, %c0_490, %c0_491] : memref<3x128x128xbf16, #tpu.memory_space<vmem>>, vector<1x128x128xbf16>
    %655 = vector.shape_cast %654 : vector<1x128x128xbf16> to vector<128x128xbf16>
    %c2_492 = arith.constant 2 : index
    %c0_493 = arith.constant 0 : index
    %c0_494 = arith.constant 0 : index
    %656 = vector.load %arg19[%c2_492, %c0_493, %c0_494] : memref<3x128x128xbf16, #tpu.memory_space<vmem>>, vector<1x128x128xbf16>
    %657 = vector.shape_cast %656 : vector<1x128x128xbf16> to vector<128x128xbf16>
    %c0_495 = arith.constant 0 : index
    %c0_496 = arith.constant 0 : index
    %658 = vector.load %arg20[%c0_495, %c0_496] : memref<1x128xf32, #tpu.memory_space<vmem>>, vector<1x128xf32>
    %c0_497 = arith.constant 0 : index
    %c0_498 = arith.constant 0 : index
    %c0_499 = arith.constant 0 : index
    %659 = vector.load %arg34[%c0_497, %c0_498, %c0_499] : memref<2x10x128xf32, #tpu.memory_space<vmem>>, vector<1x8x128xf32>
    %660 = vector.shape_cast %659 : vector<1x8x128xf32> to vector<8x128xf32>
    %661 = arith.truncf %660 : vector<8x128xf32> to vector<8x128xbf16>
    %cst_500 = arith.constant dense<0.000000e+00> : vector<8x128xf32>
    %662 = tpu.matmul %661, %653, %cst_500 {dimension_numbers = #tpu.dot_dimension_numbers<[1], [0], [0], [1], [0, 0, 1, 1], [], []>} : vector<8x128xbf16>, vector<128x128xbf16>, vector<8x128xf32> -> vector<8x128xf32>
    %c0_501 = arith.constant 0 : index
    %c1_502 = arith.constant 1 : index
    %c0_503 = arith.constant 0 : index
    %663 = vector.load %arg34[%c0_501, %c1_502, %c0_503] : memref<2x10x128xf32, #tpu.memory_space<vmem>>, vector<1x8x128xf32>
    %664 = vector.shape_cast %663 : vector<1x8x128xf32> to vector<8x128xf32>
    %665 = arith.truncf %664 : vector<8x128xf32> to vector<8x128xbf16>
    %cst_504 = arith.constant dense<0.000000e+00> : vector<8x128xf32>
    %666 = tpu.matmul %665, %655, %cst_504 {dimension_numbers = #tpu.dot_dimension_numbers<[1], [0], [0], [1], [0, 0, 1, 1], [], []>} : vector<8x128xbf16>, vector<128x128xbf16>, vector<8x128xf32> -> vector<8x128xf32>
    %667 = arith.addf %662, %666 : vector<8x128xf32>
    %c0_505 = arith.constant 0 : index
    %c2_506 = arith.constant 2 : index
    %c0_507 = arith.constant 0 : index
    %668 = vector.load %arg34[%c0_505, %c2_506, %c0_507] : memref<2x10x128xf32, #tpu.memory_space<vmem>>, vector<1x8x128xf32>
    %669 = vector.shape_cast %668 : vector<1x8x128xf32> to vector<8x128xf32>
    %670 = arith.truncf %669 : vector<8x128xf32> to vector<8x128xbf16>
    %cst_508 = arith.constant dense<0.000000e+00> : vector<8x128xf32>
    %671 = tpu.matmul %670, %657, %cst_508 {dimension_numbers = #tpu.dot_dimension_numbers<[1], [0], [0], [1], [0, 0, 1, 1], [], []>} : vector<8x128xbf16>, vector<128x128xbf16>, vector<8x128xf32> -> vector<8x128xf32>
    %672 = arith.addf %667, %671 : vector<8x128xf32>
    %673 = vector.broadcast %658 : vector<1x128xf32> to vector<8x128xf32>
    %674 = arith.addf %672, %673 : vector<8x128xf32>
    %c1_509 = arith.constant 1 : index
    %c0_510 = arith.constant 0 : index
    %c0_511 = arith.constant 0 : index
    %675 = vector.load %arg34[%c1_509, %c0_510, %c0_511] : memref<2x10x128xf32, #tpu.memory_space<vmem>>, vector<1x8x128xf32>
    %676 = vector.shape_cast %675 : vector<1x8x128xf32> to vector<8x128xf32>
    %677 = arith.truncf %676 : vector<8x128xf32> to vector<8x128xbf16>
    %cst_512 = arith.constant dense<0.000000e+00> : vector<8x128xf32>
    %678 = tpu.matmul %677, %653, %cst_512 {dimension_numbers = #tpu.dot_dimension_numbers<[1], [0], [0], [1], [0, 0, 1, 1], [], []>} : vector<8x128xbf16>, vector<128x128xbf16>, vector<8x128xf32> -> vector<8x128xf32>
    %c1_513 = arith.constant 1 : index
    %c1_514 = arith.constant 1 : index
    %c0_515 = arith.constant 0 : index
    %679 = vector.load %arg34[%c1_513, %c1_514, %c0_515] : memref<2x10x128xf32, #tpu.memory_space<vmem>>, vector<1x8x128xf32>
    %680 = vector.shape_cast %679 : vector<1x8x128xf32> to vector<8x128xf32>
    %681 = arith.truncf %680 : vector<8x128xf32> to vector<8x128xbf16>
    %cst_516 = arith.constant dense<0.000000e+00> : vector<8x128xf32>
    %682 = tpu.matmul %681, %655, %cst_516 {dimension_numbers = #tpu.dot_dimension_numbers<[1], [0], [0], [1], [0, 0, 1, 1], [], []>} : vector<8x128xbf16>, vector<128x128xbf16>, vector<8x128xf32> -> vector<8x128xf32>
    %683 = arith.addf %678, %682 : vector<8x128xf32>
    %c1_517 = arith.constant 1 : index
    %c2_518 = arith.constant 2 : index
    %c0_519 = arith.constant 0 : index
    %684 = vector.load %arg34[%c1_517, %c2_518, %c0_519] : memref<2x10x128xf32, #tpu.memory_space<vmem>>, vector<1x8x128xf32>
    %685 = vector.shape_cast %684 : vector<1x8x128xf32> to vector<8x128xf32>
    %686 = arith.truncf %685 : vector<8x128xf32> to vector<8x128xbf16>
    %cst_520 = arith.constant dense<0.000000e+00> : vector<8x128xf32>
    %687 = tpu.matmul %686, %657, %cst_520 {dimension_numbers = #tpu.dot_dimension_numbers<[1], [0], [0], [1], [0, 0, 1, 1], [], []>} : vector<8x128xbf16>, vector<128x128xbf16>, vector<8x128xf32> -> vector<8x128xf32>
    %688 = arith.addf %683, %687 : vector<8x128xf32>
    %689 = vector.broadcast %658 : vector<1x128xf32> to vector<8x128xf32>
    %690 = arith.addf %688, %689 : vector<8x128xf32>
    %c0_521 = arith.constant 0 : index
    %c1_522 = arith.constant 1 : index
    %c0_523 = arith.constant 0 : index
    %691 = vector.load %arg33[%c0_521, %c1_522, %c0_523] : memref<2x10x128xf32, #tpu.memory_space<vmem>>, vector<1x8x128xf32>
    %692 = vector.shape_cast %691 : vector<1x8x128xf32> to vector<8x128xf32>
    %693 = arith.addf %674, %692 : vector<8x128xf32>
    %c1_524 = arith.constant 1 : index
    %c1_525 = arith.constant 1 : index
    %c0_526 = arith.constant 0 : index
    %694 = vector.load %arg33[%c1_524, %c1_525, %c0_526] : memref<2x10x128xf32, #tpu.memory_space<vmem>>, vector<1x8x128xf32>
    %695 = vector.shape_cast %694 : vector<1x8x128xf32> to vector<8x128xf32>
    %696 = arith.addf %690, %695 : vector<8x128xf32>
    %cst_527 = arith.constant 0.000000e+00 : f32
    %697 = vector.broadcast %cst_527 : f32 to vector<1x128xf32>
    %cst_528 = arith.constant 0.000000e+00 : f32
    %698 = vector.broadcast %cst_528 : f32 to vector<1x128xf32>
    %cst_529 = arith.constant dense<0.000000e+00> : vector<128xf32>
    %699 = vector.multi_reduction <add>, %693, %cst_529 [0] : vector<8x128xf32> to vector<128xf32>
    %700 = vector.shape_cast %699 : vector<128xf32> to vector<1x128xf32>
    %701 = arith.addf %697, %700 : vector<1x128xf32>
    %702 = arith.mulf %693, %693 : vector<8x128xf32>
    %cst_530 = arith.constant dense<0.000000e+00> : vector<128xf32>
    %703 = vector.multi_reduction <add>, %702, %cst_530 [0] : vector<8x128xf32> to vector<128xf32>
    %704 = vector.shape_cast %703 : vector<128xf32> to vector<1x128xf32>
    %705 = arith.addf %698, %704 : vector<1x128xf32>
    %cst_531 = arith.constant dense<0.000000e+00> : vector<128xf32>
    %706 = vector.multi_reduction <add>, %696, %cst_531 [0] : vector<8x128xf32> to vector<128xf32>
    %707 = vector.shape_cast %706 : vector<128xf32> to vector<1x128xf32>
    %708 = arith.addf %701, %707 : vector<1x128xf32>
    %709 = arith.mulf %696, %696 : vector<8x128xf32>
    %cst_532 = arith.constant dense<0.000000e+00> : vector<128xf32>
    %710 = vector.multi_reduction <add>, %709, %cst_532 [0] : vector<8x128xf32> to vector<128xf32>
    %711 = vector.shape_cast %710 : vector<128xf32> to vector<1x128xf32>
    %712 = arith.addf %705, %711 : vector<1x128xf32>
    %c16_i32_533 = arith.constant 16 : i32
    %713 = tpu.dynamic_rotate %708 by %c16_i32_533 dim 1 : vector<1x128xf32>, i32 -> vector<1x128xf32>
    %714 = arith.addf %708, %713 : vector<1x128xf32>
    %c16_i32_534 = arith.constant 16 : i32
    %715 = tpu.dynamic_rotate %712 by %c16_i32_534 dim 1 : vector<1x128xf32>, i32 -> vector<1x128xf32>
    %716 = arith.addf %712, %715 : vector<1x128xf32>
    %c32_i32_535 = arith.constant 32 : i32
    %717 = tpu.dynamic_rotate %714 by %c32_i32_535 dim 1 : vector<1x128xf32>, i32 -> vector<1x128xf32>
    %718 = arith.addf %714, %717 : vector<1x128xf32>
    %c32_i32_536 = arith.constant 32 : i32
    %719 = tpu.dynamic_rotate %716 by %c32_i32_536 dim 1 : vector<1x128xf32>, i32 -> vector<1x128xf32>
    %720 = arith.addf %716, %719 : vector<1x128xf32>
    %c64_i32_537 = arith.constant 64 : i32
    %721 = tpu.dynamic_rotate %718 by %c64_i32_537 dim 1 : vector<1x128xf32>, i32 -> vector<1x128xf32>
    %722 = arith.addf %718, %721 : vector<1x128xf32>
    %c64_i32_538 = arith.constant 64 : i32
    %723 = tpu.dynamic_rotate %720 by %c64_i32_538 dim 1 : vector<1x128xf32>, i32 -> vector<1x128xf32>
    %724 = arith.addf %720, %723 : vector<1x128xf32>
    %cst_539 = arith.constant 7.812500e-03 : f32
    %725 = vector.broadcast %cst_539 : f32 to vector<1x128xf32>
    %726 = arith.mulf %722, %725 : vector<1x128xf32>
    %cst_540 = arith.constant 7.812500e-03 : f32
    %727 = vector.broadcast %cst_540 : f32 to vector<1x128xf32>
    %728 = arith.mulf %724, %727 : vector<1x128xf32>
    %729 = arith.mulf %726, %726 : vector<1x128xf32>
    %730 = arith.subf %728, %729 : vector<1x128xf32>
    %cst_541 = arith.constant 0.000000e+00 : f32
    %731 = vector.broadcast %cst_541 : f32 to vector<1x128xf32>
    %732 = arith.maximumf %730, %731 : vector<1x128xf32>
    %c0_542 = arith.constant 0 : index
    %c0_543 = arith.constant 0 : index
    %733 = vector.load %arg21[%c0_542, %c0_543] : memref<1x128xf32, #tpu.memory_space<vmem>>, vector<1x128xf32>
    %cst_544 = arith.constant 9.99999974E-6 : f32
    %734 = vector.broadcast %cst_544 : f32 to vector<1x128xf32>
    %735 = arith.addf %732, %734 : vector<1x128xf32>
    %736 = math.rsqrt %735 : vector<1x128xf32>
    %737 = arith.mulf %733, %736 : vector<1x128xf32>
    %c0_545 = arith.constant 0 : index
    %c0_546 = arith.constant 0 : index
    %738 = vector.load %arg22[%c0_545, %c0_546] : memref<1x128xf32, #tpu.memory_space<vmem>>, vector<1x128xf32>
    %739 = arith.mulf %726, %737 : vector<1x128xf32>
    %740 = arith.subf %738, %739 : vector<1x128xf32>
    %741 = vector.broadcast %737 : vector<1x128xf32> to vector<8x128xf32>
    %742 = arith.mulf %693, %741 : vector<8x128xf32>
    %743 = vector.broadcast %740 : vector<1x128xf32> to vector<8x128xf32>
    %744 = arith.addf %742, %743 : vector<8x128xf32>
    %cst_547 = arith.constant 0.000000e+00 : f32
    %745 = vector.broadcast %cst_547 : f32 to vector<8x128xf32>
    %746 = arith.maximumf %744, %745 : vector<8x128xf32>
    %747 = vector.broadcast %737 : vector<1x128xf32> to vector<8x128xf32>
    %748 = arith.mulf %696, %747 : vector<8x128xf32>
    %749 = vector.broadcast %740 : vector<1x128xf32> to vector<8x128xf32>
    %750 = arith.addf %748, %749 : vector<8x128xf32>
    %cst_548 = arith.constant 0.000000e+00 : f32
    %751 = vector.broadcast %cst_548 : f32 to vector<8x128xf32>
    %752 = arith.maximumf %750, %751 : vector<8x128xf32>
    %c0_549 = arith.constant 0 : index
    %c1_550 = arith.constant 1 : index
    %c0_551 = arith.constant 0 : index
    %753 = vector.load %arg33[%c0_549, %c1_550, %c0_551] : memref<2x10x128xf32, #tpu.memory_space<vmem>>, vector<1x8x128xf32>
    %754 = vector.shape_cast %753 : vector<1x8x128xf32> to vector<8x128xf32>
    %755 = vector.shape_cast %746 : vector<8x128xf32> to vector<1x8x128xf32>
    tpu.vector_store %arg33[%c0_549, %c1_550, %c0_551], %755 {strides = array<i32>} : memref<2x10x128xf32, #tpu.memory_space<vmem>>, vector<1x8x128xf32>,
    %c1_552 = arith.constant 1 : index
    %c1_553 = arith.constant 1 : index
    %c0_554 = arith.constant 0 : index
    %756 = vector.load %arg33[%c1_552, %c1_553, %c0_554] : memref<2x10x128xf32, #tpu.memory_space<vmem>>, vector<1x8x128xf32>
    %757 = vector.shape_cast %756 : vector<1x8x128xf32> to vector<8x128xf32>
    %758 = vector.shape_cast %752 : vector<8x128xf32> to vector<1x8x128xf32>
    tpu.vector_store %arg33[%c1_552, %c1_553, %c0_554], %758 {strides = array<i32>} : memref<2x10x128xf32, #tpu.memory_space<vmem>>, vector<1x8x128xf32>,
    %c0_555 = arith.constant 0 : index
    %c0_556 = arith.constant 0 : index
    %c0_557 = arith.constant 0 : index
    %759 = vector.load %arg28[%c0_555, %c0_556, %c0_557] : memref<2x8x128xf32, #tpu.memory_space<vmem>>, vector<1x8x128xf32>
    %760 = vector.shape_cast %759 : vector<1x8x128xf32> to vector<8x128xf32>
    %761 = vector.shape_cast %746 : vector<8x128xf32> to vector<1x8x128xf32>
    tpu.vector_store %arg28[%c0_555, %c0_556, %c0_557], %761 {strides = array<i32>} : memref<2x8x128xf32, #tpu.memory_space<vmem>>, vector<1x8x128xf32>,
    %c1_558 = arith.constant 1 : index
    %c0_559 = arith.constant 0 : index
    %c0_560 = arith.constant 0 : index
    %762 = vector.load %arg28[%c1_558, %c0_559, %c0_560] : memref<2x8x128xf32, #tpu.memory_space<vmem>>, vector<1x8x128xf32>
    %763 = vector.shape_cast %762 : vector<1x8x128xf32> to vector<8x128xf32>
    %764 = vector.shape_cast %752 : vector<8x128xf32> to vector<1x8x128xf32>
    tpu.vector_store %arg28[%c1_558, %c0_559, %c0_560], %764 {strides = array<i32>} : memref<2x8x128xf32, #tpu.memory_space<vmem>>, vector<1x8x128xf32>,
    %c0_561 = arith.constant 0 : index
    %c1_562 = arith.constant 1 : index
    %c0_563 = arith.constant 0 : index
    %765 = vector.load %arg33[%c0_561, %c1_562, %c0_563] : memref<2x10x128xf32, #tpu.memory_space<vmem>>, vector<1x1x128xf32>
    %766 = vector.shape_cast %765 : vector<1x1x128xf32> to vector<1x128xf32>
    %c0_564 = arith.constant 0 : index
    %c2_565 = arith.constant 2 : index
    %c0_566 = arith.constant 0 : index
    %767 = vector.load %arg33[%c0_564, %c2_565, %c0_566] : memref<2x10x128xf32, #tpu.memory_space<vmem>>, vector<1x1x128xf32>
    %768 = vector.shape_cast %767 : vector<1x1x128xf32> to vector<1x128xf32>
    %769 = arith.maximumf %766, %768 : vector<1x128xf32>
    %c0_567 = arith.constant 0 : index
    %c0_568 = arith.constant 0 : index
    %c0_569 = arith.constant 0 : index
    %770 = vector.load %arg36[%c0_567, %c0_568, %c0_569] : memref<2x4x128xf32, #tpu.memory_space<vmem>>, vector<1x1x128xf32>
    %771 = vector.shape_cast %770 : vector<1x1x128xf32> to vector<1x128xf32>
    %772 = vector.shape_cast %769 : vector<1x128xf32> to vector<1x1x128xf32>
    tpu.vector_store %arg36[%c0_567, %c0_568, %c0_569], %772 {strides = array<i32>} : memref<2x4x128xf32, #tpu.memory_space<vmem>>, vector<1x1x128xf32>,
    %c0_570 = arith.constant 0 : index
    %c3_571 = arith.constant 3 : index
    %c0_572 = arith.constant 0 : index
    %773 = vector.load %arg33[%c0_570, %c3_571, %c0_572] : memref<2x10x128xf32, #tpu.memory_space<vmem>>, vector<1x1x128xf32>
    %774 = vector.shape_cast %773 : vector<1x1x128xf32> to vector<1x128xf32>
    %c0_573 = arith.constant 0 : index
    %c4_574 = arith.constant 4 : index
    %c0_575 = arith.constant 0 : index
    %775 = vector.load %arg33[%c0_573, %c4_574, %c0_575] : memref<2x10x128xf32, #tpu.memory_space<vmem>>, vector<1x1x128xf32>
    %776 = vector.shape_cast %775 : vector<1x1x128xf32> to vector<1x128xf32>
    %777 = arith.maximumf %774, %776 : vector<1x128xf32>
    %c0_576 = arith.constant 0 : index
    %c1_577 = arith.constant 1 : index
    %c0_578 = arith.constant 0 : index
    %778 = vector.load %arg36[%c0_576, %c1_577, %c0_578] : memref<2x4x128xf32, #tpu.memory_space<vmem>>, vector<1x1x128xf32>
    %779 = vector.shape_cast %778 : vector<1x1x128xf32> to vector<1x128xf32>
    %780 = vector.shape_cast %777 : vector<1x128xf32> to vector<1x1x128xf32>
    tpu.vector_store %arg36[%c0_576, %c1_577, %c0_578], %780 {strides = array<i32>} : memref<2x4x128xf32, #tpu.memory_space<vmem>>, vector<1x1x128xf32>,
    %c0_579 = arith.constant 0 : index
    %c5_580 = arith.constant 5 : index
    %c0_581 = arith.constant 0 : index
    %781 = vector.load %arg33[%c0_579, %c5_580, %c0_581] : memref<2x10x128xf32, #tpu.memory_space<vmem>>, vector<1x1x128xf32>
    %782 = vector.shape_cast %781 : vector<1x1x128xf32> to vector<1x128xf32>
    %c0_582 = arith.constant 0 : index
    %c6_583 = arith.constant 6 : index
    %c0_584 = arith.constant 0 : index
    %783 = vector.load %arg33[%c0_582, %c6_583, %c0_584] : memref<2x10x128xf32, #tpu.memory_space<vmem>>, vector<1x1x128xf32>
    %784 = vector.shape_cast %783 : vector<1x1x128xf32> to vector<1x128xf32>
    %785 = arith.maximumf %782, %784 : vector<1x128xf32>
    %c0_585 = arith.constant 0 : index
    %c2_586 = arith.constant 2 : index
    %c0_587 = arith.constant 0 : index
    %786 = vector.load %arg36[%c0_585, %c2_586, %c0_587] : memref<2x4x128xf32, #tpu.memory_space<vmem>>, vector<1x1x128xf32>
    %787 = vector.shape_cast %786 : vector<1x1x128xf32> to vector<1x128xf32>
    %788 = vector.shape_cast %785 : vector<1x128xf32> to vector<1x1x128xf32>
    tpu.vector_store %arg36[%c0_585, %c2_586, %c0_587], %788 {strides = array<i32>} : memref<2x4x128xf32, #tpu.memory_space<vmem>>, vector<1x1x128xf32>,
    %c0_588 = arith.constant 0 : index
    %c7_589 = arith.constant 7 : index
    %c0_590 = arith.constant 0 : index
    %789 = vector.load %arg33[%c0_588, %c7_589, %c0_590] : memref<2x10x128xf32, #tpu.memory_space<vmem>>, vector<1x1x128xf32>
    %790 = vector.shape_cast %789 : vector<1x1x128xf32> to vector<1x128xf32>
    %c0_591 = arith.constant 0 : index
    %c8_592 = arith.constant 8 : index
    %c0_593 = arith.constant 0 : index
    %791 = vector.load %arg33[%c0_591, %c8_592, %c0_593] : memref<2x10x128xf32, #tpu.memory_space<vmem>>, vector<1x1x128xf32>
    %792 = vector.shape_cast %791 : vector<1x1x128xf32> to vector<1x128xf32>
    %793 = arith.maximumf %790, %792 : vector<1x128xf32>
    %c0_594 = arith.constant 0 : index
    %c3_595 = arith.constant 3 : index
    %c0_596 = arith.constant 0 : index
    %794 = vector.load %arg36[%c0_594, %c3_595, %c0_596] : memref<2x4x128xf32, #tpu.memory_space<vmem>>, vector<1x1x128xf32>
    %795 = vector.shape_cast %794 : vector<1x1x128xf32> to vector<1x128xf32>
    %796 = vector.shape_cast %793 : vector<1x128xf32> to vector<1x1x128xf32>
    tpu.vector_store %arg36[%c0_594, %c3_595, %c0_596], %796 {strides = array<i32>} : memref<2x4x128xf32, #tpu.memory_space<vmem>>, vector<1x1x128xf32>,
    %c1_597 = arith.constant 1 : index
    %c1_598 = arith.constant 1 : index
    %c0_599 = arith.constant 0 : index
    %797 = vector.load %arg33[%c1_597, %c1_598, %c0_599] : memref<2x10x128xf32, #tpu.memory_space<vmem>>, vector<1x1x128xf32>
    %798 = vector.shape_cast %797 : vector<1x1x128xf32> to vector<1x128xf32>
    %c1_600 = arith.constant 1 : index
    %c2_601 = arith.constant 2 : index
    %c0_602 = arith.constant 0 : index
    %799 = vector.load %arg33[%c1_600, %c2_601, %c0_602] : memref<2x10x128xf32, #tpu.memory_space<vmem>>, vector<1x1x128xf32>
    %800 = vector.shape_cast %799 : vector<1x1x128xf32> to vector<1x128xf32>
    %801 = arith.maximumf %798, %800 : vector<1x128xf32>
    %c1_603 = arith.constant 1 : index
    %c0_604 = arith.constant 0 : index
    %c0_605 = arith.constant 0 : index
    %802 = vector.load %arg36[%c1_603, %c0_604, %c0_605] : memref<2x4x128xf32, #tpu.memory_space<vmem>>, vector<1x1x128xf32>
    %803 = vector.shape_cast %802 : vector<1x1x128xf32> to vector<1x128xf32>
    %804 = vector.shape_cast %801 : vector<1x128xf32> to vector<1x1x128xf32>
    tpu.vector_store %arg36[%c1_603, %c0_604, %c0_605], %804 {strides = array<i32>} : memref<2x4x128xf32, #tpu.memory_space<vmem>>, vector<1x1x128xf32>,
    %c1_606 = arith.constant 1 : index
    %c3_607 = arith.constant 3 : index
    %c0_608 = arith.constant 0 : index
    %805 = vector.load %arg33[%c1_606, %c3_607, %c0_608] : memref<2x10x128xf32, #tpu.memory_space<vmem>>, vector<1x1x128xf32>
    %806 = vector.shape_cast %805 : vector<1x1x128xf32> to vector<1x128xf32>
    %c1_609 = arith.constant 1 : index
    %c4_610 = arith.constant 4 : index
    %c0_611 = arith.constant 0 : index
    %807 = vector.load %arg33[%c1_609, %c4_610, %c0_611] : memref<2x10x128xf32, #tpu.memory_space<vmem>>, vector<1x1x128xf32>
    %808 = vector.shape_cast %807 : vector<1x1x128xf32> to vector<1x128xf32>
    %809 = arith.maximumf %806, %808 : vector<1x128xf32>
    %c1_612 = arith.constant 1 : index
    %c1_613 = arith.constant 1 : index
    %c0_614 = arith.constant 0 : index
    %810 = vector.load %arg36[%c1_612, %c1_613, %c0_614] : memref<2x4x128xf32, #tpu.memory_space<vmem>>, vector<1x1x128xf32>
    %811 = vector.shape_cast %810 : vector<1x1x128xf32> to vector<1x128xf32>
    %812 = vector.shape_cast %809 : vector<1x128xf32> to vector<1x1x128xf32>
    tpu.vector_store %arg36[%c1_612, %c1_613, %c0_614], %812 {strides = array<i32>} : memref<2x4x128xf32, #tpu.memory_space<vmem>>, vector<1x1x128xf32>,
    %c1_615 = arith.constant 1 : index
    %c5_616 = arith.constant 5 : index
    %c0_617 = arith.constant 0 : index
    %813 = vector.load %arg33[%c1_615, %c5_616, %c0_617] : memref<2x10x128xf32, #tpu.memory_space<vmem>>, vector<1x1x128xf32>
    %814 = vector.shape_cast %813 : vector<1x1x128xf32> to vector<1x128xf32>
    %c1_618 = arith.constant 1 : index
    %c6_619 = arith.constant 6 : index
    %c0_620 = arith.constant 0 : index
    %815 = vector.load %arg33[%c1_618, %c6_619, %c0_620] : memref<2x10x128xf32, #tpu.memory_space<vmem>>, vector<1x1x128xf32>
    %816 = vector.shape_cast %815 : vector<1x1x128xf32> to vector<1x128xf32>
    %817 = arith.maximumf %814, %816 : vector<1x128xf32>
    %c1_621 = arith.constant 1 : index
    %c2_622 = arith.constant 2 : index
    %c0_623 = arith.constant 0 : index
    %818 = vector.load %arg36[%c1_621, %c2_622, %c0_623] : memref<2x4x128xf32, #tpu.memory_space<vmem>>, vector<1x1x128xf32>
    %819 = vector.shape_cast %818 : vector<1x1x128xf32> to vector<1x128xf32>
    %820 = vector.shape_cast %817 : vector<1x128xf32> to vector<1x1x128xf32>
    tpu.vector_store %arg36[%c1_621, %c2_622, %c0_623], %820 {strides = array<i32>} : memref<2x4x128xf32, #tpu.memory_space<vmem>>, vector<1x1x128xf32>,
    %c1_624 = arith.constant 1 : index
    %c7_625 = arith.constant 7 : index
    %c0_626 = arith.constant 0 : index
    %821 = vector.load %arg33[%c1_624, %c7_625, %c0_626] : memref<2x10x128xf32, #tpu.memory_space<vmem>>, vector<1x1x128xf32>
    %822 = vector.shape_cast %821 : vector<1x1x128xf32> to vector<1x128xf32>
    %c1_627 = arith.constant 1 : index
    %c8_628 = arith.constant 8 : index
    %c0_629 = arith.constant 0 : index
    %823 = vector.load %arg33[%c1_627, %c8_628, %c0_629] : memref<2x10x128xf32, #tpu.memory_space<vmem>>, vector<1x1x128xf32>
    %824 = vector.shape_cast %823 : vector<1x1x128xf32> to vector<1x128xf32>
    %825 = arith.maximumf %822, %824 : vector<1x128xf32>
    %c1_630 = arith.constant 1 : index
    %c3_631 = arith.constant 3 : index
    %c0_632 = arith.constant 0 : index
    %826 = vector.load %arg36[%c1_630, %c3_631, %c0_632] : memref<2x4x128xf32, #tpu.memory_space<vmem>>, vector<1x1x128xf32>
    %827 = vector.shape_cast %826 : vector<1x1x128xf32> to vector<1x128xf32>
    %828 = vector.shape_cast %825 : vector<1x128xf32> to vector<1x1x128xf32>
    tpu.vector_store %arg36[%c1_630, %c3_631, %c0_632], %828 {strides = array<i32>} : memref<2x4x128xf32, #tpu.memory_space<vmem>>, vector<1x1x128xf32>,
    %c0_633 = arith.constant 0 : index
    %c0_634 = arith.constant 0 : index
    %c0_635 = arith.constant 0 : index
    %829 = vector.load %arg23[%c0_633, %c0_634, %c0_635] : memref<1x128x128xbf16, #tpu.memory_space<vmem>>, vector<1x128x128xbf16>
    %830 = vector.shape_cast %829 : vector<1x128x128xbf16> to vector<128x128xbf16>
    %c0_636 = arith.constant 0 : index
    %c0_637 = arith.constant 0 : index
    %831 = vector.load %arg24[%c0_636, %c0_637] : memref<1x128xf32, #tpu.memory_space<vmem>>, vector<1x128xf32>
    %c0_638 = arith.constant 0 : index
    %c0_639 = arith.constant 0 : index
    %c0_640 = arith.constant 0 : index
    %832 = vector.load %arg36[%c0_638, %c0_639, %c0_640] : memref<2x4x128xf32, #tpu.memory_space<vmem>>, vector<1x4x128xf32>
    %833 = vector.shape_cast %832 : vector<1x4x128xf32> to vector<4x128xf32>
    %c112_i32 = arith.constant 112 : i32
    %834 = tpu.dynamic_rotate %833 by %c112_i32 dim 1 : vector<4x128xf32>, i32 -> vector<4x128xf32>
    %835 = arith.maximumf %833, %834 : vector<4x128xf32>
    %836 = arith.truncf %835 : vector<4x128xf32> to vector<4x128xbf16>
    %cst_641 = arith.constant dense<0.000000e+00> : vector<4x128xf32>
    %837 = tpu.matmul %836, %830, %cst_641 {dimension_numbers = #tpu.dot_dimension_numbers<[1], [0], [0], [1], [0, 0, 1, 1], [], []>} : vector<4x128xbf16>, vector<128x128xbf16>, vector<4x128xf32> -> vector<4x128xf32>
    %838 = vector.broadcast %831 : vector<1x128xf32> to vector<4x128xf32>
    %839 = arith.addf %837, %838 : vector<4x128xf32>
    %c1_642 = arith.constant 1 : index
    %c0_643 = arith.constant 0 : index
    %c0_644 = arith.constant 0 : index
    %840 = vector.load %arg36[%c1_642, %c0_643, %c0_644] : memref<2x4x128xf32, #tpu.memory_space<vmem>>, vector<1x4x128xf32>
    %841 = vector.shape_cast %840 : vector<1x4x128xf32> to vector<4x128xf32>
    %c112_i32_645 = arith.constant 112 : i32
    %842 = tpu.dynamic_rotate %841 by %c112_i32_645 dim 1 : vector<4x128xf32>, i32 -> vector<4x128xf32>
    %843 = arith.maximumf %841, %842 : vector<4x128xf32>
    %844 = arith.truncf %843 : vector<4x128xf32> to vector<4x128xbf16>
    %cst_646 = arith.constant dense<0.000000e+00> : vector<4x128xf32>
    %845 = tpu.matmul %844, %830, %cst_646 {dimension_numbers = #tpu.dot_dimension_numbers<[1], [0], [0], [1], [0, 0, 1, 1], [], []>} : vector<4x128xbf16>, vector<128x128xbf16>, vector<4x128xf32> -> vector<4x128xf32>
    %846 = vector.broadcast %831 : vector<1x128xf32> to vector<4x128xf32>
    %847 = arith.addf %845, %846 : vector<4x128xf32>
    %cst_647 = arith.constant 0.000000e+00 : f32
    %848 = vector.broadcast %cst_647 : f32 to vector<1x128xf32>
    %cst_648 = arith.constant 0.000000e+00 : f32
    %849 = vector.broadcast %cst_648 : f32 to vector<1x128xf32>
    %cst_649 = arith.constant dense<0.000000e+00> : vector<128xf32>
    %850 = vector.multi_reduction <add>, %839, %cst_649 [0] : vector<4x128xf32> to vector<128xf32>
    %851 = vector.shape_cast %850 : vector<128xf32> to vector<1x128xf32>
    %852 = arith.addf %848, %851 : vector<1x128xf32>
    %853 = arith.mulf %839, %839 : vector<4x128xf32>
    %cst_650 = arith.constant dense<0.000000e+00> : vector<128xf32>
    %854 = vector.multi_reduction <add>, %853, %cst_650 [0] : vector<4x128xf32> to vector<128xf32>
    %855 = vector.shape_cast %854 : vector<128xf32> to vector<1x128xf32>
    %856 = arith.addf %849, %855 : vector<1x128xf32>
    %cst_651 = arith.constant dense<0.000000e+00> : vector<128xf32>
    %857 = vector.multi_reduction <add>, %847, %cst_651 [0] : vector<4x128xf32> to vector<128xf32>
    %858 = vector.shape_cast %857 : vector<128xf32> to vector<1x128xf32>
    %859 = arith.addf %852, %858 : vector<1x128xf32>
    %860 = arith.mulf %847, %847 : vector<4x128xf32>
    %cst_652 = arith.constant dense<0.000000e+00> : vector<128xf32>
    %861 = vector.multi_reduction <add>, %860, %cst_652 [0] : vector<4x128xf32> to vector<128xf32>
    %862 = vector.shape_cast %861 : vector<128xf32> to vector<1x128xf32>
    %863 = arith.addf %856, %862 : vector<1x128xf32>
    %c32_i32_653 = arith.constant 32 : i32
    %864 = tpu.dynamic_rotate %859 by %c32_i32_653 dim 1 : vector<1x128xf32>, i32 -> vector<1x128xf32>
    %865 = arith.addf %859, %864 : vector<1x128xf32>
    %c32_i32_654 = arith.constant 32 : i32
    %866 = tpu.dynamic_rotate %863 by %c32_i32_654 dim 1 : vector<1x128xf32>, i32 -> vector<1x128xf32>
    %867 = arith.addf %863, %866 : vector<1x128xf32>
    %c64_i32_655 = arith.constant 64 : i32
    %868 = tpu.dynamic_rotate %865 by %c64_i32_655 dim 1 : vector<1x128xf32>, i32 -> vector<1x128xf32>
    %869 = arith.addf %865, %868 : vector<1x128xf32>
    %c64_i32_656 = arith.constant 64 : i32
    %870 = tpu.dynamic_rotate %867 by %c64_i32_656 dim 1 : vector<1x128xf32>, i32 -> vector<1x128xf32>
    %871 = arith.addf %867, %870 : vector<1x128xf32>
    %cst_657 = arith.constant 3.125000e-02 : f32
    %872 = vector.broadcast %cst_657 : f32 to vector<1x128xf32>
    %873 = arith.mulf %869, %872 : vector<1x128xf32>
    %cst_658 = arith.constant 3.125000e-02 : f32
    %874 = vector.broadcast %cst_658 : f32 to vector<1x128xf32>
    %875 = arith.mulf %871, %874 : vector<1x128xf32>
    %876 = arith.mulf %873, %873 : vector<1x128xf32>
    %877 = arith.subf %875, %876 : vector<1x128xf32>
    %cst_659 = arith.constant 0.000000e+00 : f32
    %878 = vector.broadcast %cst_659 : f32 to vector<1x128xf32>
    %879 = arith.maximumf %877, %878 : vector<1x128xf32>
    %c0_660 = arith.constant 0 : index
    %c0_661 = arith.constant 0 : index
    %880 = vector.load %arg25[%c0_660, %c0_661] : memref<1x128xf32, #tpu.memory_space<vmem>>, vector<1x128xf32>
    %cst_662 = arith.constant 9.99999974E-6 : f32
    %881 = vector.broadcast %cst_662 : f32 to vector<1x128xf32>
    %882 = arith.addf %879, %881 : vector<1x128xf32>
    %883 = math.rsqrt %882 : vector<1x128xf32>
    %884 = arith.mulf %880, %883 : vector<1x128xf32>
    %c0_663 = arith.constant 0 : index
    %c0_664 = arith.constant 0 : index
    %885 = vector.load %arg26[%c0_663, %c0_664] : memref<1x128xf32, #tpu.memory_space<vmem>>, vector<1x128xf32>
    %886 = arith.mulf %873, %884 : vector<1x128xf32>
    %887 = arith.subf %885, %886 : vector<1x128xf32>
    %888 = vector.broadcast %884 : vector<1x128xf32> to vector<4x128xf32>
    %889 = arith.mulf %839, %888 : vector<4x128xf32>
    %890 = vector.broadcast %887 : vector<1x128xf32> to vector<4x128xf32>
    %891 = arith.addf %889, %890 : vector<4x128xf32>
    %cst_665 = arith.constant 0.000000e+00 : f32
    %892 = vector.broadcast %cst_665 : f32 to vector<4x128xf32>
    %893 = arith.maximumf %891, %892 : vector<4x128xf32>
    %894 = vector.broadcast %884 : vector<1x128xf32> to vector<4x128xf32>
    %895 = arith.mulf %847, %894 : vector<4x128xf32>
    %896 = vector.broadcast %887 : vector<1x128xf32> to vector<4x128xf32>
    %897 = arith.addf %895, %896 : vector<4x128xf32>
    %cst_666 = arith.constant 0.000000e+00 : f32
    %898 = vector.broadcast %cst_666 : f32 to vector<4x128xf32>
    %899 = arith.maximumf %897, %898 : vector<4x128xf32>
    %c0_667 = arith.constant 0 : index
    %c0_668 = arith.constant 0 : index
    %c0_669 = arith.constant 0 : index
    %900 = vector.load %arg29[%c0_667, %c0_668, %c0_669] : memref<2x4x128xf32, #tpu.memory_space<vmem>>, vector<1x4x128xf32>
    %901 = vector.shape_cast %900 : vector<1x4x128xf32> to vector<4x128xf32>
    %902 = vector.shape_cast %893 : vector<4x128xf32> to vector<1x4x128xf32>
    tpu.vector_store %arg29[%c0_667, %c0_668, %c0_669], %902 {strides = array<i32>} : memref<2x4x128xf32, #tpu.memory_space<vmem>>, vector<1x4x128xf32>,
    %c1_670 = arith.constant 1 : index
    %c0_671 = arith.constant 0 : index
    %c0_672 = arith.constant 0 : index
    %903 = vector.load %arg29[%c1_670, %c0_671, %c0_672] : memref<2x4x128xf32, #tpu.memory_space<vmem>>, vector<1x4x128xf32>
    %904 = vector.shape_cast %903 : vector<1x4x128xf32> to vector<4x128xf32>
    %905 = vector.shape_cast %899 : vector<4x128xf32> to vector<1x4x128xf32>
    tpu.vector_store %arg29[%c1_670, %c0_671, %c0_672], %905 {strides = array<i32>} : memref<2x4x128xf32, #tpu.memory_space<vmem>>, vector<1x4x128xf32>,
    return
  }
}

</mosaic_0001>

<bundles_post_ra>
// kernel: forward.1
= control target key start
LH: loop header
LB: loop body
LE: loop exit
PB: predicated region body
PF: predicated region fallthrough
CT: control target
= control target key end

     0   :  { %s3469_s6 = smov 1   ;;  %s3470_s10 = smov 2   ;;  %s3977_s0 = inlined_call_operand.smem [shape: u32[30], index: -1, kind: input, shape index: {}] }
   0x1   :  { %s3519_s5 = sld [smem:[%s3977_s0]]   ;;  %s3471_s14 = smov 3  }
   0x2   :  { %s3524_s9 = sld [smem:[%s3977_s0 + %s3469_s6]]   ;;  %s3472_s18 = smov 4  }
   0x3   :  { %s3529_s13 = sld [smem:[%s3977_s0 + %s3470_s10]]   ;;  %s3473_s22 = smov 5  }
   0x4   :  { %s3534_s17 = sld [smem:[%s3977_s0 + %s3471_s14]]   ;;  %s3474_s26 = smov 6  }
   0x5   :  { %s3539_s21 = sld [smem:[%s3977_s0 + %s3472_s18]]   ;;  %s3475_s30 = smov 7  }
   0x6   :  { %s3544_s25 = sld [smem:[%s3977_s0 + %s3473_s22]]   ;;  %s3476_s4 = smov 8  }
   0x7   :  { %s3549_s29 = sld [smem:[%s3977_s0 + %s3474_s26]]   ;;  %s3477_s10 = smov 9  }
   0x8   :  { %s3554_s3 = sld [smem:[%s3977_s0 + %s3475_s30]]   ;;  %s3478_s15 = smov 10  }
   0x9   :  { %s3559_s8 = sld [smem:[%s3977_s0 + %s3476_s4]]   ;;  %s3479_s20 = smov 11  }
   0xa   :  { %s3564_s14 = sld [smem:[%s3977_s0 + %s3477_s10]]   ;;  %s3480_s26 = smov 12  }
   0xb   :  { %s3569_s19 = sld [smem:[%s3977_s0 + %s3478_s15]]   ;;  %s3481_s1 = smov 13  }
   0xc   :  { %s3574_s24 = sld [smem:[%s3977_s0 + %s3479_s20]]   ;;  %s3482_s7 = smov 14  }
   0xd   :  { %s3579_s30 = sld [smem:[%s3977_s0 + %s3480_s26]]   ;;  %s3483_s15 = smov 15  }
   0xe   :  { %s3584_s6 = sld [smem:[%s3977_s0 + %s3481_s1]]   ;;  %s3484_s22 = smov 16  }
   0xf   :  { %s3589_s12 = sld [smem:[%s3977_s0 + %s3482_s7]]   ;;  %s3485_s28 = smov 17  }
  0x10   :  { %s3594_s20 = sld [smem:[%s3977_s0 + %s3483_s15]]   ;;  %s3486_s7 = smov 18  }
  0x11   :  { %3978 = sst [smem:[#allocation20_spill]] %s3569_s19  ;;  %s3487_s15 = smov 19  }
  0x12   :  { %s3599_s27 = sld [smem:[%s3977_s0 + %s3484_s22]]   ;;  %s3488_s22 = smov 20  }
  0x13   :  { %3979 = sst [smem:[#allocation21_spill]] %s3579_s30 }
  0x14   :  { %3980 = sst [smem:[#allocation22_spill]] %s3584_s6 }
  0x15   :  { %3981 = sst [smem:[#allocation23_spill]] %s3589_s12 }
  0x16   :  { %s3604_s4 = sld [smem:[%s3977_s0 + %s3485_s28]]   ;;  %s3489_s28 = smov 21  }
  0x17   :  { %s3609_s12 = sld [smem:[%s3977_s0 + %s3486_s7]]   ;;  %s3490_s7 = smov 22  }
  0x18   :  { %3982 = sst [smem:[#allocation24_spill]] %s3599_s27 }
  0x19   :  { %s3614_s6 = sld [smem:[%s3977_s0 + %s3487_s15]]   ;;  %s3491_s15 = smov 23  }
  0x1a   :  { %s3619_s27 = sld [smem:[%s3977_s0 + %s3488_s22]]   ;;  %s3492_s22 = smov 24  }
  0x1b   :  { %s3634_s30 = sld [smem:[%s3977_s0 + %s3491_s15]]   ;;  %s3495_s15 = smov 27  }
  0x1c   :  { %3983 = sst [smem:[#allocation25_spill]] %s3604_s4 }
  0x1d   :  { %3984 = sst [smem:[#allocation26_spill]] %s3609_s12 }
  0x1e   :  { %s3624_s4 = sld [smem:[%s3977_s0 + %s3489_s28]]   ;;  %s3493_s28 = smov 25  }
  0x1f   :  { %s3629_s12 = sld [smem:[%s3977_s0 + %s3490_s7]]   ;;  %s3494_s7 = smov 26  }
  0x20   :  { %3985 = sst [smem:[#allocation27_spill]] %s3619_s27 }
  0x21   :  { %s3639_s27 = sld [smem:[%s3977_s0 + %s3492_s22]]   ;;  %s3496_s22 = smov 28  }
  0x22   :  { %s3654_s19 = sld [smem:[%s3977_s0 + %s3495_s15]]  }
  0x24   :  { %3986 = sst [smem:[#allocation28_spill]] %s3624_s4 }
  0x25   :  { %3987 = sst [smem:[#allocation29_spill]] %s3629_s12 }
  0x26   :  { %s3644_s4 = sld [smem:[%s3977_s0 + %s3493_s28]]   ;;  %s3497_s28 = smov 29  }
  0x27   :  { %3988 = sst [smem:[#allocation30_spill]] %s3639_s27 }
  0x28   :  { %s3649_s12 = sld [smem:[%s3977_s0 + %s3494_s7]]  }
  0x29   :  { %s3659_s27 = sld [smem:[%s3977_s0 + %s3496_s22]]  }
  0x2c   :  { %3989 = sst [smem:[#allocation31_spill]] %s3644_s4 }
  0x2d   :  { %s3664_s4 = sld [smem:[%s3977_s0 + %s3497_s28]]  }
  0x2e   :  { %65 = vsyncpa [#allocation10], 0 }
  0x2f   :  { %66 = vsyncpa [#allocation12], 0 }
  0x30   :  { %67 = vsyncpa [#allocation15], 0  ;;  %s105_s7 = sshll.u32 %s3574_s24, 4  ;;  %s3498_s10 = smov [#allocation11]   ;;  %s106_s7 = int_to_ptr.hbm [resolvable:$true] %s105_s7 }
  0x31   :  { %s107_s11 = sshll.u32 %s3498_s10, 4  ;;  %s143_s15 = sshll.u32 %s3614_s6, 4  ;;  %s108_s11 = int_to_ptr.vmem [resolvable:$true] %s107_s11  ;;  %s144_s15 = int_to_ptr.hbm [resolvable:$true] %s143_s15 }
  0x32   :  { %s3343_s16 = sshra.s32 %s106_s7, 4  ;;  %s3347_s22 = scalar_lea.hbm %s3574_s24, 64  ;;  %s3344_s16 = int_to_ptr.hbm [resolvable:$true] %s3343_s16 }
  0x33   :  { %s3345_s18 = scalar_lea.hbm %s3344_s16, 64  ;;  %p3348_p1 = scmp.lt.s32.totalorder %s3344_s16, %s3574_s24 }
  0x34   :  { %p3346_p0 = scmp.ne.s32.totalorder %s3344_s16, %s3345_s18  ;;  %p3349_p2 = scmp.lt.s32.totalorder %s3347_s22, %s3345_s18 }
  0x36   :  { %p3350_p3 = por %p3349_p2, %p3348_p1 }
  0x38   :  { %p3351_p4 = pnand %p3350_p3, %p3346_p0 }
  0x3a   :  { %3354 = shalt.err (!%p3351_p4)
}
  0x3b   :  { %s3499_s0 = smov 64   ;;  %s3500_s23 = smov 4  }
  0x3c   :  { %113 = dma.hbm_to_vmem [thread:$0]  %s106_s7, 1024, %s108_s11, [#allocation12], %s3499_s0, %s3499_s0, %s3500_s23  }
  0x3d   :  { %s3501_s26 = smov [#allocation14]   ;;  %s74_s1 = sshll.u32 %s3524_s9, 4  ;;  %s3674_s1 = int_to_ptr.hbm [resolvable:$true] %s74_s1 }
  0x3e   :  { %s145_s28 = sshll.u32 %s3501_s26, 4  ;;  %s3367_s24 = sshra.s32 %s144_s15, 4  ;;  %s146_s28 = int_to_ptr.vmem [resolvable:$true] %s145_s28  ;;  %s3368_s24 = int_to_ptr.hbm [resolvable:$true] %s3367_s24 }
  0x3f   :  { %s3369_s2 = scalar_lea.hbm %s3368_s24, 192  ;;  %s3371_s10 = scalar_lea.hbm %s3614_s6, 192 }
  0x40   :  { %p3370_p5 = scmp.ne.s32.totalorder %s3368_s24, %s3369_s2  ;;  %p3372_p6 = scmp.lt.s32.totalorder %s3368_s24, %s3614_s6 }
  0x41   :  { %p3373_p7 = scmp.lt.s32.totalorder %s3371_s10, %s3369_s2 }
  0x43   :  { %p3374_p8 = por %p3373_p7, %p3372_p6 }
  0x45   :  { %p3375_p9 = pnand %p3374_p8, %p3370_p5 }
  0x47   :  { %3378 = shalt.err (!%p3375_p9)
}
  0x48   :  { %151 = dma.hbm_to_vmem [thread:$0]  %s144_s15, 3072, %s146_s28, [#allocation15], %s3499_s0, %s3499_s0, %s3500_s23  }
  0x49   :  { %s124_s7 = sshll.u32 %s3594_s20, 4  ;;  %s3502_s11 = smov [#allocation9]   ;;  %s3682_s7 = int_to_ptr.hbm [resolvable:$true] %s124_s7 }
  0x4a   :  { %s76_s16 = sshll.u32 %s3502_s11, 4  ;;  %s3391_s18 = sshra.s32 %s3674_s1, 4  ;;  %s77_s16 = int_to_ptr.vmem [resolvable:$true] %s76_s16  ;;  %s3392_s18 = int_to_ptr.hbm [resolvable:$true] %s3391_s18 }
  0x4b   :  { %s3393_s6 = scalar_lea.hbm %s3392_s18, 96  ;;  %s3395_s22 = scalar_lea.hbm %s3524_s9, 96 }
  0x4c   :  { %p3394_p10 = scmp.ne.s32.totalorder %s3392_s18, %s3393_s6  ;;  %p3396_p11 = scmp.lt.s32.totalorder %s3392_s18, %s3524_s9 }
  0x4d   :  { %p3397_p12 = scmp.lt.s32.totalorder %s3395_s22, %s3393_s6 }
  0x4f   :  { %p3398_p13 = por %p3397_p12, %p3396_p11 }
  0x51   :  { %p3399_p0 = pnand %p3398_p13, %p3394_p10 }
  0x53   :  { %3402 = shalt.err (!%p3399_p0)
}
  0x54   :  { %82 = dma.hbm_to_vmem [thread:$0]  %s3674_s1, 1536, %s77_s16, [#allocation10], %s3499_s0, %s3499_s0, %s3500_s23  }
  0x55   :  { %s3503_s15 = smov [#allocation13]   ;;  %s162_s28 = sshll.u32 %s3634_s30, 4  ;;  %s163_s28 = int_to_ptr.hbm [resolvable:$true] %s162_s28 }
  0x56   :  { %s126_s26 = sshll.u32 %s3503_s15, 4  ;;  %s3415_s24 = sshra.s32 %s3682_s7, 4  ;;  %s127_s26 = int_to_ptr.vmem [resolvable:$true] %s126_s26  ;;  %s3416_s24 = int_to_ptr.hbm [resolvable:$true] %s3415_s24 }
  0x57   :  { %s3417_s9 = scalar_lea.hbm %s3416_s24, 192  ;;  %s3419_s2 = scalar_lea.hbm %s3594_s20, 192 }
  0x58   :  { %p3418_p1 = scmp.ne.s32.totalorder %s3416_s24, %s3417_s9  ;;  %p3420_p2 = scmp.lt.s32.totalorder %s3416_s24, %s3594_s20 }
  0x59   :  { %p3421_p3 = scmp.lt.s32.totalorder %s3419_s2, %s3417_s9 }
  0x5b   :  { %p3422_p4 = por %p3421_p3, %p3420_p2 }
  0x5d   :  { %p3423_p5 = pnand %p3422_p4, %p3418_p1 }
  0x5f   :  { %3426 = shalt.err (!%p3423_p5)
}
  0x60   :  { %132 = dma.hbm_to_vmem [thread:$0]  %s3682_s7, 3072, %s127_s26, [#allocation12], %s3499_s0, %s3499_s0, %s3500_s23  }
  0x61   :  { %s3504_s1 = smov [#allocation16]   ;;  %s3439_s11 = sshra.s32 %s163_s28, 4  ;;  %s3440_s11 = int_to_ptr.hbm [resolvable:$true] %s3439_s11 }
  0x62   :  { %s164_s10 = sshll.u32 %s3504_s1, 4  ;;  %s3441_s16 = scalar_lea.hbm %s3440_s11, 64  ;;  %s165_s10 = int_to_ptr.vmem [resolvable:$true] %s164_s10 }
  0x63   :  { %p3442_p6 = scmp.ne.s32.totalorder %s3440_s11, %s3441_s16  ;;  %s3443_s20 = scalar_lea.hbm %s3634_s30, 64 }
  0x64   :  { %p3444_p7 = scmp.lt.s32.totalorder %s3440_s11, %s3634_s30  ;;  %p3445_p8 = scmp.lt.s32.totalorder %s3443_s20, %s3441_s16 }
  0x66   :  { %p3446_p9 = por %p3445_p8, %p3444_p7 }
  0x68   :  { %p3447_p10 = pnand %p3446_p9, %p3442_p6 }
  0x6a   :  { %3450 = shalt.err (!%p3447_p10)
}
  0x6b   :  { %170 = dma.hbm_to_vmem [thread:$0]  %s163_s28, 1024, %s165_s10, [#allocation15], %s3499_s0, %s3499_s0, %s3500_s23  }
  0x6c   :  { %3463 = dma.done.wait [#allocation10], 1536  }
  0x6d   :  { %3464 = vsyncadd [#allocation10], 4294965760 }
  0x6e   :  { %3465 = dma.done.wait [#allocation12], 4096  }
  0x6f   :  { %3466 = vsyncadd [#allocation12], 4294963200 }
  0x70   :  { %3467 = dma.done.wait [#allocation15], 4096  }
  0x71   :  { %3468 = vsyncadd [#allocation15], 4294963200  ;;  %vm198_vm0 = vcmask 516096   ;;  %v3505_v0 = vmov 0.0   ;;  %v3155_v1 = vld [vmem:[#allocation9 + $0x38] sm:$0xff]  ;;  %v3154_v4 = vld [vmem:[#allocation9 + $0x30] sm:$0xff] }
  0x72   :  { %199 = vst.msk [vmem:[#allocation2] sm:$0x1] %vm198_vm0, %v3505_v0  ;;  %v3151_v2 = vld [vmem:[#allocation9 + $0x18] sm:$0xff]  ;;  %298 = vmatpush.bf16.msra.mxu0 %v3155_v1  ;;  %v3150_v5 = vld [vmem:[#allocation9 + $0x10] sm:$0xff]  ;;  %vm226_vm1 = vcmask 523264   ;;  %413 = vmatpush.bf16.msra.mxu3 %v3155_v1  ;;  %v225_v8 = vld [vmem:[%s3519_s5 + $0x8] sm:$0xff] }
  0x73   :  { %200 = vst.msk [vmem:[#allocation2 + $0x11] sm:$0x1] %vm198_vm0, %v3505_v0  ;;  %v3159_v3 = vld [vmem:[#allocation9 + $0x58] sm:$0xff]  ;;  %339 = vmatpush.bf16.msra.mxu1 %v3151_v2  ;;  %v3158_v6 = vld [vmem:[#allocation9 + $0x50] sm:$0xff]  ;;  %v3153_v9 = vld [vmem:[#allocation9 + $0x28] sm:$0xff]  ;;  %s3996_s30 = sld [smem:[#allocation26_spill]] }
  0x74   :  { %202 = vst.msk [vmem:[#allocation2 + $0x18] sm:$0x1] %vm198_vm0, %v3505_v0  ;;  %383 = vmatpush.bf16.msra.mxu2 %v3159_v3  ;;  %v224_v7 = vld [vmem:[%s3519_s5] sm:$0xff]  ;;  %v3149_v10 = vld [vmem:[#allocation9 + $0x8] sm:$0xff]  ;;  %v3152_v12 = vld [vmem:[#allocation9 + $0x20] sm:$0xff]  ;;  %s3997_s23 = sld [smem:[#allocation27_spill]] }
  0x75   :  { %203 = vst.msk [vmem:[#allocation2 + $0x29] sm:$0x1] %vm198_vm0, %v3505_v0  ;;  %v3157_v11 = vld [vmem:[#allocation9 + $0x48] sm:$0xff]  ;;  %v3148_v13 = vld [vmem:[#allocation9] sm:$0xff]  ;;  %v2577_v24 = vld [vmem:[%s3519_s5 + $0x18] sm:$0xff]  ;;  %s3998_s7 = sld [smem:[#allocation28_spill]] }
  0x76   :  { %204 = vst [vmem:[#allocation3] sm:$0x1] %v3505_v0  ;;  %299 = vmatpush.bf16.msra.mxu0 %v3154_v4  ;;  %414 = vmatpush.bf16.msra.mxu3 %v3154_v4  ;;  %v3156_v14 = vld [vmem:[#allocation9 + $0x40] sm:$0xff]  ;;  %v2576_v17 = vld [vmem:[%s3519_s5 + $0x10] sm:$0xff]  ;;  %v3711_v25 = vld [vmem:[%s3534_s17 + $0x38] sm:$0xff]  ;;  %s3506_s5 = smov 8  }
  0x77   :  { %205 = vst [vmem:[#allocation3 + $0x11] sm:$0x1] %v3505_v0  ;;  %340 = vmatpush.bf16.msra.mxu1 %v3150_v5  ;;  %v3175_v27 = vld [vmem:[%s3534_s17 + $0x78] sm:$0xff]  ;;  %v3721_v28 = vld [vmem:[%s3534_s17 + $0x30] sm:$0xff]  ;;  %v3726_v30 = vld [vmem:[%s3534_s17 + $0x28] sm:$0xff]  ;;  %s3999_s18 = sld [smem:[#allocation29_spill]] }
  0x78   :  { %207 = vst [vmem:[#allocation3 + $0x18] sm:$0x1] %v3505_v0  ;;  %384 = vmatpush.bf16.msra.mxu2 %v3158_v6  ;;  %v3174_v29 = vld [vmem:[%s3534_s17 + $0x70] sm:$0xff]  ;;  %v3173_v33 = vld [vmem:[%s3534_s17 + $0x68] sm:$0xff]  ;;  %v3164_v36 = vld [vmem:[%s3534_s17 + $0x20] sm:$0xff]  ;;  %s3510_s6 = smov 112  }
  0x79   :  { %208 = vst [vmem:[#allocation3 + $0x29] sm:$0x1] %v3505_v0  ;;  %v3183_v37 = vld [vmem:[%s3534_s17 + $0xb8] sm:$0xff]  ;;  %v3172_v41 = vld [vmem:[%s3534_s17 + $0x60] sm:$0xff]  ;;  %v3182_v46 = vld [vmem:[%s3534_s17 + $0xb0] sm:$0xff]  ;;  %s4001_s22 = sld [smem:[#allocation31_spill]] }
  0x7a   :  { %209 = vst [vmem:[#allocation5] sm:$0x1] %v3505_v0  ;;  %300 = vmatpush.bf16.msra.mxu0 %v3153_v9  ;;  %415 = vmatpush.bf16.msra.mxu3 %v3153_v9  ;;  %v3171_v44 = vld [vmem:[%s3534_s17 + $0x58] sm:$0xff]  ;;  %v3170_v47 = vld [vmem:[%s3534_s17 + $0x50] sm:$0xff]  ;;  %v3169_v49 = vld [vmem:[%s3534_s17 + $0x48] sm:$0xff] }
  0x7b   :  { %210 = vst [vmem:[#allocation5 + $0x9] sm:$0x1] %v3505_v0  ;;  %341 = vmatpush.bf16.msra.mxu1 %v3149_v10  ;;  %v3163_v45 = vld [vmem:[%s3534_s17 + $0x18] sm:$0xff]  ;;  %v3162_v48 = vld [vmem:[%s3534_s17 + $0x10] sm:$0xff]  ;;  %v3181_v50 = vld [vmem:[%s3534_s17 + $0xa8] sm:$0xff] }
  0x7c   :  { %212 = vst [vmem:[#allocation5 + $0x10] sm:$0x1] %v3505_v0  ;;  %385 = vmatpush.bf16.msra.mxu2 %v3157_v11  ;;  %v3161_v51 = vld [vmem:[%s3534_s17 + $0x8] sm:$0xff]  ;;  %v3180_v52 = vld [vmem:[%s3534_s17 + $0xa0] sm:$0xff]  ;;  %v3179_v55 = vld [vmem:[%s3534_s17 + $0x98] sm:$0xff] }
  0x7d   :  { %227 = vst.msk [vmem:[#allocation2 + $0x1] sm:$0xff] %vm226_vm1, %v224_v7  ;;  %v3168_v53 = vld [vmem:[%s3534_s17 + $0x40] sm:$0xff]  ;;  %v3178_v56 = vld [vmem:[%s3534_s17 + $0x90] sm:$0xff]  ;;  %v3177_v57 = vld [vmem:[%s3534_s17 + $0x88] sm:$0xff] }
  0x7e   :  { %228 = vst.msk [vmem:[#allocation2 + $0x9] sm:$0xff] %vm226_vm1, %v225_v8  ;;  %301 = vmatpush.bf16.msra.mxu0 %v3152_v12  ;;  %416 = vmatpush.bf16.msra.mxu3 %v3152_v12  ;;  %v3160_v54 = vld [vmem:[%s3534_s17] sm:$0xff] }
  0x7f   :  { %213 = vst [vmem:[#allocation5 + $0x19] sm:$0x1] %v3505_v0  ;;  %342 = vmatpush.bf16.msra.mxu1 %v3148_v13  ;;  %v3176_v58 = vld [vmem:[%s3534_s17 + $0x80] sm:$0xff]  ;;  %s3508_s17 = smov 32  }
  0x80   :  { %214 = vst [vmem:[#allocation4] sm:$0x1] %v3505_v0  ;;  %386 = vmatpush.bf16.msra.mxu2 %v3156_v14  ;;  %v3324_v62 = vld [vmem:[%s3529_s13] ss:$0 sm:$0xff]  ;;  %s3507_s13 = smov 16  }
  0x81   :  { %215 = vst [vmem:[#allocation4 + $0x11] sm:$0x1] %v3505_v0 }
  0x82   :  { %217 = vst [vmem:[#allocation4 + $0x18] sm:$0x1] %v3505_v0  ;;  %430 = vmatpush.bf16.msrb.mxu0 %v3151_v2  ;;  %635 = vmatpush.bf16.msrb.mxu3 %v3711_v25 }
  0x83   :  { %218 = vst [vmem:[#allocation4 + $0x29] sm:$0x1] %v3505_v0  ;;  %450 = vmatpush.bf16.msrb.mxu1 %v3159_v3 }
  0x84   :  { %v264_v15 = vld [vmem:[#allocation2 + $0x1] sm:$0xff]  ;;  %219 = vst [vmem:[#allocation6] sm:$0x1] %v3505_v0  ;;  %573 = vmatpush.bf16.msrb.mxu2 %v3175_v27 }
  0x85   :  { %v261_v16 = vld [vmem:[#allocation2] sm:$0xff]  ;;  %v265_v18 = vld [vmem:[#allocation2 + $0x9] sm:$0xff]  ;;  %220 = vst [vmem:[#allocation6 + $0x9] sm:$0x1] %v3505_v0 }
  0x86   :  { %v262_v19 = vld [vmem:[#allocation2 + $0x8] sm:$0xff]  ;;  %v266_v21 = vpack.c.bf16 %v265_v18, %v264_v15  ;;  %222 = vst [vmem:[#allocation6 + $0x10] sm:$0x1] %v3505_v0  ;;  %431 = vmatpush.bf16.msrb.mxu0 %v3150_v5  ;;  %636 = vmatpush.bf16.msrb.mxu3 %v3721_v28 }
  0x87   :  { %v349_v20 = vld [vmem:[#allocation2 + $0x2] sm:$0xff]  ;;  %v263_v22 = vpack.c.bf16 %v262_v19, %v261_v16  ;;  %v350_v23 = vld [vmem:[#allocation2 + $0xa] sm:$0xff]  ;;  %223 = vst [vmem:[#allocation6 + $0x19] sm:$0x1] %v3505_v0  ;;  %451 = vmatpush.bf16.msrb.mxu1 %v3158_v6 }
  0x88   :  { %v351_v26 = vpack.c.bf16 %v350_v23, %v349_v20  ;;  %232 = vst.msk [vmem:[#allocation2 + $0x19] sm:$0xff] %vm226_vm1, %v2576_v17  ;;  %2594 = vmatmul.msk.bf16.vlgmr.msra.gmra.mxu0 %vm226_vm1, %v266_v21  ;;  %574 = vmatpush.bf16.msrb.mxu2 %v3174_v29 }
  0x89   :  { %2611 = vmatmul.msk.bf16.vlgmr.msra.gmra.mxu1 %vm226_vm1, %v263_v22  ;;  %233 = vst.msk [vmem:[#allocation2 + $0x21] sm:$0xff] %vm226_vm1, %v2577_v24 }
  0x8a   :  { %2628 = vmatmul.msk.bf16.vlgmr.msra.gmra.mxu2 %vm226_vm1, %v351_v26  ;;  %432 = vmatpush.bf16.msrb.mxu0 %v3149_v10 }
  0x8b   :  { %452 = vmatpush.bf16.msrb.mxu1 %v3157_v11  ;;  %637 = vmatpush.bf16.msrb.mxu3 %v3726_v30 }
  0x8c   :  { %575 = vmatpush.bf16.msrb.mxu2 %v3173_v33 }
  0x8e   :  { %433 = vmatpush.bf16.msrb.mxu0 %v3148_v13 }
  0x8f   :  { %v403_v31 = vld [vmem:[#allocation2 + $0x19] sm:$0xff]  ;;  %453 = vmatpush.bf16.msrb.mxu1 %v3156_v14  ;;  %638 = vmatpush.bf16.msrb.mxu3 %v3164_v36 }
  0x90   :  { %v404_v32 = vld [vmem:[#allocation2 + $0x21] sm:$0xff]  ;;  %v400_v35 = vld [vmem:[#allocation2 + $0x18] sm:$0xff]  ;;  %576 = vmatpush.bf16.msrb.mxu2 %v3172_v41 }
  0x91   :  { %v405_v34 = vpack.c.bf16 %v404_v32, %v403_v31  ;;  %v401_v38 = vld [vmem:[#allocation2 + $0x20] sm:$0xff] }
  0x92   :  { %v440_v39 = vld [vmem:[#allocation2 + $0x1a] sm:$0xff]  ;;  %v441_v40 = vld [vmem:[#allocation2 + $0x22] sm:$0xff]  ;;  %v402_v42 = vpack.c.bf16 %v401_v38, %v400_v35  ;;  %700 = vmatpush.bf16.msra.mxu0 %v3183_v37 }
  0x93   :  { %2629 = vmatmul.msk.bf16.vlgmr.msra.gmra.mxu3 %vm226_vm1, %v405_v34  ;;  %v442_v43 = vpack.c.bf16 %v441_v40, %v440_v39  ;;  %727 = vmatpush.bf16.msra.mxu1 %v3175_v27 }
  0x94   :  { %577 = vmatpush.bf16.msrb.mxu2 %v3171_v44  ;;  %639 = vmatpush.bf16.msrb.mxu3 %v3163_v45 }
  0x96   :  { %701 = vmatpush.bf16.msra.mxu0 %v3182_v46 }
  0x97   :  { %728 = vmatpush.bf16.msra.mxu1 %v3174_v29 }
  0x98   :  { %2630 = vmatmul.msk.bf16.vlgmr.msrb.gmra.mxu0 %vm226_vm1, %v402_v42  ;;  %578 = vmatpush.bf16.msrb.mxu2 %v3170_v47 }
  0x99   :  { %2631 = vmatmul.msk.bf16.vlgmr.msrb.gmra.mxu1 %vm226_vm1, %v442_v43  ;;  %640 = vmatpush.bf16.msrb.mxu3 %v3162_v48  ;;  %v3325_v43 = vld [vmem:[%s3539_s21] ss:$0 sm:$0xff]  ;;  %s3990_s21 = sld [smem:[#allocation20_spill]]  ;;  %vm2449_vm1 = vcmask 1043456  }
  0x9a   :  { %702 = vmatpush.bf16.msra.mxu0 %v3181_v50 }
  0x9b   :  { %729 = vmatpush.bf16.msra.mxu1 %v3173_v33 }
  0x9c   :  { %579 = vmatpush.bf16.msrb.mxu2 %v3169_v49 }
  0x9d   :  { %641 = vmatpush.bf16.msrb.mxu3 %v3161_v51 }
  0x9e   :  { %703 = vmatpush.bf16.msra.mxu0 %v3180_v52 }
  0x9f   :  { %730 = vmatpush.bf16.msra.mxu1 %v3172_v41 }
  0xa0   :  { %580 = vmatpush.bf16.msrb.mxu2 %v3168_v53 }
  0xa1   :  { %642 = vmatpush.bf16.msrb.mxu3 %v3160_v54 }
  0xa2   :  { %704 = vmatpush.bf16.msra.mxu0 %v3179_v55 }
  0xa3   :  { %731 = vmatpush.bf16.msra.mxu1 %v3171_v44 }
  0xa4   :  { %741 = vmatpush.bf16.msra.mxu2 %v3711_v25 }
  0xa5   :  { %758 = vmatpush.bf16.msra.mxu3 %v3183_v37 }
  0xa6   :  { %705 = vmatpush.bf16.msra.mxu0 %v3178_v56 }
  0xa7   :  { %732 = vmatpush.bf16.msra.mxu1 %v3170_v47 }
  0xa8   :  { %742 = vmatpush.bf16.msra.mxu2 %v3721_v28 }
  0xa9   :  { %759 = vmatpush.bf16.msra.mxu3 %v3182_v46 }
  0xaa   :  { %706 = vmatpush.bf16.msra.mxu0 %v3177_v57 }
  0xab   :  { %733 = vmatpush.bf16.msra.mxu1 %v3169_v49 }
  0xac   :  { %743 = vmatpush.bf16.msra.mxu2 %v3726_v30 }
  0xad   :  { %760 = vmatpush.bf16.msra.mxu3 %v3181_v50 }
  0xae   :  { %707 = vmatpush.bf16.msra.mxu0 %v3176_v58 }
  0xaf   :  { %734 = vmatpush.bf16.msra.mxu1 %v3168_v53 }
  0xb0   :  { %744 = vmatpush.bf16.msra.mxu2 %v3164_v36 }
  0xb1   :  { %761 = vmatpush.bf16.msra.mxu3 %v3180_v52 }
  0xb4   :  { %745 = vmatpush.bf16.msra.mxu2 %v3163_v45 }
  0xb5   :  { %762 = vmatpush.bf16.msra.mxu3 %v3179_v55 }
  0xb8   :  { %746 = vmatpush.bf16.msra.mxu2 %v3162_v48 }
  0xb9   :  { %763 = vmatpush.bf16.msra.mxu3 %v3178_v56 }
  0xbc   :  { %747 = vmatpush.bf16.msra.mxu2 %v3161_v51 }
  0xbd   :  { %764 = vmatpush.bf16.msra.mxu3 %v3177_v57 }
  0xc0   :  { %748 = vmatpush.bf16.msra.mxu2 %v3160_v54 }
  0xc1   :  { %765 = vmatpush.bf16.msra.mxu3 %v3176_v58 }
 0x105   :  { %v303_v59 = vpop.f32.mrf.mxu0 }
 0x106   :  { %v344_v60 = vpop.f32.mrf.mxu1 }
 0x107   :  { %v345_v61 = vadd.f32 %v344_v60, %v303_v59 }
 0x10d   :  { %v388_v63 = vpop.f32.mrf.mxu2  ;;  %v305_v1 = vpop.f32.mrf.mxu0 }
 0x10e   :  { %v393_v0 = vadd.f32 %v388_v63, %v345_v61  ;;  %v346_v2 = vpop.f32.mrf.mxu1 }
 0x10f   :  { %v347_v4 = vadd.f32 %v346_v2, %v305_v1 }
 0x110   :  { %v3755_v3 = vadd.f32 %v3324_v62, %v393_v0 }
 0x112   :  { %464 = vst [vmem:[#allocation3 + $0x1] sm:$0xff] %v3755_v3 }
 0x115   :  { %v390_v5 = vpop.f32.mrf.mxu2  ;;  %v435_v8 = vpop.f32.mrf.mxu0 }
 0x116   :  { %v418_v6 = vpop.f32.mrf.mxu3  ;;  %v394_v7 = vadd.f32 %v390_v5, %v347_v4  ;;  %v455_v10 = vpop.f32.mrf.mxu1 }
 0x117   :  { %v436_v9 = vadd.f32 %v435_v8, %v418_v6 }
 0x118   :  { %v3758_v11 = vadd.f32 %v3324_v62, %v394_v7 }
 0x119   :  { %v460_v12 = vadd.f32 %v455_v10, %v436_v9  ;;  %v519_v19 = vld [vmem:[#allocation3] sm:$0xff] }
 0x11a   :  { %465 = vst [vmem:[#allocation3 + $0x9] sm:$0xff] %v3758_v11  ;;  %v524_v13 = vpack.c.bf16 %v3758_v11, %v3755_v3 }
 0x11b   :  { %v3763_v14 = vadd.f32 %v3324_v62, %v460_v12 }
 0x11c   :  { %581 = vmatmul.bf16.vlgmr.msrb.gmra.mxu2 %v524_v13 }
 0x11d   :  { %466 = vst [vmem:[#allocation3 + $0x19] sm:$0xff] %v3763_v14  ;;  %v437_v16 = vpop.f32.mrf.mxu0 }
 0x11e   :  { %v420_v15 = vpop.f32.mrf.mxu3  ;;  %v457_v18 = vpop.f32.mrf.mxu1 }
 0x11f   :  { %v438_v17 = vadd.f32 %v437_v16, %v420_v15 }
 0x121   :  { %v461_v20 = vadd.f32 %v457_v18, %v438_v17  ;;  %v520_v21 = vld [vmem:[#allocation3 + $0x8] sm:$0xff] }
 0x122   :  { %v649_v22 = vld [vmem:[#allocation3 + $0x2] sm:$0xff]  ;;  %v650_v23 = vld [vmem:[#allocation3 + $0xa] sm:$0xff]  ;;  %v521_v24 = vpack.c.bf16 %v520_v21, %v519_v19 }
 0x123   :  { %v651_v25 = vpack.c.bf16 %v650_v23, %v649_v22  ;;  %v3766_v26 = vadd.f32 %v3324_v62, %v461_v20 }
 0x124   :  { %643 = vmatmul.bf16.vlgmr.msrb.gmra.mxu3 %v521_v24  ;;  %v721_v28 = vld [vmem:[#allocation3 + $0x18] sm:$0xff] }
 0x125   :  { %708 = vmatmul.bf16.vlgmr.msra.gmra.mxu0 %v651_v25  ;;  %467 = vst [vmem:[#allocation3 + $0x21] sm:$0xff] %v3766_v26  ;;  %v726_v27 = vpack.c.bf16 %v3766_v26, %v3763_v14 }
 0x127   :  { %735 = vmatmul.bf16.vlgmr.msra.gmra.mxu1 %v726_v27 }
 0x12c   :  { %v722_v29 = vld [vmem:[#allocation3 + $0x20] sm:$0xff] }
 0x12d   :  { %v723_v30 = vpack.c.bf16 %v722_v29, %v721_v28  ;;  %v755_v31 = vld [vmem:[#allocation3 + $0x1a] sm:$0xff]  ;;  %v756_v32 = vld [vmem:[#allocation3 + $0x22] sm:$0xff] }
 0x12e   :  { %v757_v33 = vpack.c.bf16 %v756_v32, %v755_v31 }
 0x12f   :  { %749 = vmatmul.bf16.vlgmr.msra.gmra.mxu2 %v723_v30 }
 0x134   :  { %766 = vmatmul.bf16.vlgmr.msra.gmra.mxu3 %v757_v33 }
 0x19f   :  { %v582_v34 = vpop.f32.mrf.mxu2 }
 0x1a2   :  { %v709_v35 = vpop.f32.mrf.mxu0 }
 0x1a4   :  { %v736_v46 = vpop.f32.mrf.mxu1 }
 0x1a7   :  { %v644_v36 = vpop.f32.mrf.mxu3  ;;  %v584_v37 = vpop.f32.mrf.mxu2 }
 0x1a8   :  { %v645_v38 = vadd.f32 %v644_v36, %v582_v34 }
 0x1aa   :  { %v711_v41 = vpop.f32.mrf.mxu0  ;;  %v714_v42 = vadd.f32 %v709_v35, %v645_v38 }
 0x1ac   :  { %v3774_v48 = vadd.f32 %v3325_v43, %v714_v42  ;;  %v738_v57 = vpop.f32.mrf.mxu1 }
 0x1ae   :  { %v784_v56 = vmul.f32 %v3774_v48, %v3774_v48 }
 0x1af   :  { %v646_v39 = vpop.f32.mrf.mxu3 }
 0x1b0   :  { %v647_v40 = vadd.f32 %v646_v39, %v584_v37 }
 0x1b2   :  { %v715_v44 = vadd.f32 %v711_v41, %v647_v40  ;;  %v750_v45 = vpop.f32.mrf.mxu2 }
 0x1b3   :  { %v751_v51 = vadd.f32 %v750_v45, %v736_v46  ;;  %v3199_v45 = vld [vmem:[%s3554_s3 + $0x78] sm:$0xff]  ;;  %v3198_v46 = vld [vmem:[%s3554_s3 + $0x70] sm:$0xff] }
 0x1b4   :  { %v3772_v47 = vadd.f32 %v3325_v43, %v715_v44  ;;  %984 = vmatpush.bf16.msrb.mxu0 %v3199_v45  ;;  %1138 = vmatpush.bf16.msrb.mxu3 %v3199_v45 }
 0x1b6   :  { %v776_v50 = vadd.f32 %v3772_v47, %v3774_v48  ;;  %v785_v52 = vmul.f32 %v3772_v47, %v3772_v47 }
 0x1b7   :  { %v767_v49 = vpop.f32.mrf.mxu3 }
 0x1b8   :  { %v772_v54 = vadd.f32 %v767_v49, %v751_v51  ;;  %v777_v55 = vrot.slane %v776_v50, 4  ;;  %v786_v59 = vadd.f32 %v785_v52, %v784_v56  ;;  %985 = vmatpush.bf16.msrb.mxu0 %v3198_v46  ;;  %1139 = vmatpush.bf16.msrb.mxu3 %v3198_v46  ;;  %v3191_v49 = vld [vmem:[%s3554_s3 + $0x38] sm:$0xff]  ;;  %v3190_v51 = vld [vmem:[%s3554_s3 + $0x30] sm:$0xff]  ;;  %v3196_v52 = vld [vmem:[%s3554_s3 + $0x60] sm:$0xff] }
 0x1b9   :  { %1046 = vmatpush.bf16.msrb.mxu1 %v3191_v49  ;;  %v3194_v56 = vld [vmem:[%s3554_s3 + $0x50] sm:$0xff] }
 0x1ba   :  { %v752_v53 = vpop.f32.mrf.mxu2  ;;  %v3782_v61 = vadd.f32 %v3325_v43, %v772_v54  ;;  %v778_v63 = vadd.f32 %v777_v55, %v776_v50  ;;  %v787_v1 = vrot.slane %v786_v59, 4  ;;  %v3197_v50 = vld [vmem:[%s3554_s3 + $0x68] sm:$0xff]  ;;  %v3195_v54 = vld [vmem:[%s3554_s3 + $0x58] sm:$0xff]  ;;  %v3188_v55 = vld [vmem:[%s3554_s3 + $0x20] sm:$0xff] }
 0x1bb   :  { %v753_v58 = vadd.f32 %v752_v53, %v738_v57  ;;  %v3189_v53 = vld [vmem:[%s3554_s3 + $0x28] sm:$0xff]  ;;  %v3207_v57 = vld [vmem:[%s3554_s3 + $0xb8] sm:$0xff] }
 0x1bc   :  { %v802_v2 = vmul.f32 %v3782_v61, %v3782_v61  ;;  %v779_v6 = vrot.slane %v778_v63, 2  ;;  %v788_v13 = vadd.f32 %v787_v1, %v786_v59  ;;  %986 = vmatpush.bf16.msrb.mxu0 %v3197_v50  ;;  %1140 = vmatpush.bf16.msrb.mxu3 %v3197_v50  ;;  %v3187_v59 = vld [vmem:[%s3554_s3 + $0x18] sm:$0xff]  ;;  %v3186_v1 = vld [vmem:[%s3554_s3 + $0x10] sm:$0xff] }
 0x1bd   :  { %1047 = vmatpush.bf16.msrb.mxu1 %v3190_v51  ;;  %1111 = vmatpush.bf16.msrb.mxu2 %v3207_v57 }
 0x1be   :  { %v780_v10 = vadd.f32 %v779_v6, %v778_v63  ;;  %v789_v19 = vrot.slane %v788_v13, 2  ;;  %v3206_v63 = vld [vmem:[%s3554_s3 + $0xb0] sm:$0xff] }
 0x1bf   :  { %v769_v60 = vpop.f32.mrf.mxu3 }
 0x1c0   :  { %v773_v62 = vadd.f32 %v769_v60, %v753_v58  ;;  %v781_v17 = vrot.slane %v780_v10, 1  ;;  %v790_v25 = vadd.f32 %v789_v19, %v788_v13  ;;  %987 = vmatpush.bf16.msrb.mxu0 %v3196_v52  ;;  %1141 = vmatpush.bf16.msrb.mxu3 %v3196_v52  ;;  %v3193_v60 = vld [vmem:[%s3554_s3 + $0x48] sm:$0xff]  ;;  %v3202_v19 = vld [vmem:[%s3554_s3 + $0x90] sm:$0xff] }
 0x1c1   :  { %1048 = vmatpush.bf16.msrb.mxu1 %v3189_v53  ;;  %1112 = vmatpush.bf16.msrb.mxu2 %v3206_v63 }
 0x1c2   :  { %v3784_v0 = vadd.f32 %v3325_v43, %v773_v62  ;;  %v782_v23 = vadd.f32 %v781_v17, %v780_v10  ;;  %v791_v29 = vrot.slane %v790_v25, 1  ;;  %v3203_v17 = vld [vmem:[%s3554_s3 + $0x98] sm:$0xff] }
 0x1c4   :  { %v794_v4 = vadd.f32 %v3784_v0, %v3782_v61  ;;  %v803_v5 = vmul.f32 %v3784_v0, %v3784_v0  ;;  %v792_v31 = vadd.f32 %v791_v29, %v790_v25  ;;  %988 = vmatpush.bf16.msrb.mxu0 %v3195_v54  ;;  %1142 = vmatpush.bf16.msrb.mxu3 %v3195_v54 }
 0x1c5   :  { %1049 = vmatpush.bf16.msrb.mxu1 %v3188_v55 }
 0x1c6   :  { %v795_v7 = vrot.slane %v794_v4, 4  ;;  %v804_v8 = vadd.f32 %v803_v5, %v802_v2  ;;  %v3192_v2 = vld [vmem:[%s3554_s3 + $0x40] sm:$0xff]  ;;  %v3205_v5 = vld [vmem:[%s3554_s3 + $0xa8] sm:$0xff] }
 0x1c7   :  { %1113 = vmatpush.bf16.msrb.mxu2 %v3205_v5 }
 0x1c8   :  { %v805_v9 = vrot.slane %v804_v8, 4  ;;  %v796_v12 = vadd.f32 %v795_v7, %v794_v4  ;;  %989 = vmatpush.bf16.msrb.mxu0 %v3194_v56  ;;  %1143 = vmatpush.bf16.msrb.mxu3 %v3194_v56 }
 0x1c9   :  { %1050 = vmatpush.bf16.msrb.mxu1 %v3187_v59 }
 0x1ca   :  { %v797_v15 = vrot.slane %v796_v12, 2  ;;  %v806_v16 = vadd.f32 %v805_v9, %v804_v8  ;;  %v3185_v8 = vld [vmem:[%s3554_s3 + $0x8] sm:$0xff] }
 0x1cc   :  { %v798_v18 = vadd.f32 %v797_v15, %v796_v12  ;;  %v807_v20 = vrot.slane %v806_v16, 2  ;;  %990 = vmatpush.bf16.msrb.mxu0 %v3193_v60  ;;  %1144 = vmatpush.bf16.msrb.mxu3 %v3193_v60  ;;  %v3204_v12 = vld [vmem:[%s3554_s3 + $0xa0] sm:$0xff] }
 0x1cd   :  { %1051 = vmatpush.bf16.msrb.mxu1 %v3186_v1  ;;  %1114 = vmatpush.bf16.msrb.mxu2 %v3204_v12  ;;  %v3184_v15 = vld [vmem:[%s3554_s3] sm:$0xff] }
 0x1ce   :  { %v799_v21 = vrot.slane %v798_v18, 1  ;;  %v808_v22 = vadd.f32 %v807_v20, %v806_v16  ;;  %v3201_v20 = vld [vmem:[%s3554_s3 + $0x88] sm:$0xff] }
 0x1d0   :  { %v800_v24 = vadd.f32 %v799_v21, %v798_v18  ;;  %v809_v28 = vrot.slane %v808_v22, 1  ;;  %991 = vmatpush.bf16.msrb.mxu0 %v3192_v2  ;;  %1145 = vmatpush.bf16.msrb.mxu3 %v3192_v2 }
 0x1d1   :  { %1052 = vmatpush.bf16.msrb.mxu1 %v3185_v8  ;;  %1115 = vmatpush.bf16.msrb.mxu2 %v3203_v17 }
 0x1d2   :  { %v801_v27 = vadd.f32 %v800_v24, %v782_v23  ;;  %v810_v30 = vadd.f32 %v809_v28, %v808_v22  ;;  %v3200_v22 = vld [vmem:[%s3554_s3 + $0x80] sm:$0xff]  ;;  %s3992_s3 = sld [smem:[#allocation22_spill]] }
 0x1d3   :  { %v841_v28 = vld [vmem:[%s3544_s25] sm:$0x1]  ;;  %s3991_s25 = sld [smem:[#allocation21_spill]] }
 0x1d4   :  { %812 = vrot.lane.b32.xlu0 %v801_v27, %s3506_s5  ;;  %v811_v32 = vadd.f32 %v810_v30, %v792_v31  ;;  %1152 = vmatpush.bf16.msra.mxu0 %v3191_v49 }
 0x1d5   :  { %1053 = vmatpush.bf16.msrb.mxu1 %v3184_v15  ;;  %1116 = vmatpush.bf16.msrb.mxu2 %v3202_v19 }
 0x1d8   :  { %1153 = vmatpush.bf16.msra.mxu0 %v3190_v51 }
 0x1d9   :  { %1169 = vmatpush.bf16.msra.mxu1 %v3207_v57  ;;  %1117 = vmatpush.bf16.msrb.mxu2 %v3201_v20 }
 0x1dc   :  { %815 = vrot.lane.b32.xlu0 %v811_v32, %s3506_s5  ;;  %1154 = vmatpush.bf16.msra.mxu0 %v3189_v53 }
 0x1dd   :  { %1170 = vmatpush.bf16.msra.mxu1 %v3206_v63  ;;  %1118 = vmatpush.bf16.msrb.mxu2 %v3200_v22 }
 0x1e0   :  { %1155 = vmatpush.bf16.msra.mxu0 %v3188_v55 }
 0x1e1   :  { %1171 = vmatpush.bf16.msra.mxu1 %v3205_v5 }
 0x1e4   :  { %1156 = vmatpush.bf16.msra.mxu0 %v3187_v59 }
 0x1e5   :  { %1172 = vmatpush.bf16.msra.mxu1 %v3204_v12 }
 0x1e8   :  { %1157 = vmatpush.bf16.msra.mxu0 %v3186_v1 }
 0x1e9   :  { %1173 = vmatpush.bf16.msra.mxu1 %v3203_v17 }
 0x1ec   :  { %1158 = vmatpush.bf16.msra.mxu0 %v3185_v8 }
 0x1ed   :  { %1174 = vmatpush.bf16.msra.mxu1 %v3202_v19 }
 0x1f0   :  { %1159 = vmatpush.bf16.msra.mxu0 %v3184_v15 }
 0x1f1   :  { %1175 = vmatpush.bf16.msra.mxu1 %v3201_v20 }
 0x1f5   :  { %1176 = vmatpush.bf16.msra.mxu1 %v3200_v22 }
 0x246   :  { %v813_v33 = vpop.permute.xlu0 %812 }
 0x247   :  { %v814_v34 = vadd.f32 %v813_v33, %v801_v27 }
 0x249   :  { %818 = vrot.lane.b32.xlu1 %v814_v34, %s3507_s13 }
 0x24e   :  { %v816_v35 = vpop.permute.xlu0 %815 }
 0x24f   :  { %v817_v36 = vadd.f32 %v816_v35, %v811_v32  ;;  %v854_v32 = vld [vmem:[%s3549_s29] sm:$0x1]  ;;  %s3509_s29 = smov 120  }
 0x251   :  { %821 = vrot.lane.b32.xlu1 %v817_v36, %s3507_s13 }
 0x2bb   :  { %v819_v37 = vpop.permute.xlu1 %818 }
 0x2bc   :  { %v820_v38 = vadd.f32 %v819_v37, %v814_v34 }
 0x2be   :  { %824 = vrot.lane.b32.xlu2 %v820_v38, %s3508_s17 }
 0x2c3   :  { %v822_v39 = vpop.permute.xlu1 %821 }
 0x2c4   :  { %v823_v40 = vadd.f32 %v822_v39, %v817_v36 }
 0x2c6   :  { %827 = vrot.lane.b32.xlu2 %v823_v40, %s3508_s17 }
 0x318   :  { %v825_v41 = vpop.permute.xlu2 %824 }
 0x319   :  { %v826_v42 = vadd.f32 %v825_v41, %v820_v38 }
 0x31b   :  { %830 = vrot.lane.b32.xlu0 %v826_v42, %s3499_s0 }
 0x320   :  { %v828_v43 = vpop.permute.xlu2 %827 }
 0x321   :  { %v829_v44 = vadd.f32 %v828_v43, %v823_v40 }
 0x323   :  { %833 = vrot.lane.b32.xlu1 %v829_v44, %s3499_s0 }
 0x38d   :  { %v831_v58 = vpop.permute.xlu0 %830 }
 0x38e   :  { %v832_v62 = vadd.f32 %v831_v58, %v826_v42 }
 0x390   :  { %v836_v4 = vmul.f32 0.001953125, %v832_v62 }
 0x392   :  { %v838_v9 = vmul.f32 %v836_v4, %v836_v4 }
 0x395   :  { %v834_v6 = vpop.permute.xlu1 %833 }
 0x396   :  { %v835_v7 = vadd.f32 %v834_v6, %v829_v44 }
 0x398   :  { %v837_v10 = vmul.f32 0.001953125, %v835_v7  ;;  %v3326_v7 = vld [vmem:[%s3559_s8] ss:$0 sm:$0xff]  ;;  %s3993_s8 = sld [smem:[#allocation23_spill]] }
 0x39a   :  { %v839_v13 = vsub.f32 %v837_v10, %v838_v9 }
 0x39c   :  { %v840_v16 = vmax.f32 %v839_v13, 0.0 }
 0x39e   :  { %v842_v18 = vadd.f32 1e-05, %v840_v16 }
 0x3a0   :  { %3331 = vrsqrt.f32 %v842_v18  ;;  %vm849_vm3 = vweird.f32 %v842_v18 }
 0x3a6   :  { %v3332_v21 = vpop.eup %3331 }
 0x3a7   :  { %v844_v23 = vmul.f32 %v3332_v21, %v842_v18  ;;  %vm850_vm2 = vweird.f32 %v3332_v21 }
 0x3a8   :  { %vm851_vm4 = vmor %vm849_vm3, %vm850_vm2 }
 0x3a9   :  { %v845_v24 = vmul.f32 %v3332_v21, %v844_v23 }
 0x3ab   :  { %v846_v25 = vmul.f32 0.5, %v845_v24 }
 0x3ad   :  { %v847_v27 = vsub.f32 1.5, %v846_v25 }
 0x3af   :  { %v848_v29 = vmul.f32 %v3332_v21, %v847_v27 }
 0x3b1   :  { %v852_v30 = vsel %vm851_vm4, %v3332_v21, %v848_v29 }
 0x3b2   :  { %v853_v31 = vmul.f32 %v852_v30, %v841_v28 }
 0x3b4   :  { %v855_v33 = vmul.f32 %v853_v31, %v836_v4  ;;  %v858_v34 = vperm.slane %v853_v31, 0 }
 0x3b6   :  { %v856_v35 = vsub.f32 %v854_v32, %v855_v33  ;;  %v860_v36 = vmul.f32 %v858_v34, %v3774_v48  ;;  %v861_v37 = vmul.f32 %v858_v34, %v3772_v47  ;;  %v869_v39 = vmul.f32 %v858_v34, %v3782_v61 }
 0x3b7   :  { %v870_v40 = vmul.f32 %v858_v34, %v3784_v0 }
 0x3b8   :  { %v863_v38 = vperm.slane %v856_v35, 0 }
 0x3ba   :  { %v865_v41 = vadd.f32 %v863_v38, %v860_v36  ;;  %v866_v42 = vadd.f32 %v863_v38, %v861_v37  ;;  %v871_v43 = vadd.f32 %v869_v39, %v863_v38  ;;  %v872_v44 = vadd.f32 %v870_v40, %v863_v38 }
 0x3bc   :  { %v867_v45 = vmax.f32 %v865_v41, 0.0  ;;  %v868_v46 = vmax.f32 %v866_v42, 0.0  ;;  %v873_v49 = vmax.f32 %v871_v43, 0.0  ;;  %v874_v50 = vmax.f32 %v872_v44, 0.0 }
 0x3be   :  { %875 = vst [vmem:[#allocation4 + $0x1] sm:$0xff] %v867_v45  ;;  %v935_v51 = vpack.c.bf16 %v868_v46, %v867_v45  ;;  %v1137_v52 = vpack.c.bf16 %v874_v50, %v873_v49 }
 0x3bf   :  { %876 = vst [vmem:[#allocation4 + $0x9] sm:$0xff] %v868_v46 }
 0x3c0   :  { %877 = vst [vmem:[#allocation4 + $0x19] sm:$0xff] %v873_v49  ;;  %992 = vmatmul.bf16.vlgmr.msrb.gmra.mxu0 %v935_v51  ;;  %1146 = vmatmul.bf16.vlgmr.msrb.gmra.mxu3 %v1137_v52 }
 0x3c1   :  { %878 = vst [vmem:[#allocation4 + $0x21] sm:$0xff] %v874_v50 }
 0x3c5   :  { %v930_v47 = vld [vmem:[#allocation4] sm:$0xff] }
 0x3c6   :  { %v931_v48 = vld [vmem:[#allocation4 + $0x8] sm:$0xff] }
 0x3c7   :  { %v1060_v61 = vld [vmem:[#allocation4 + $0x2] sm:$0xff]  ;;  %v1061_v0 = vld [vmem:[#allocation4 + $0xa] sm:$0xff]  ;;  %v932_v53 = vpack.c.bf16 %v931_v48, %v930_v47  ;;  %v1132_v55 = vld [vmem:[#allocation4 + $0x18] sm:$0xff] }
 0x3c8   :  { %v1062_v54 = vpack.c.bf16 %v1061_v0, %v1060_v61  ;;  %v1133_v56 = vld [vmem:[#allocation4 + $0x20] sm:$0xff] }
 0x3c9   :  { %1054 = vmatmul.bf16.vlgmr.msrb.gmra.mxu1 %v932_v53  ;;  %v1134_v57 = vpack.c.bf16 %v1133_v56, %v1132_v55  ;;  %v1166_v58 = vld [vmem:[#allocation4 + $0x1a] sm:$0xff]  ;;  %v1167_v59 = vld [vmem:[#allocation4 + $0x22] sm:$0xff] }
 0x3ca   :  { %1119 = vmatmul.bf16.vlgmr.msrb.gmra.mxu2 %v1062_v54  ;;  %v1168_v60 = vpack.c.bf16 %v1167_v59, %v1166_v58 }
 0x3d0   :  { %1160 = vmatmul.bf16.vlgmr.msra.gmra.mxu0 %v1134_v57 }
 0x3d9   :  { %1177 = vmatmul.bf16.vlgmr.msra.gmra.mxu1 %v1168_v60 }
 0x43d   :  { %v993_v62 = vpop.f32.mrf.mxu0 }
 0x443   :  { %v1147_v9 = vpop.f32.mrf.mxu3 }
 0x445   :  { %v995_v1 = vpop.f32.mrf.mxu0 }
 0x446   :  { %v1055_v63 = vpop.f32.mrf.mxu1 }
 0x447   :  { %v1056_v4 = vadd.f32 %v1055_v63, %v993_v62 }
 0x44b   :  { %v1149_v27 = vpop.f32.mrf.mxu3 }
 0x44d   :  { %v1120_v2 = vpop.f32.mrf.mxu2  ;;  %v1161_v8 = vpop.f32.mrf.mxu0 }
 0x44e   :  { %v1057_v5 = vpop.f32.mrf.mxu1  ;;  %v1125_v6 = vadd.f32 %v1120_v2, %v1056_v4  ;;  %v1162_v19 = vadd.f32 %v1161_v8, %v1147_v9 }
 0x44f   :  { %v1058_v12 = vadd.f32 %v1057_v5, %v995_v1 }
 0x450   :  { %v1130_v10 = vadd.f32 %v3326_v7, %v1125_v6 }
 0x452   :  { %v3832_v17 = vadd.f32 %v1130_v10, %v3755_v3 }
 0x454   :  { %v1203_v23 = vmul.f32 %v3832_v17, %v3832_v17 }
 0x455   :  { %v1122_v13 = vpop.f32.mrf.mxu2  ;;  %v1163_v22 = vpop.f32.mrf.mxu0 }
 0x456   :  { %v1126_v15 = vadd.f32 %v1122_v13, %v1058_v12  ;;  %v1178_v16 = vpop.f32.mrf.mxu1  ;;  %v1164_v30 = vadd.f32 %v1163_v22, %v1149_v27 }
 0x457   :  { %v1183_v21 = vadd.f32 %v1178_v16, %v1162_v19 }
 0x458   :  { %v1131_v18 = vadd.f32 %v3326_v7, %v1126_v15 }
 0x459   :  { %v1185_v29 = vadd.f32 %v3326_v7, %v1183_v21 }
 0x45a   :  { %v3835_v20 = vadd.f32 %v1131_v18, %v3758_v11 }
 0x45b   :  { %v3844_v33 = vadd.f32 %v1185_v29, %v3763_v14 }
 0x45c   :  { %v1195_v24 = vadd.f32 %v3835_v20, %v3832_v17  ;;  %v1204_v25 = vmul.f32 %v3835_v20, %v3835_v20 }
 0x45d   :  { %v1221_v38 = vmul.f32 %v3844_v33, %v3844_v33 }
 0x45e   :  { %v1196_v28 = vrot.slane %v1195_v24, 4  ;;  %v1205_v3 = vadd.f32 %v1204_v25, %v1203_v23  ;;  %v1180_v31 = vpop.f32.mrf.mxu1 }
 0x45f   :  { %v1184_v32 = vadd.f32 %v1180_v31, %v1164_v30  ;;  %v1260_v30 = vld [vmem:[%s3564_s14] sm:$0x1]  ;;  %s3994_s14 = sld [smem:[#allocation24_spill]] }
 0x460   :  { %v1206_v11 = vrot.slane %v1205_v3, 4  ;;  %v1197_v35 = vadd.f32 %v1196_v28, %v1195_v24 }
 0x461   :  { %v1186_v34 = vadd.f32 %v3326_v7, %v1184_v32 }
 0x462   :  { %v1207_v37 = vadd.f32 %v1206_v11, %v1205_v3  ;;  %v1198_v41 = vrot.slane %v1197_v35, 2 }
 0x463   :  { %v3847_v36 = vadd.f32 %v1186_v34, %v3766_v26  ;;  %v1273_v34 = vld [vmem:[%s3990_s21] sm:$0x1] }
 0x464   :  { %v1208_v14 = vrot.slane %v1207_v37, 2  ;;  %v1199_v44 = vadd.f32 %v1198_v41, %v1197_v35 }
 0x465   :  { %v1213_v39 = vadd.f32 %v3847_v36, %v3844_v33  ;;  %v1222_v40 = vmul.f32 %v3847_v36, %v3847_v36 }
 0x466   :  { %v1209_v26 = vadd.f32 %v1208_v14, %v1207_v37  ;;  %v1200_v51 = vrot.slane %v1199_v44, 1 }
 0x467   :  { %v1214_v42 = vrot.slane %v1213_v39, 4  ;;  %v1223_v43 = vadd.f32 %v1222_v40, %v1221_v38 }
 0x468   :  { %v1210_v61 = vrot.slane %v1209_v26, 1  ;;  %v1201_v53 = vadd.f32 %v1200_v51, %v1199_v44 }
 0x469   :  { %v1215_v45 = vadd.f32 %v1214_v42, %v1213_v39  ;;  %v1224_v46 = vrot.slane %v1223_v43, 4 }
 0x46a   :  { %v1211_v57 = vadd.f32 %v1210_v61, %v1209_v26 }
 0x46b   :  { %v1216_v49 = vrot.slane %v1215_v45, 2  ;;  %v1225_v50 = vadd.f32 %v1224_v46, %v1223_v43 }
 0x46d   :  { %v1217_v52 = vadd.f32 %v1216_v49, %v1215_v45  ;;  %v1226_v47 = vrot.slane %v1225_v50, 2 }
 0x46f   :  { %v1218_v48 = vrot.slane %v1217_v52, 1  ;;  %v1227_v0 = vadd.f32 %v1226_v47, %v1225_v50 }
 0x471   :  { %v1219_v54 = vadd.f32 %v1218_v48, %v1217_v52  ;;  %v1228_v55 = vrot.slane %v1227_v0, 1  ;;  %v3213_v52 = vld [vmem:[#allocation11 + $0x28] sm:$0xff] }
 0x473   :  { %v1220_v56 = vadd.f32 %v1219_v54, %v1201_v53  ;;  %v1229_v58 = vadd.f32 %v1228_v55, %v1227_v0 }
 0x475   :  { %1231 = vrot.lane.b32.xlu2 %v1220_v56, %s3506_s5  ;;  %v1230_v59 = vadd.f32 %v1229_v58, %v1211_v57 }
 0x477   :  { %1234 = vrot.lane.b32.xlu0 %v1230_v59, %s3506_s5 }
 0x4cf   :  { %v1232_v60 = vpop.permute.xlu2 %1231 }
 0x4d0   :  { %v1233_v62 = vadd.f32 %v1232_v60, %v1220_v56 }
 0x4d2   :  { %1237 = vrot.lane.b32.xlu1 %v1233_v62, %s3507_s13 }
 0x4e9   :  { %v1235_v63 = vpop.permute.xlu0 %1234 }
 0x4ea   :  { %v1236_v1 = vadd.f32 %v1235_v63, %v1230_v59 }
 0x4ec   :  { %1240 = vrot.lane.b32.xlu2 %v1236_v1, %s3507_s13 }
 0x544   :  { %v1238_v2 = vpop.permute.xlu1 %1237 }
 0x545   :  { %v1239_v4 = vadd.f32 %v1238_v2, %v1233_v62  ;;  %v3212_v2 = vld [vmem:[#allocation11 + $0x20] sm:$0xff] }
 0x546   :  { %v1241_v5 = vpop.permute.xlu2 %1240 }
 0x547   :  { %v1242_v6 = vadd.f32 %v1241_v5, %v1236_v1  ;;  %1243 = vrot.lane.b32.xlu0 %v1239_v4, %s3508_s17 }
 0x549   :  { %1246 = vrot.lane.b32.xlu1 %v1242_v6, %s3508_s17 }
 0x5b9   :  { %v1244_v7 = vpop.permute.xlu0 %1243 }
 0x5ba   :  { %v1245_v8 = vadd.f32 %v1244_v7, %v1239_v4 }
 0x5bb   :  { %v1247_v9 = vpop.permute.xlu1 %1246 }
 0x5bc   :  { %v1248_v10 = vadd.f32 %v1247_v9, %v1242_v6  ;;  %1249 = vrot.lane.b32.xlu2 %v1245_v8, %s3499_s0 }
 0x5be   :  { %1252 = vrot.lane.b32.xlu0 %v1248_v10, %s3499_s0 }
 0x616   :  { %v1250_v12 = vpop.permute.xlu2 %1249 }
 0x617   :  { %v1251_v13 = vadd.f32 %v1250_v12, %v1245_v8 }
 0x619   :  { %v1255_v15 = vmul.f32 0.001953125, %v1251_v13 }
 0x61b   :  { %v1257_v19 = vmul.f32 %v1255_v15, %v1255_v15 }
 0x630   :  { %v1253_v16 = vpop.permute.xlu0 %1252 }
 0x631   :  { %v1254_v18 = vadd.f32 %v1253_v16, %v1248_v10 }
 0x633   :  { %v1256_v21 = vmul.f32 0.001953125, %v1254_v18 }
 0x635   :  { %v1258_v22 = vsub.f32 %v1256_v21, %v1257_v19  ;;  %v3211_v19 = vld [vmem:[#allocation11 + $0x18] sm:$0xff] }
 0x637   :  { %v1259_v23 = vmax.f32 %v1258_v22, 0.0 }
 0x639   :  { %v1261_v24 = vadd.f32 1e-05, %v1259_v23 }
 0x63b   :  { %3333 = vrsqrt.f32 %v1261_v24  ;;  %vm1268_vm6 = vweird.f32 %v1261_v24 }
 0x641   :  { %v3334_v25 = vpop.eup %3333 }
 0x642   :  { %v1263_v27 = vmul.f32 %v3334_v25, %v1261_v24  ;;  %vm1269_vm5 = vweird.f32 %v3334_v25 }
 0x643   :  { %vm1270_vm7 = vmor %vm1268_vm6, %vm1269_vm5 }
 0x644   :  { %v1264_v28 = vmul.f32 %v3334_v25, %v1263_v27 }
 0x646   :  { %v1265_v3 = vmul.f32 0.5, %v1264_v28 }
 0x648   :  { %v1266_v29 = vsub.f32 1.5, %v1265_v3 }
 0x64a   :  { %v1267_v31 = vmul.f32 %v3334_v25, %v1266_v29 }
 0x64c   :  { %v1271_v32 = vsel %vm1270_vm7, %v3334_v25, %v1267_v31 }
 0x64d   :  { %v1272_v11 = vmul.f32 %v1271_v32, %v1260_v30 }
 0x64f   :  { %v1274_v35 = vmul.f32 %v1272_v11, %v1255_v15  ;;  %v1277_v37 = vperm.slane %v1272_v11, 0  ;;  %v3210_v11 = vld [vmem:[#allocation11 + $0x10] sm:$0xff] }
 0x651   :  { %v1275_v38 = vsub.f32 %v1273_v34, %v1274_v35  ;;  %v1279_v39 = vmul.f32 %v1277_v37, %v3832_v17  ;;  %v1280_v40 = vmul.f32 %v1277_v37, %v3835_v20  ;;  %v1288_v42 = vmul.f32 %v1277_v37, %v3844_v33  ;;  %v3215_v17 = vld [vmem:[#allocation11 + $0x38] sm:$0xff]  ;;  %v3214_v20 = vld [vmem:[#allocation11 + $0x30] sm:$0xff] }
 0x652   :  { %v1289_v43 = vmul.f32 %v1277_v37, %v3847_v36  ;;  %1441 = vmatpush.bf16.msra.mxu2 %v3215_v17  ;;  %1459 = vmatpush.bf16.msra.mxu3 %v3215_v17 }
 0x653   :  { %v1282_v41 = vperm.slane %v1275_v38, 0 }
 0x655   :  { %v1284_v14 = vadd.f32 %v1282_v41, %v1279_v39  ;;  %v1285_v44 = vadd.f32 %v1282_v41, %v1280_v40  ;;  %v1290_v45 = vadd.f32 %v1288_v42, %v1282_v41  ;;  %v1291_v46 = vadd.f32 %v1289_v43, %v1282_v41  ;;  %v3209_v42 = vld [vmem:[#allocation11 + $0x8] sm:$0xff] }
 0x656   :  { %1442 = vmatpush.bf16.msra.mxu2 %v3214_v20  ;;  %1460 = vmatpush.bf16.msra.mxu3 %v3214_v20 }
 0x657   :  { %v1286_v49 = vmax.f32 %v1284_v14, 0.0  ;;  %v1287_v26 = vmax.f32 %v1285_v44, 0.0  ;;  %v1292_v50 = vmax.f32 %v1290_v45, 0.0  ;;  %v1293_v51 = vmax.f32 %v1291_v46, 0.0  ;;  %v3208_v45 = vld [vmem:[#allocation11] sm:$0xff] }
 0x659   :  { %1294 = vst [vmem:[#allocation3 + $0x1] sm:$0xff] %v1286_v49 }
 0x65a   :  { %1295 = vst [vmem:[#allocation3 + $0x9] sm:$0xff] %v1287_v26  ;;  %1443 = vmatpush.bf16.msra.mxu2 %v3213_v52  ;;  %1461 = vmatpush.bf16.msra.mxu3 %v3213_v52 }
 0x65b   :  { %1296 = vst [vmem:[#allocation3 + $0x19] sm:$0xff] %v1292_v50 }
 0x65c   :  { %1297 = vst [vmem:[#allocation3 + $0x21] sm:$0xff] %v1293_v51 }
 0x65d   :  { %1298 = vst [vmem:[%s3654_s19] sm:$0xff] %v1286_v49 }
 0x65e   :  { %1299 = vst [vmem:[%s3654_s19 + $0x8] sm:$0xff] %v1287_v26  ;;  %1444 = vmatpush.bf16.msra.mxu2 %v3212_v2  ;;  %1462 = vmatpush.bf16.msra.mxu3 %v3212_v2 }
 0x65f   :  { %2888 = vst [vmem:[%s3654_s19 + $0x10] sm:$0xff] %v1292_v50 }
 0x660   :  { %2889 = vst [vmem:[%s3654_s19 + $0x18] sm:$0xff] %v1293_v51  ;;  %v1303_v33 = vld [vmem:[#allocation3 + $0x1] sm:$0x1]  ;;  %v1304_v36 = vld [vmem:[#allocation3 + $0x2] sm:$0x1]  ;;  %s3995_s19 = sld [smem:[#allocation25_spill]] }
 0x661   :  { %v1305_v47 = vmax.f32 %v1303_v33, %v1304_v36  ;;  %v1307_v48 = vld [vmem:[#allocation3 + $0x3] sm:$0x1]  ;;  %v1308_v61 = vld [vmem:[#allocation3 + $0x4] sm:$0x1]  ;;  %v1311_v0 = vld [vmem:[#allocation3 + $0x5] sm:$0x1] }
 0x662   :  { %v1309_v53 = vmax.f32 %v1307_v48, %v1308_v61  ;;  %v1312_v54 = vld [vmem:[#allocation3 + $0x6] sm:$0x1]  ;;  %v1315_v55 = vld [vmem:[#allocation3 + $0x7] sm:$0x1]  ;;  %v1316_v56 = vld [vmem:[#allocation3 + $0x8] sm:$0x1]  ;;  %1445 = vmatpush.bf16.msra.mxu2 %v3211_v19  ;;  %1463 = vmatpush.bf16.msra.mxu3 %v3211_v19 }
 0x663   :  { %1306 = vst [vmem:[#allocation7] sm:$0x1] %v1305_v47  ;;  %v1313_v57 = vmax.f32 %v1311_v0, %v1312_v54  ;;  %v1317_v58 = vmax.f32 %v1315_v55, %v1316_v56  ;;  %v1319_v59 = vld [vmem:[#allocation3 + $0x9] sm:$0x1]  ;;  %v1320_v60 = vld [vmem:[#allocation3 + $0xa] sm:$0x1] }
 0x664   :  { %1310 = vst [vmem:[#allocation7 + $0x1] sm:$0x1] %v1309_v53  ;;  %v1321_v62 = vmax.f32 %v1319_v59, %v1320_v60  ;;  %v1323_v63 = vld [vmem:[#allocation3 + $0xb] sm:$0x1]  ;;  %v1324_v1 = vld [vmem:[#allocation3 + $0xc] sm:$0x1] }
 0x665   :  { %1314 = vst [vmem:[#allocation7 + $0x2] sm:$0x1] %v1313_v57  ;;  %v1325_v4 = vmax.f32 %v1323_v63, %v1324_v1  ;;  %v1327_v5 = vld [vmem:[#allocation3 + $0xd] sm:$0x1]  ;;  %v1328_v6 = vld [vmem:[#allocation3 + $0xe] sm:$0x1] }
 0x666   :  { %1318 = vst [vmem:[#allocation7 + $0x3] sm:$0x1] %v1317_v58  ;;  %v1329_v7 = vmax.f32 %v1327_v5, %v1328_v6  ;;  %v1331_v8 = vld [vmem:[#allocation3 + $0xf] sm:$0x1]  ;;  %v1332_v9 = vld [vmem:[#allocation3 + $0x10] sm:$0x1]  ;;  %1446 = vmatpush.bf16.msra.mxu2 %v3210_v11  ;;  %1464 = vmatpush.bf16.msra.mxu3 %v3210_v11 }
 0x667   :  { %1322 = vst [vmem:[#allocation7 + $0x4] sm:$0x1] %v1321_v62  ;;  %v1333_v10 = vmax.f32 %v1331_v8, %v1332_v9  ;;  %v1335_v12 = vld [vmem:[#allocation3 + $0x19] sm:$0x1]  ;;  %v1336_v13 = vld [vmem:[#allocation3 + $0x1a] sm:$0x1] }
 0x668   :  { %1326 = vst [vmem:[#allocation7 + $0x5] sm:$0x1] %v1325_v4  ;;  %v1337_v15 = vmax.f32 %v1335_v12, %v1336_v13  ;;  %v1340_v16 = vld [vmem:[#allocation3 + $0x1b] sm:$0x1]  ;;  %v1341_v18 = vld [vmem:[#allocation3 + $0x1c] sm:$0x1] }
 0x669   :  { %1330 = vst [vmem:[#allocation7 + $0x6] sm:$0x1] %v1329_v7  ;;  %v1342_v21 = vmax.f32 %v1340_v16, %v1341_v18  ;;  %v1344_v22 = vld [vmem:[#allocation3 + $0x1d] sm:$0x1]  ;;  %v1345_v23 = vld [vmem:[#allocation3 + $0x1e] sm:$0x1] }
 0x66a   :  { %1334 = vst [vmem:[#allocation7 + $0x7] sm:$0x1] %v1333_v10  ;;  %v1346_v24 = vmax.f32 %v1344_v22, %v1345_v23  ;;  %v1348_v25 = vld [vmem:[#allocation3 + $0x1f] sm:$0x1]  ;;  %v1349_v27 = vld [vmem:[#allocation3 + $0x20] sm:$0x1]  ;;  %1447 = vmatpush.bf16.msra.mxu2 %v3209_v42  ;;  %1465 = vmatpush.bf16.msra.mxu3 %v3209_v42 }
 0x66b   :  { %1339 = vst [vmem:[#allocation7 + $0x8] sm:$0x1] %v1337_v15  ;;  %v1350_v28 = vmax.f32 %v1348_v25, %v1349_v27  ;;  %v1352_v3 = vld [vmem:[#allocation3 + $0x21] sm:$0x1]  ;;  %v1353_v29 = vld [vmem:[#allocation3 + $0x22] sm:$0x1] }
 0x66c   :  { %1343 = vst [vmem:[#allocation7 + $0x9] sm:$0x1] %v1342_v21  ;;  %v1354_v30 = vmax.f32 %v1352_v3, %v1353_v29  ;;  %v1356_v31 = vld [vmem:[#allocation3 + $0x23] sm:$0x1]  ;;  %v1357_v32 = vld [vmem:[#allocation3 + $0x24] sm:$0x1] }
 0x66d   :  { %1347 = vst [vmem:[#allocation7 + $0xa] sm:$0x1] %v1346_v24  ;;  %v1358_v34 = vmax.f32 %v1356_v31, %v1357_v32  ;;  %v1360_v35 = vld [vmem:[#allocation3 + $0x25] sm:$0x1]  ;;  %v1361_v37 = vld [vmem:[#allocation3 + $0x26] sm:$0x1] }
 0x66e   :  { %1351 = vst [vmem:[#allocation7 + $0xb] sm:$0x1] %v1350_v28  ;;  %v1362_v38 = vmax.f32 %v1360_v35, %v1361_v37  ;;  %v1364_v39 = vld [vmem:[#allocation3 + $0x27] sm:$0x1]  ;;  %v1365_v40 = vld [vmem:[#allocation3 + $0x28] sm:$0x1]  ;;  %1448 = vmatpush.bf16.msra.mxu2 %v3208_v45  ;;  %1466 = vmatpush.bf16.msra.mxu3 %v3208_v45 }
 0x66f   :  { %1355 = vst [vmem:[#allocation7 + $0xc] sm:$0x1] %v1354_v30  ;;  %v1366_v41 = vmax.f32 %v1364_v39, %v1365_v40  ;;  %v3327_v33 = vld [vmem:[%s3991_s25] ss:$0 sm:$0xff]  ;;  %v3230_v11 = vld [vmem:[#allocation13 + $0x70] sm:$0xff]  ;;  %v3229_v35 = vld [vmem:[#allocation13 + $0x68] sm:$0xff] }
 0x670   :  { %1359 = vst [vmem:[#allocation7 + $0xd] sm:$0x1] %v1358_v34  ;;  %v3231_v32 = vld [vmem:[#allocation13 + $0x78] sm:$0xff]  ;;  %v3222_v37 = vld [vmem:[#allocation13 + $0x30] sm:$0xff]  ;;  %v3221_v39 = vld [vmem:[#allocation13 + $0x28] sm:$0xff] }
 0x671   :  { %1363 = vst [vmem:[#allocation7 + $0xe] sm:$0x1] %v1362_v38  ;;  %v1385_v43 = vld [vmem:[#allocation7] sm:$0xff]  ;;  %1658 = vmatpush.bf16.msrb.mxu0 %v3231_v32  ;;  %v3223_v34 = vld [vmem:[#allocation13 + $0x38] sm:$0xff]  ;;  %v3228_v38 = vld [vmem:[#allocation13 + $0x60] sm:$0xff] }
 0x672   :  { %1367 = vst [vmem:[#allocation7 + $0xf] sm:$0x1] %v1366_v41  ;;  %1804 = vmatpush.bf16.msrb.mxu3 %v3231_v32  ;;  %1719 = vmatpush.bf16.msrb.mxu1 %v3223_v34  ;;  %v3227_v40 = vld [vmem:[#allocation13 + $0x58] sm:$0xff]  ;;  %v3220_v41 = vld [vmem:[#allocation13 + $0x20] sm:$0xff]  ;;  %v3226_v42 = vld [vmem:[#allocation13 + $0x50] sm:$0xff] }
 0x673   :  { %v3238_v45 = vld [vmem:[#allocation13 + $0xb0] sm:$0xff] }
 0x675   :  { %1659 = vmatpush.bf16.msrb.mxu0 %v3230_v11 }
 0x676   :  { %1805 = vmatpush.bf16.msrb.mxu3 %v3230_v11  ;;  %1720 = vmatpush.bf16.msrb.mxu1 %v3222_v37 }
 0x679   :  { %v1454_v14 = vld [vmem:[#allocation7 + $0x8] sm:$0xff]  ;;  %1660 = vmatpush.bf16.msrb.mxu0 %v3229_v35 }
 0x67a   :  { %v3314_v44 = vpack.i.bf16 %v1454_v14, %v1385_v43  ;;  %1806 = vmatpush.bf16.msrb.mxu3 %v3229_v35  ;;  %1721 = vmatpush.bf16.msrb.mxu1 %v3221_v39 }
 0x67c   :  { %3315 = vrot.lane.b32.xlu1 %v3314_v44, %s3509_s29  ;;  %v3225_v44 = vld [vmem:[#allocation13 + $0x48] sm:$0xff] }
 0x67d   :  { %1661 = vmatpush.bf16.msrb.mxu0 %v3228_v38 }
 0x67e   :  { %1807 = vmatpush.bf16.msrb.mxu3 %v3228_v38  ;;  %1722 = vmatpush.bf16.msrb.mxu1 %v3220_v41  ;;  %v3328_v38 = vld [vmem:[%s3994_s14] ss:$0 sm:$0xff] }
 0x681   :  { %1662 = vmatpush.bf16.msrb.mxu0 %v3227_v40 }
 0x682   :  { %1808 = vmatpush.bf16.msrb.mxu3 %v3227_v40 }
 0x685   :  { %1663 = vmatpush.bf16.msrb.mxu0 %v3226_v42 }
 0x686   :  { %1809 = vmatpush.bf16.msrb.mxu3 %v3226_v42 }
 0x689   :  { %1664 = vmatpush.bf16.msrb.mxu0 %v3225_v44 }
 0x68a   :  { %1810 = vmatpush.bf16.msrb.mxu3 %v3225_v44 }
 0x6ee   :  { %v3316_v46 = vpop.permute.xlu1 %3315 }
 0x6ef   :  { %v3318_v49 = vunpack.i.h.bf16 %v3316_v46  ;;  %v3317_v26 = vunpack.i.l.bf16 %v3316_v46  ;;  %v3218_v46 = vld [vmem:[#allocation13 + $0x10] sm:$0xff] }
 0x6f1   :  { %v1457_v50 = vmax.f32 %v1454_v14, %v3318_v49  ;;  %v1388_v51 = vmax.f32 %v1385_v43, %v3317_v26  ;;  %v3239_v43 = vld [vmem:[#allocation13 + $0xb8] sm:$0xff]  ;;  %v3224_v49 = vld [vmem:[#allocation13 + $0x40] sm:$0xff]  ;;  %v3237_v26 = vld [vmem:[#allocation13 + $0xa8] sm:$0xff] }
 0x6f2   :  { %1782 = vmatpush.bf16.msrb.mxu2 %v3239_v43  ;;  %v3219_v14 = vld [vmem:[#allocation13 + $0x18] sm:$0xff]  ;;  %1665 = vmatpush.bf16.msrb.mxu0 %v3224_v49 }
 0x6f3   :  { %v1458_v17 = vpack.c.bf16 %v1457_v50, %v1457_v50  ;;  %v1389_v20 = vpack.c.bf16 %v1388_v51, %v1388_v51  ;;  %1723 = vmatpush.bf16.msrb.mxu1 %v3219_v14  ;;  %v3217_v51 = vld [vmem:[#allocation13 + $0x8] sm:$0xff]  ;;  %1811 = vmatpush.bf16.msrb.mxu3 %v3224_v49 }
 0x6f5   :  { %1449 = vmatmul.bf16.vlgmr.msra.gmra.mxu2 %v1389_v20  ;;  %1467 = vmatmul.bf16.vlgmr.msra.gmra.mxu3 %v1458_v17  ;;  %v3236_v20 = vld [vmem:[#allocation13 + $0xa0] sm:$0xff] }
 0x6f6   :  { %1783 = vmatpush.bf16.msrb.mxu2 %v3238_v45  ;;  %1817 = vmatpush.bf16.msra.mxu0 %v3223_v34 }
 0x6f7   :  { %1724 = vmatpush.bf16.msrb.mxu1 %v3218_v46 }
 0x6fa   :  { %1784 = vmatpush.bf16.msrb.mxu2 %v3237_v26  ;;  %1818 = vmatpush.bf16.msra.mxu0 %v3222_v37 }
 0x6fb   :  { %1725 = vmatpush.bf16.msrb.mxu1 %v3217_v51 }
 0x6fe   :  { %1785 = vmatpush.bf16.msrb.mxu2 %v3236_v20  ;;  %1819 = vmatpush.bf16.msra.mxu0 %v3221_v39 }
 0x702   :  { %1820 = vmatpush.bf16.msra.mxu0 %v3220_v41 }
 0x706   :  { %1821 = vmatpush.bf16.msra.mxu0 %v3219_v14 }
 0x70a   :  { %1822 = vmatpush.bf16.msra.mxu0 %v3218_v46 }
 0x70e   :  { %1823 = vmatpush.bf16.msra.mxu0 %v3217_v51 }
 0x778   :  { %v1450_v36 = vpop.f32.mrf.mxu2  ;;  %v1468_v52 = vpop.f32.mrf.mxu3 }
 0x779   :  { %v3874_v47 = vadd.f32 %v3327_v33, %v1450_v36  ;;  %v3876_v48 = vadd.f32 %v3327_v33, %v1468_v52 }
 0x77b   :  { %v1472_v61 = vrot.slane %v3874_v47, 4  ;;  %v1479_v0 = vmul.f32 %v3874_v47, %v3874_v47  ;;  %v1487_v53 = vrot.slane %v3876_v48, 4  ;;  %v1494_v54 = vmul.f32 %v3876_v48, %v3876_v48 }
 0x77d   :  { %v1473_v55 = vadd.f32 %v1472_v61, %v3874_v47  ;;  %v1480_v56 = vrot.slane %v1479_v0, 4  ;;  %v1488_v57 = vadd.f32 %v1487_v53, %v3876_v48  ;;  %v1495_v58 = vrot.slane %v1494_v54, 4  ;;  %v3216_v61 = vld [vmem:[#allocation13] sm:$0xff] }
 0x77e   :  { %1726 = vmatpush.bf16.msrb.mxu1 %v3216_v61  ;;  %1824 = vmatpush.bf16.msra.mxu0 %v3216_v61 }
 0x77f   :  { %v1474_v59 = vrot.slane %v1473_v55, 2  ;;  %v1489_v60 = vrot.slane %v1488_v57, 2  ;;  %v1481_v62 = vadd.f32 %v1480_v56, %v1479_v0  ;;  %v1496_v63 = vadd.f32 %v1495_v58, %v1494_v54  ;;  %v3235_v54 = vld [vmem:[#allocation13 + $0x98] sm:$0xff] }
 0x780   :  { %v1452_v1 = vpop.f32.mrf.mxu2  ;;  %v1470_v2 = vpop.f32.mrf.mxu3  ;;  %1786 = vmatpush.bf16.msrb.mxu2 %v3235_v54 }
 0x781   :  { %v1475_v4 = vadd.f32 %v1474_v59, %v1473_v55  ;;  %v1490_v5 = vadd.f32 %v1489_v60, %v1488_v57  ;;  %v1482_v6 = vrot.slane %v1481_v62, 2  ;;  %v1497_v7 = vrot.slane %v1496_v63, 2  ;;  %v3234_v57 = vld [vmem:[#allocation13 + $0x90] sm:$0xff]  ;;  %v3233_v59 = vld [vmem:[#allocation13 + $0x88] sm:$0xff]  ;;  %v3232_v60 = vld [vmem:[#allocation13 + $0x80] sm:$0xff] }
 0x782   :  { %1832 = vmatpush.bf16.msra.mxu1 %v3239_v43 }
 0x783   :  { %v1476_v8 = vrot.slane %v1475_v4, 1  ;;  %v1491_v9 = vrot.slane %v1490_v5, 1  ;;  %v1483_v10 = vadd.f32 %v1482_v6, %v1481_v62  ;;  %v1498_v12 = vadd.f32 %v1497_v7, %v1496_v63 }
 0x784   :  { %1787 = vmatpush.bf16.msrb.mxu2 %v3234_v57 }
 0x785   :  { %v1477_v13 = vadd.f32 %v1476_v8, %v1475_v4  ;;  %v1492_v15 = vadd.f32 %v1491_v9, %v1490_v5  ;;  %v1484_v16 = vrot.slane %v1483_v10, 1  ;;  %v1499_v18 = vrot.slane %v1498_v12, 1  ;;  %v1525_v5 = vld [vmem:[%s3992_s3] sm:$0x1] }
 0x786   :  { %1833 = vmatpush.bf16.msra.mxu1 %v3238_v45  ;;  %v1538_v9 = vld [vmem:[%s3993_s8] sm:$0x1] }
 0x787   :  { %v1493_v19 = vadd.f32 %v1492_v15, %v1477_v13  ;;  %v1485_v21 = vadd.f32 %v1484_v16, %v1483_v10  ;;  %v1500_v22 = vadd.f32 %v1499_v18, %v1498_v12 }
 0x788   :  { %1788 = vmatpush.bf16.msrb.mxu2 %v3233_v59 }
 0x789   :  { %1502 = vrot.lane.b32.xlu2 %v1493_v19, %s3507_s13  ;;  %v1501_v23 = vadd.f32 %v1500_v22, %v1485_v21 }
 0x78a   :  { %1834 = vmatpush.bf16.msra.mxu1 %v3237_v26 }
 0x78b   :  { %1505 = vrot.lane.b32.xlu0 %v1501_v23, %s3507_s13 }
 0x78c   :  { %1789 = vmatpush.bf16.msrb.mxu2 %v3232_v60 }
 0x78e   :  { %1835 = vmatpush.bf16.msra.mxu1 %v3236_v20 }
 0x792   :  { %1836 = vmatpush.bf16.msra.mxu1 %v3235_v54 }
 0x796   :  { %1837 = vmatpush.bf16.msra.mxu1 %v3234_v57 }
 0x79a   :  { %1838 = vmatpush.bf16.msra.mxu1 %v3233_v59 }
 0x79e   :  { %1839 = vmatpush.bf16.msra.mxu1 %v3232_v60 }
 0x7e3   :  { %v1503_v24 = vpop.permute.xlu2 %1502 }
 0x7e4   :  { %v1504_v25 = vadd.f32 %v1503_v24, %v1493_v19 }
 0x7e6   :  { %1508 = vrot.lane.b32.xlu1 %v1504_v25, %s3508_s17 }
 0x7fd   :  { %v1506_v27 = vpop.permute.xlu0 %1505 }
 0x7fe   :  { %v1507_v28 = vadd.f32 %v1506_v27, %v1501_v23 }
 0x800   :  { %1511 = vrot.lane.b32.xlu2 %v1507_v28, %s3508_s17 }
 0x858   :  { %v1509_v3 = vpop.permute.xlu1 %1508 }
 0x859   :  { %v1510_v29 = vadd.f32 %v1509_v3, %v1504_v25 }
 0x85a   :  { %v1512_v30 = vpop.permute.xlu2 %1511 }
 0x85b   :  { %v1513_v31 = vadd.f32 %v1512_v30, %v1507_v28  ;;  %1514 = vrot.lane.b32.xlu0 %v1510_v29, %s3499_s0 }
 0x85d   :  { %1517 = vrot.lane.b32.xlu1 %v1513_v31, %s3499_s0 }
 0x8cd   :  { %v1515_v50 = vpop.permute.xlu0 %1514 }
 0x8ce   :  { %v1516_v17 = vadd.f32 %v1515_v50, %v1510_v29 }
 0x8cf   :  { %v1518_v33 = vpop.permute.xlu1 %1517 }
 0x8d0   :  { %v1520_v36 = vmul.f32 0.0078125, %v1516_v17  ;;  %v1519_v52 = vadd.f32 %v1518_v33, %v1513_v31 }
 0x8d2   :  { %v1522_v0 = vmul.f32 %v1520_v36, %v1520_v36  ;;  %v1521_v53 = vmul.f32 0.0078125, %v1519_v52 }
 0x8d4   :  { %v1523_v55 = vsub.f32 %v1521_v53, %v1522_v0 }
 0x8d6   :  { %v1524_v56 = vmax.f32 %v1523_v55, 0.0 }
 0x8d8   :  { %v1526_v58 = vadd.f32 1e-05, %v1524_v56 }
 0x8da   :  { %3335 = vrsqrt.f32 %v1526_v58  ;;  %vm1533_vm9 = vweird.f32 %v1526_v58 }
 0x8e0   :  { %v3336_v62 = vpop.eup %3335 }
 0x8e1   :  { %v1528_v63 = vmul.f32 %v3336_v62, %v1526_v58  ;;  %vm1534_vm8 = vweird.f32 %v3336_v62 }
 0x8e2   :  { %vm1535_vm10 = vmor %vm1533_vm9, %vm1534_vm8 }
 0x8e3   :  { %v1529_v1 = vmul.f32 %v3336_v62, %v1528_v63 }
 0x8e5   :  { %v1530_v2 = vmul.f32 0.5, %v1529_v1 }
 0x8e7   :  { %v1531_v4 = vsub.f32 1.5, %v1530_v2 }
 0x8e9   :  { %v1532_v6 = vmul.f32 %v3336_v62, %v1531_v4 }
 0x8eb   :  { %v1536_v7 = vsel %vm1535_vm10, %v3336_v62, %v1532_v6 }
 0x8ec   :  { %v1537_v8 = vmul.f32 %v1536_v7, %v1525_v5 }
 0x8ee   :  { %v1539_v10 = vmul.f32 %v1537_v8, %v1520_v36  ;;  %v1542_v12 = vperm.slane %v1537_v8, 0 }
 0x8f0   :  { %v1540_v13 = vsub.f32 %v1538_v9, %v1539_v10  ;;  %v1544_v15 = vmul.f32 %v1542_v12, %v3874_v47  ;;  %v1550_v18 = vmul.f32 %v1542_v12, %v3876_v48 }
 0x8f2   :  { %v1546_v16 = vperm.slane %v1540_v13, 0 }
 0x8f4   :  { %v1548_v19 = vadd.f32 %v1546_v16, %v1544_v15  ;;  %v1551_v21 = vadd.f32 %v1550_v18, %v1546_v16 }
 0x8f6   :  { %v3896_v22 = vmax.f32 %v1548_v19, 0.0  ;;  %v3898_v23 = vmax.f32 %v1551_v21, 0.0 }
 0x8f8   :  { %1553 = vst [vmem:[#allocation5 + $0x1] sm:$0xff] %v3896_v22  ;;  %v1609_v24 = vpack.c.bf16 %v3896_v22, %v3896_v22  ;;  %v1803_v25 = vpack.c.bf16 %v3898_v23, %v3898_v23 }
 0x8f9   :  { %1554 = vst [vmem:[#allocation5 + $0x11] sm:$0xff] %v3898_v23 }
 0x8fa   :  { %1666 = vmatmul.bf16.vlgmr.msrb.gmra.mxu0 %v1609_v24  ;;  %1812 = vmatmul.bf16.vlgmr.msrb.gmra.mxu3 %v1803_v25 }
 0x8ff   :  { %v1606_v47 = vld [vmem:[#allocation5] sm:$0xff] }
 0x900   :  { %v1732_v48 = vld [vmem:[#allocation5 + $0x2] sm:$0xff]  ;;  %v1607_v27 = vpack.c.bf16 %v1606_v47, %v1606_v47  ;;  %v1800_v3 = vld [vmem:[#allocation5 + $0x10] sm:$0xff] }
 0x901   :  { %v1733_v28 = vpack.c.bf16 %v1732_v48, %v1732_v48  ;;  %v1801_v29 = vpack.c.bf16 %v1800_v3, %v1800_v3  ;;  %v1830_v30 = vld [vmem:[#allocation5 + $0x12] sm:$0xff]  ;;  %v3253_v3 = vld [vmem:[#allocation14 + $0x68] sm:$0xff] }
 0x902   :  { %1727 = vmatmul.bf16.vlgmr.msrb.gmra.mxu1 %v1607_v27  ;;  %v1831_v31 = vpack.c.bf16 %v1830_v30, %v1830_v30  ;;  %v3255_v48 = vld [vmem:[#allocation14 + $0x78] sm:$0xff]  ;;  %v3254_v27 = vld [vmem:[#allocation14 + $0x70] sm:$0xff]  ;;  %v3252_v30 = vld [vmem:[#allocation14 + $0x60] sm:$0xff] }
 0x903   :  { %1790 = vmatmul.bf16.vlgmr.msrb.gmra.mxu2 %v1733_v28  ;;  %2179 = vmatpush.bf16.msrb.mxu1 %v3255_v48  ;;  %v3247_v28 = vld [vmem:[#allocation14 + $0x38] sm:$0xff] }
 0x904   :  { %2033 = vmatpush.bf16.msra.mxu2 %v3255_v48  ;;  %2094 = vmatpush.bf16.msra.mxu3 %v3247_v28 }
 0x907   :  { %2180 = vmatpush.bf16.msrb.mxu1 %v3254_v27 }
 0x908   :  { %2034 = vmatpush.bf16.msra.mxu2 %v3254_v27 }
 0x90a   :  { %1825 = vmatmul.bf16.vlgmr.msra.gmra.mxu0 %v1801_v29  ;;  %v3246_v29 = vld [vmem:[#allocation14 + $0x30] sm:$0xff] }
 0x90b   :  { %2181 = vmatpush.bf16.msrb.mxu1 %v3253_v3  ;;  %2095 = vmatpush.bf16.msra.mxu3 %v3246_v29 }
 0x90c   :  { %2035 = vmatpush.bf16.msra.mxu2 %v3253_v3 }
 0x90f   :  { %2182 = vmatpush.bf16.msrb.mxu1 %v3252_v30 }
 0x910   :  { %2036 = vmatpush.bf16.msra.mxu2 %v3252_v30 }
 0x912   :  { %1840 = vmatmul.bf16.vlgmr.msra.gmra.mxu1 %v1831_v31  ;;  %v3245_v31 = vld [vmem:[#allocation14 + $0x28] sm:$0xff] }
 0x913   :  { %2096 = vmatpush.bf16.msra.mxu3 %v3245_v31 }
 0x977   :  { %v1667_v32 = vpop.f32.mrf.mxu0 }
 0x97d   :  { %v1813_v11 = vpop.f32.mrf.mxu3 }
 0x97f   :  { %v1728_v34 = vpop.f32.mrf.mxu1  ;;  %v1669_v35 = vpop.f32.mrf.mxu0 }
 0x980   :  { %v1729_v37 = vadd.f32 %v1728_v34, %v1667_v32  ;;  %v3251_v32 = vld [vmem:[#allocation14 + $0x58] sm:$0xff]  ;;  %v3250_v34 = vld [vmem:[#allocation14 + $0x50] sm:$0xff] }
 0x981   :  { %2037 = vmatpush.bf16.msra.mxu2 %v3251_v32  ;;  %2183 = vmatpush.bf16.msrb.mxu1 %v3251_v32  ;;  %v3263_v35 = vld [vmem:[#allocation14 + $0xb8] sm:$0xff] }
 0x982   :  { %2157 = vmatpush.bf16.msrb.mxu0 %v3263_v35 }
 0x985   :  { %v1815_v40 = vpop.f32.mrf.mxu3  ;;  %2038 = vmatpush.bf16.msra.mxu2 %v3250_v34  ;;  %2184 = vmatpush.bf16.msrb.mxu1 %v3250_v34  ;;  %v3329_v34 = vld [vmem:[%s3997_s23] ss:$0 sm:$0xff] }
 0x986   :  { %v1791_v39 = vpop.f32.mrf.mxu2  ;;  %v3242_v40 = vld [vmem:[#allocation14 + $0x10] sm:$0xff] }
 0x987   :  { %v1795_v41 = vadd.f32 %v1791_v39, %v1729_v37  ;;  %v1730_v42 = vpop.f32.mrf.mxu1  ;;  %v1826_v43 = vpop.f32.mrf.mxu0  ;;  %v3243_v37 = vld [vmem:[#allocation14 + $0x18] sm:$0xff]  ;;  %v3262_v39 = vld [vmem:[#allocation14 + $0xb0] sm:$0xff] }
 0x988   :  { %v1827_v26 = vadd.f32 %v1826_v43, %v1813_v11  ;;  %v3244_v11 = vld [vmem:[#allocation14 + $0x20] sm:$0xff]  ;;  %2158 = vmatpush.bf16.msrb.mxu0 %v3262_v39  ;;  %v3261_v42 = vld [vmem:[#allocation14 + $0xa8] sm:$0xff] }
 0x989   :  { %v3907_v14 = vadd.f32 %v3328_v38, %v1795_v41  ;;  %2097 = vmatpush.bf16.msra.mxu3 %v3244_v11  ;;  %v3248_v41 = vld [vmem:[#allocation14 + $0x40] sm:$0xff] }
 0x98b   :  { %v1847_v44 = vrot.slane %v3907_v14, 4  ;;  %v1854_v45 = vmul.f32 %v3907_v14, %v3907_v14 }
 0x98c   :  { %2159 = vmatpush.bf16.msrb.mxu0 %v3261_v42 }
 0x98d   :  { %v1855_v46 = vrot.slane %v1854_v45, 4  ;;  %v1848_v50 = vadd.f32 %v1847_v44, %v3907_v14  ;;  %2098 = vmatpush.bf16.msra.mxu3 %v3243_v37  ;;  %v3241_v44 = vld [vmem:[#allocation14 + $0x8] sm:$0xff] }
 0x98e   :  { %v1793_v49 = vpop.f32.mrf.mxu2 }
 0x98f   :  { %v1841_v51 = vpop.f32.mrf.mxu1  ;;  %v1828_v17 = vpop.f32.mrf.mxu0  ;;  %v1856_v33 = vadd.f32 %v1855_v46, %v1854_v45  ;;  %v1849_v52 = vrot.slane %v1848_v50, 2  ;;  %v3260_v46 = vld [vmem:[#allocation14 + $0xa0] sm:$0xff] }
 0x990   :  { %v1845_v20 = vadd.f32 %v1841_v51, %v1827_v26  ;;  %2160 = vmatpush.bf16.msrb.mxu0 %v3260_v46  ;;  %v3240_v51 = vld [vmem:[#allocation14] sm:$0xff] }
 0x991   :  { %v1857_v53 = vrot.slane %v1856_v33, 2  ;;  %v1850_v54 = vadd.f32 %v1849_v52, %v1848_v50  ;;  %2099 = vmatpush.bf16.msra.mxu3 %v3242_v40 }
 0x992   :  { %v3913_v36 = vadd.f32 %v3328_v38, %v1845_v20  ;;  %v3249_v38 = vld [vmem:[#allocation14 + $0x48] sm:$0xff] }
 0x993   :  { %v1858_v59 = vadd.f32 %v1857_v53, %v1856_v33  ;;  %v1851_v62 = vrot.slane %v1850_v54, 1  ;;  %2039 = vmatpush.bf16.msra.mxu2 %v3249_v38  ;;  %2185 = vmatpush.bf16.msrb.mxu1 %v3249_v38  ;;  %v3259_v33 = vld [vmem:[#allocation14 + $0x98] sm:$0xff] }
 0x994   :  { %v1862_v61 = vrot.slane %v3913_v36, 4  ;;  %v1869_v0 = vmul.f32 %v3913_v36, %v3913_v36  ;;  %2161 = vmatpush.bf16.msrb.mxu0 %v3259_v33 }
 0x995   :  { %v1859_v4 = vrot.slane %v1858_v59, 1  ;;  %v1852_v6 = vadd.f32 %v1851_v62, %v1850_v54  ;;  %2100 = vmatpush.bf16.msra.mxu3 %v3241_v44  ;;  %v3257_v54 = vld [vmem:[#allocation14 + $0x88] sm:$0xff]  ;;  %v1900_v62 = vld [vmem:[%s3995_s19] sm:$0x1] }
 0x996   :  { %v1863_v55 = vadd.f32 %v1862_v61, %v3913_v36  ;;  %v1870_v56 = vrot.slane %v1869_v0, 4 }
 0x997   :  { %v1843_v57 = vpop.f32.mrf.mxu1  ;;  %v1860_v10 = vadd.f32 %v1859_v4, %v1858_v59  ;;  %2040 = vmatpush.bf16.msra.mxu2 %v3248_v41  ;;  %2186 = vmatpush.bf16.msrb.mxu1 %v3248_v41  ;;  %v1913_v4 = vld [vmem:[%s3996_s30] sm:$0x1] }
 0x998   :  { %v1864_v58 = vrot.slane %v1863_v55, 2  ;;  %v1871_v60 = vadd.f32 %v1870_v56, %v1869_v0  ;;  %v3258_v0 = vld [vmem:[#allocation14 + $0x90] sm:$0xff] }
 0x999   :  { %2101 = vmatpush.bf16.msra.mxu3 %v3240_v51  ;;  %2162 = vmatpush.bf16.msrb.mxu0 %v3258_v0 }
 0x99a   :  { %v1865_v63 = vadd.f32 %v1864_v58, %v1863_v55  ;;  %v1872_v1 = vrot.slane %v1871_v60, 2  ;;  %v3256_v55 = vld [vmem:[#allocation14 + $0x80] sm:$0xff] }
 0x99b   :  { %2192 = vmatpush.bf16.msrb.mxu2 %v3247_v28 }
 0x99c   :  { %v1866_v2 = vrot.slane %v1865_v63, 1  ;;  %v1873_v5 = vadd.f32 %v1872_v1, %v1871_v60 }
 0x99d   :  { %2207 = vmatpush.bf16.msrb.mxu3 %v3263_v35  ;;  %2163 = vmatpush.bf16.msrb.mxu0 %v3257_v54 }
 0x99e   :  { %v1867_v7 = vadd.f32 %v1866_v2, %v1865_v63  ;;  %v1874_v8 = vrot.slane %v1873_v5, 1 }
 0x99f   :  { %2193 = vmatpush.bf16.msrb.mxu2 %v3246_v29 }
 0x9a0   :  { %v1868_v9 = vadd.f32 %v1867_v7, %v1852_v6  ;;  %v1875_v12 = vadd.f32 %v1874_v8, %v1873_v5 }
 0x9a1   :  { %2208 = vmatpush.bf16.msrb.mxu3 %v3262_v39  ;;  %2164 = vmatpush.bf16.msrb.mxu0 %v3256_v55 }
 0x9a2   :  { %1877 = vrot.lane.b32.xlu2 %v1868_v9, %s3507_s13  ;;  %v1876_v13 = vadd.f32 %v1875_v12, %v1860_v10 }
 0x9a3   :  { %2194 = vmatpush.bf16.msrb.mxu2 %v3245_v31 }
 0x9a4   :  { %1880 = vrot.lane.b32.xlu0 %v1876_v13, %s3507_s13 }
 0x9a5   :  { %2209 = vmatpush.bf16.msrb.mxu3 %v3261_v42 }
 0x9a7   :  { %2195 = vmatpush.bf16.msrb.mxu2 %v3244_v11 }
 0x9a9   :  { %2210 = vmatpush.bf16.msrb.mxu3 %v3260_v46 }
 0x9ab   :  { %2196 = vmatpush.bf16.msrb.mxu2 %v3243_v37 }
 0x9ad   :  { %2211 = vmatpush.bf16.msrb.mxu3 %v3259_v33 }
 0x9af   :  { %2197 = vmatpush.bf16.msrb.mxu2 %v3242_v40 }
 0x9b1   :  { %2212 = vmatpush.bf16.msrb.mxu3 %v3258_v0 }
 0x9b3   :  { %2198 = vmatpush.bf16.msrb.mxu2 %v3241_v44 }
 0x9b5   :  { %2213 = vmatpush.bf16.msrb.mxu3 %v3257_v54 }
 0x9b7   :  { %2199 = vmatpush.bf16.msrb.mxu2 %v3240_v51 }
 0x9b9   :  { %2214 = vmatpush.bf16.msrb.mxu3 %v3256_v55 }
 0x9fc   :  { %v1878_v15 = vpop.permute.xlu2 %1877 }
 0x9fd   :  { %v1879_v16 = vadd.f32 %v1878_v15, %v1868_v9 }
 0x9ff   :  { %1883 = vrot.lane.b32.xlu1 %v1879_v16, %s3508_s17 }
 0xa16   :  { %v1881_v18 = vpop.permute.xlu0 %1880 }
 0xa17   :  { %v1882_v19 = vadd.f32 %v1881_v18, %v1876_v13 }
 0xa19   :  { %1886 = vrot.lane.b32.xlu2 %v1882_v19, %s3508_s17 }
 0xa71   :  { %v1884_v21 = vpop.permute.xlu1 %1883 }
 0xa72   :  { %v1885_v24 = vadd.f32 %v1884_v21, %v1879_v16 }
 0xa73   :  { %v1887_v25 = vpop.permute.xlu2 %1886 }
 0xa74   :  { %v1888_v47 = vadd.f32 %v1887_v25, %v1882_v19  ;;  %1889 = vrot.lane.b32.xlu0 %v1885_v24, %s3499_s0 }
 0xa76   :  { %1892 = vrot.lane.b32.xlu1 %v1888_v47, %s3499_s0 }
 0xae6   :  { %v1890_v43 = vpop.permute.xlu0 %1889 }
 0xae7   :  { %v1891_v45 = vadd.f32 %v1890_v43, %v1885_v24 }
 0xae8   :  { %v1893_v49 = vpop.permute.xlu1 %1892 }
 0xae9   :  { %v1895_v26 = vmul.f32 0.0078125, %v1891_v45  ;;  %v1894_v50 = vadd.f32 %v1893_v49, %v1888_v47 }
 0xaeb   :  { %v1897_v17 = vmul.f32 %v1895_v26, %v1895_v26  ;;  %v1896_v20 = vmul.f32 0.0078125, %v1894_v50 }
 0xaed   :  { %v1898_v52 = vsub.f32 %v1896_v20, %v1897_v17 }
 0xaef   :  { %v1899_v61 = vmax.f32 %v1898_v52, 0.0 }
 0xaf1   :  { %v1901_v53 = vadd.f32 1e-05, %v1899_v61 }
 0xaf3   :  { %3337 = vrsqrt.f32 %v1901_v53  ;;  %vm1908_vm12 = vweird.f32 %v1901_v53 }
 0xaf9   :  { %v3338_v56 = vpop.eup %3337 }
 0xafa   :  { %v1903_v57 = vmul.f32 %v3338_v56, %v1901_v53  ;;  %vm1909_vm11 = vweird.f32 %v3338_v56 }
 0xafb   :  { %vm1910_vm13 = vmor %vm1908_vm12, %vm1909_vm11 }
 0xafc   :  { %v1904_v58 = vmul.f32 %v3338_v56, %v1903_v57 }
 0xafe   :  { %v1905_v59 = vmul.f32 0.5, %v1904_v58 }
 0xb00   :  { %v1906_v60 = vsub.f32 1.5, %v1905_v59 }
 0xb02   :  { %v1907_v63 = vmul.f32 %v3338_v56, %v1906_v60 }
 0xb04   :  { %v1911_v1 = vsel %vm1910_vm13, %v3338_v56, %v1907_v63 }
 0xb05   :  { %v1912_v2 = vmul.f32 %v1911_v1, %v1900_v62 }
 0xb07   :  { %v1914_v5 = vmul.f32 %v1912_v2, %v1895_v26  ;;  %v1917_v6 = vperm.slane %v1912_v2, 0 }
 0xb09   :  { %v1915_v7 = vsub.f32 %v1913_v4, %v1914_v5  ;;  %v1919_v8 = vmul.f32 %v1917_v6, %v3907_v14  ;;  %v1925_v10 = vmul.f32 %v1917_v6, %v3913_v36 }
 0xb0b   :  { %v1921_v9 = vperm.slane %v1915_v7, 0 }
 0xb0d   :  { %v1923_v12 = vadd.f32 %v1921_v9, %v1919_v8  ;;  %v1926_v13 = vadd.f32 %v1925_v10, %v1921_v9 }
 0xb0f   :  { %v1924_v15 = vmax.f32 %v1923_v12, 0.0  ;;  %v1927_v16 = vmax.f32 %v1926_v13, 0.0 }
 0xb11   :  { %1928 = vst [vmem:[#allocation6 + $0x1] sm:$0xff] %v1924_v15  ;;  %v1984_v18 = vpack.c.bf16 %v1924_v15, %v1924_v15  ;;  %v2178_v19 = vpack.c.bf16 %v1927_v16, %v1927_v16 }
 0xb12   :  { %1929 = vst [vmem:[#allocation6 + $0x11] sm:$0xff] %v1927_v16 }
 0xb13   :  { %2041 = vmatmul.bf16.vlgmr.msra.gmra.mxu2 %v1984_v18  ;;  %2187 = vmatmul.bf16.vlgmr.msrb.gmra.mxu1 %v2178_v19 }
 0xb18   :  { %v1981_v21 = vld [vmem:[#allocation6] sm:$0xff] }
 0xb19   :  { %v2107_v24 = vld [vmem:[#allocation6 + $0x2] sm:$0xff]  ;;  %v1982_v25 = vpack.c.bf16 %v1981_v21, %v1981_v21  ;;  %v2175_v14 = vld [vmem:[#allocation6 + $0x10] sm:$0xff] }
 0xb1a   :  { %v2108_v47 = vpack.c.bf16 %v2107_v24, %v2107_v24  ;;  %v2176_v48 = vpack.c.bf16 %v2175_v14, %v2175_v14  ;;  %v2205_v36 = vld [vmem:[#allocation6 + $0x12] sm:$0xff] }
 0xb1b   :  { %2102 = vmatmul.bf16.vlgmr.msra.gmra.mxu3 %v1982_v25  ;;  %v2206_v27 = vpack.c.bf16 %v2205_v36, %v2205_v36 }
 0xb1c   :  { %2165 = vmatmul.bf16.vlgmr.msrb.gmra.mxu0 %v2108_v47 }
 0xb23   :  { %2200 = vmatmul.bf16.vlgmr.msrb.gmra.mxu2 %v2176_v48 }
 0xb2b   :  { %2215 = vmatmul.bf16.vlgmr.msrb.gmra.mxu3 %v2206_v27 }
 0xb90   :  { %v2188_v28 = vpop.f32.mrf.mxu1 }
 0xb96   :  { %v2042_v3 = vpop.f32.mrf.mxu2 }
 0xb98   :  { %v2190_v30 = vpop.f32.mrf.mxu1 }
 0xb99   :  { %v2166_v29 = vpop.f32.mrf.mxu0 }
 0xb9e   :  { %v2103_v31 = vpop.f32.mrf.mxu3  ;;  %v2044_v32 = vpop.f32.mrf.mxu2 }
 0xb9f   :  { %v2104_v11 = vadd.f32 %v2103_v31, %v2042_v3 }
 0xba1   :  { %v2168_v35 = vpop.f32.mrf.mxu0  ;;  %v2170_v37 = vadd.f32 %v2166_v29, %v2104_v11 }
 0xba2   :  { %v2279_v35 = vld [vmem:[%s3998_s7] sm:$0x1] }
 0xba3   :  { %v2174_v38 = vadd.f32 %v3329_v34, %v2170_v37 }
 0xba5   :  { %v3931_v39 = vadd.f32 %v2174_v38, %v3896_v22 }
 0xba6   :  { %v2105_v40 = vpop.f32.mrf.mxu3  ;;  %v2201_v41 = vpop.f32.mrf.mxu2 }
 0xba7   :  { %v2233_v42 = vmul.f32 %v3931_v39, %v3931_v39  ;;  %v2226_v43 = vrot.slane %v3931_v39, 4  ;;  %v2202_v44 = vadd.f32 %v2201_v41, %v2188_v28  ;;  %v2292_v41 = vld [vmem:[%s3999_s18] sm:$0x1] }
 0xba9   :  { %v2234_v45 = vrot.slane %v2233_v42, 4  ;;  %v2227_v50 = vadd.f32 %v2226_v43, %v3931_v39 }
 0xbab   :  { %v2235_v17 = vadd.f32 %v2234_v45, %v2233_v42  ;;  %v2228_v22 = vrot.slane %v2227_v50, 2 }
 0xbad   :  { %v2236_v52 = vrot.slane %v2235_v17, 2  ;;  %v2229_v53 = vadd.f32 %v2228_v22, %v2227_v50 }
 0xbae   :  { %v2216_v46 = vpop.f32.mrf.mxu3  ;;  %v2203_v49 = vpop.f32.mrf.mxu2 }
 0xbaf   :  { %v2220_v26 = vadd.f32 %v2216_v46, %v2202_v44  ;;  %v2237_v57 = vadd.f32 %v2236_v52, %v2235_v17  ;;  %v2230_v59 = vrot.slane %v2229_v53, 1  ;;  %v3270_v17 = vld [vmem:[#allocation16 + $0x30] sm:$0xff]  ;;  %v3269_v52 = vld [vmem:[#allocation16 + $0x28] sm:$0xff] }
 0xbb1   :  { %v2221_v51 = vadd.f32 %v3329_v34, %v2220_v26  ;;  %v2238_v63 = vrot.slane %v2237_v57, 1  ;;  %v2231_v2 = vadd.f32 %v2230_v59, %v2229_v53  ;;  %v3271_v26 = vld [vmem:[#allocation16 + $0x38] sm:$0xff] }
 0xbb2   :  { %2418 = vmatpush.bf16.msra.mxu0 %v3271_v26  ;;  %2436 = vmatpush.bf16.msra.mxu1 %v3271_v26  ;;  %v3267_v53 = vld [vmem:[#allocation16 + $0x18] sm:$0xff] }
 0xbb3   :  { %v3938_v20 = vadd.f32 %v2221_v51, %v3898_v23  ;;  %v2239_v7 = vadd.f32 %v2238_v63, %v2237_v57 }
 0xbb5   :  { %v2241_v33 = vrot.slane %v3938_v20, 4  ;;  %v2248_v61 = vmul.f32 %v3938_v20, %v3938_v20 }
 0xbb6   :  { %v2218_v0 = vpop.f32.mrf.mxu3  ;;  %2419 = vmatpush.bf16.msra.mxu0 %v3270_v17  ;;  %2437 = vmatpush.bf16.msra.mxu1 %v3270_v17 }
 0xbb7   :  { %v2242_v54 = vadd.f32 %v2241_v33, %v3938_v20  ;;  %v2249_v55 = vrot.slane %v2248_v61, 4 }
 0xbb9   :  { %v2243_v56 = vrot.slane %v2242_v54, 2  ;;  %v2250_v58 = vadd.f32 %v2249_v55, %v2248_v61 }
 0xbba   :  { %2420 = vmatpush.bf16.msra.mxu0 %v3269_v52  ;;  %2438 = vmatpush.bf16.msra.mxu1 %v3269_v52 }
 0xbbb   :  { %v2244_v60 = vadd.f32 %v2243_v56, %v2242_v54  ;;  %v2251_v62 = vrot.slane %v2250_v58, 2 }
 0xbbd   :  { %v2245_v23 = vrot.slane %v2244_v60, 1  ;;  %v2252_v1 = vadd.f32 %v2251_v62, %v2250_v58 }
 0xbbf   :  { %v2246_v4 = vadd.f32 %v2245_v23, %v2244_v60  ;;  %v2253_v5 = vrot.slane %v2252_v1, 1 }
 0xbc1   :  { %v2247_v6 = vadd.f32 %v2246_v4, %v2231_v2  ;;  %v2254_v8 = vadd.f32 %v2253_v5, %v2252_v1 }
 0xbc3   :  { %2256 = vrot.lane.b32.xlu2 %v2247_v6, %s3507_s13  ;;  %v2255_v9 = vadd.f32 %v2254_v8, %v2239_v7 }
 0xbc5   :  { %2259 = vrot.lane.b32.xlu0 %v2255_v9, %s3507_s13 }
 0xc1d   :  { %v2257_v10 = vpop.permute.xlu2 %2256 }
 0xc1e   :  { %v2258_v12 = vadd.f32 %v2257_v10, %v2247_v6 }
 0xc20   :  { %2262 = vrot.lane.b32.xlu1 %v2258_v12, %s3508_s17 }
 0xc37   :  { %v2260_v13 = vpop.permute.xlu0 %2259 }
 0xc38   :  { %v2261_v15 = vadd.f32 %v2260_v13, %v2255_v9  ;;  %v3266_v13 = vld [vmem:[#allocation16 + $0x10] sm:$0xff] }
 0xc3a   :  { %2265 = vrot.lane.b32.xlu2 %v2261_v15, %s3508_s17 }
 0xc92   :  { %v2263_v16 = vpop.permute.xlu1 %2262 }
 0xc93   :  { %v2264_v18 = vadd.f32 %v2263_v16, %v2258_v12  ;;  %v3265_v16 = vld [vmem:[#allocation16 + $0x8] sm:$0xff] }
 0xc94   :  { %v2266_v19 = vpop.permute.xlu2 %2265 }
 0xc95   :  { %v2267_v21 = vadd.f32 %v2266_v19, %v2261_v15  ;;  %2268 = vrot.lane.b32.xlu0 %v2264_v18, %s3499_s0 }
 0xc97   :  { %2271 = vrot.lane.b32.xlu1 %v2267_v21, %s3499_s0 }
 0xd07   :  { %v2269_v24 = vpop.permute.xlu0 %2268 }
 0xd08   :  { %v2270_v25 = vadd.f32 %v2269_v24, %v2264_v18  ;;  %v3264_v24 = vld [vmem:[#allocation16] sm:$0xff] }
 0xd09   :  { %v2272_v47 = vpop.permute.xlu1 %2271 }
 0xd0a   :  { %v2274_v14 = vmul.f32 0.0078125, %v2270_v25  ;;  %v2273_v48 = vadd.f32 %v2272_v47, %v2267_v21 }
 0xd0c   :  { %v2276_v36 = vmul.f32 %v2274_v14, %v2274_v14  ;;  %v2275_v27 = vmul.f32 0.0078125, %v2273_v48 }
 0xd0e   :  { %v2277_v28 = vsub.f32 %v2275_v27, %v2276_v36 }
 0xd10   :  { %v2278_v3 = vmax.f32 %v2277_v28, 0.0 }
 0xd12   :  { %v2280_v29 = vadd.f32 1e-05, %v2278_v3 }
 0xd14   :  { %3339 = vrsqrt.f32 %v2280_v29  ;;  %vm2287_vm15 = vweird.f32 %v2280_v29 }
 0xd1a   :  { %v3340_v30 = vpop.eup %3339 }
 0xd1b   :  { %v2282_v31 = vmul.f32 %v3340_v30, %v2280_v29  ;;  %vm2288_vm14 = vweird.f32 %v3340_v30 }
 0xd1c   :  { %vm2289_vm0 = vmor %vm2287_vm15, %vm2288_vm14 }
 0xd1d   :  { %v2283_v32 = vmul.f32 %v3340_v30, %v2282_v31 }
 0xd1f   :  { %v2284_v11 = vmul.f32 0.5, %v2283_v32 }
 0xd21   :  { %v2285_v34 = vsub.f32 1.5, %v2284_v11 }
 0xd23   :  { %v2286_v37 = vmul.f32 %v3340_v30, %v2285_v34 }
 0xd25   :  { %v2290_v38 = vsel %vm2289_vm0, %v3340_v30, %v2286_v37 }
 0xd26   :  { %v2291_v40 = vmul.f32 %v2290_v38, %v2279_v35 }
 0xd28   :  { %v2293_v42 = vmul.f32 %v2291_v40, %v2274_v14  ;;  %v2296_v43 = vperm.slane %v2291_v40, 0 }
 0xd2a   :  { %v2294_v44 = vsub.f32 %v2292_v41, %v2293_v42  ;;  %v2298_v45 = vmul.f32 %v2296_v43, %v3931_v39  ;;  %v2304_v49 = vmul.f32 %v2296_v43, %v3938_v20  ;;  %v3268_v39 = vld [vmem:[#allocation16 + $0x20] sm:$0xff] }
 0xd2b   :  { %2421 = vmatpush.bf16.msra.mxu0 %v3268_v39  ;;  %2439 = vmatpush.bf16.msra.mxu1 %v3268_v39 }
 0xd2c   :  { %v2300_v46 = vperm.slane %v2294_v44, 0 }
 0xd2e   :  { %v2302_v50 = vadd.f32 %v2300_v46, %v2298_v45  ;;  %v2305_v51 = vadd.f32 %v2304_v49, %v2300_v46 }
 0xd2f   :  { %2422 = vmatpush.bf16.msra.mxu0 %v3267_v53  ;;  %2440 = vmatpush.bf16.msra.mxu1 %v3267_v53 }
 0xd30   :  { %v2303_v22 = vmax.f32 %v2302_v50, 0.0  ;;  %v2306_v33 = vmax.f32 %v2305_v51, 0.0 }
 0xd32   :  { %2307 = vst [vmem:[#allocation5 + $0x1] sm:$0xff] %v2303_v22 }
 0xd33   :  { %2308 = vst [vmem:[#allocation5 + $0x11] sm:$0xff] %v2306_v33  ;;  %2423 = vmatpush.bf16.msra.mxu0 %v3266_v13  ;;  %2441 = vmatpush.bf16.msra.mxu1 %v3266_v13 }
 0xd34   :  { %2309 = vst [vmem:[%s3659_s27] sm:$0xff] %v2303_v22 }
 0xd35   :  { %3114 = vst [vmem:[%s3659_s27 + $0x8] sm:$0xff] %v2306_v33  ;;  %s4000_s27 = sld [smem:[#allocation30_spill]] }
 0xd37   :  { %2424 = vmatpush.bf16.msra.mxu0 %v3265_v16  ;;  %2442 = vmatpush.bf16.msra.mxu1 %v3265_v16 }
 0xd39   :  { %v2312_v61 = vld [vmem:[#allocation5 + $0x1] sm:$0x1]  ;;  %v2313_v20 = vld [vmem:[#allocation5 + $0x2] sm:$0x1]  ;;  %v2316_v0 = vld [vmem:[#allocation5 + $0x3] sm:$0x1] }
 0xd3a   :  { %v2314_v54 = vmax.f32 %v2312_v61, %v2313_v20  ;;  %v2317_v55 = vld [vmem:[#allocation5 + $0x4] sm:$0x1]  ;;  %v2320_v56 = vld [vmem:[#allocation5 + $0x5] sm:$0x1]  ;;  %v2321_v57 = vld [vmem:[#allocation5 + $0x6] sm:$0x1] }
 0xd3b   :  { %v2318_v58 = vmax.f32 %v2316_v0, %v2317_v55  ;;  %v2322_v59 = vmax.f32 %v2320_v56, %v2321_v57  ;;  %v2324_v60 = vld [vmem:[#allocation5 + $0x7] sm:$0x1]  ;;  %v2325_v62 = vld [vmem:[#allocation5 + $0x8] sm:$0x1]  ;;  %v2328_v23 = vld [vmem:[#allocation5 + $0x11] sm:$0x1]  ;;  %2425 = vmatpush.bf16.msra.mxu0 %v3264_v24  ;;  %2443 = vmatpush.bf16.msra.mxu1 %v3264_v24 }
 0xd3c   :  { %2315 = vst [vmem:[#allocation8] sm:$0x1] %v2314_v54  ;;  %v2326_v63 = vmax.f32 %v2324_v60, %v2325_v62  ;;  %v2329_v1 = vld [vmem:[#allocation5 + $0x12] sm:$0x1]  ;;  %v2333_v2 = vld [vmem:[#allocation5 + $0x13] sm:$0x1] }
 0xd3d   :  { %2319 = vst [vmem:[#allocation8 + $0x1] sm:$0x1] %v2318_v58  ;;  %v2330_v4 = vmax.f32 %v2328_v23, %v2329_v1  ;;  %v2334_v5 = vld [vmem:[#allocation5 + $0x14] sm:$0x1]  ;;  %v2337_v6 = vld [vmem:[#allocation5 + $0x15] sm:$0x1] }
 0xd3e   :  { %2323 = vst [vmem:[#allocation8 + $0x2] sm:$0x1] %v2322_v59  ;;  %v2335_v7 = vmax.f32 %v2333_v2, %v2334_v5  ;;  %v2338_v8 = vld [vmem:[#allocation5 + $0x16] sm:$0x1]  ;;  %v2341_v9 = vld [vmem:[#allocation5 + $0x17] sm:$0x1] }
 0xd3f   :  { %2327 = vst [vmem:[#allocation8 + $0x3] sm:$0x1] %v2326_v63  ;;  %v2339_v10 = vmax.f32 %v2337_v6, %v2338_v8  ;;  %v2342_v12 = vld [vmem:[#allocation5 + $0x18] sm:$0x1]  ;;  %v3330_v3 = vld [vmem:[%s4000_s27] ss:$0 sm:$0xff] }
 0xd40   :  { %2332 = vst [vmem:[#allocation8 + $0x4] sm:$0x1] %v2330_v4  ;;  %v2343_v15 = vmax.f32 %v2341_v9, %v2342_v12 }
 0xd41   :  { %2336 = vst [vmem:[#allocation8 + $0x5] sm:$0x1] %v2335_v7 }
 0xd42   :  { %2340 = vst [vmem:[#allocation8 + $0x6] sm:$0x1] %v2339_v10 }
 0xd43   :  { %2344 = vst [vmem:[#allocation8 + $0x7] sm:$0x1] %v2343_v15 }
 0xd46   :  { %v2362_v18 = vld [vmem:[#allocation8] sm:$0xf] }
 0xd4a   :  { %v2431_v19 = vld [vmem:[#allocation8 + $0x4] sm:$0xf] }
 0xd4b   :  { %v3319_v21 = vpack.i.bf16 %v2431_v19, %v2362_v18 }
 0xd4d   :  { %3320 = vrot.lane.b32.xlu2 %v3319_v21, %s3510_s6 }
 0xda7   :  { %v3321_v25 = vpop.permute.xlu2 %3320 }
 0xda8   :  { %v3323_v47 = vunpack.i.h.bf16 %v3321_v25  ;;  %v3322_v14 = vunpack.i.l.bf16 %v3321_v25 }
 0xdaa   :  { %v2434_v48 = vmax.f32 %v2431_v19, %v3323_v47  ;;  %v2365_v36 = vmax.f32 %v2362_v18, %v3322_v14  ;;  %v2501_v47 = vld [vmem:[%s4001_s22] sm:$0x1] }
 0xdac   :  { %v2435_v27 = vpack.c.bf16 %v2434_v48, %v2434_v48  ;;  %v2366_v28 = vpack.c.bf16 %v2365_v36, %v2365_v36 }
 0xdae   :  { %2426 = vmatmul.bf16.vlgmr.msra.gmra.mxu0 %v2366_v28  ;;  %2444 = vmatmul.bf16.vlgmr.msra.gmra.mxu1 %v2435_v27  ;;  %v2514_v27 = vld [vmem:[%s3649_s12] sm:$0x1] }
 0xe2b   :  { %v2427_v29 = vpop.f32.mrf.mxu0  ;;  %v2445_v30 = vpop.f32.mrf.mxu1 }
 0xe2c   :  { %v3957_v31 = vadd.f32 %v3330_v3, %v2427_v29  ;;  %v3959_v32 = vadd.f32 %v3330_v3, %v2445_v30 }
 0xe2e   :  { %v2450_v11 = vsel %vm2449_vm1, %v3957_v31, 0.0  ;;  %v2458_v34 = vmul.f32 %v3957_v31, %v3957_v31  ;;  %v2467_v35 = vsel %vm2449_vm1, %v3959_v32, 0.0  ;;  %v2475_v37 = vmul.f32 %v3959_v32, %v3959_v32 }
 0xe2f   :  { %v2451_v38 = vrot.slane %v2450_v11, 4  ;;  %v2468_v40 = vrot.slane %v2467_v35, 4 }
 0xe30   :  { %v2459_v41 = vsel %vm2449_vm1, %v2458_v34, 0.0  ;;  %v2476_v42 = vsel %vm2449_vm1, %v2475_v37, 0.0 }
 0xe31   :  { %v2452_v43 = vadd.f32 %v2451_v38, %v2450_v11  ;;  %v2460_v44 = vrot.slane %v2459_v41, 4  ;;  %v2469_v45 = vadd.f32 %v2468_v40, %v2467_v35  ;;  %v2477_v46 = vrot.slane %v2476_v42, 4 }
 0xe33   :  { %v2453_v49 = vrot.slane %v2452_v43, 2  ;;  %v2461_v26 = vadd.f32 %v2460_v44, %v2459_v41  ;;  %v2470_v50 = vrot.slane %v2469_v45, 2  ;;  %v2478_v51 = vadd.f32 %v2477_v46, %v2476_v42  ;;  %v2429_v17 = vpop.f32.mrf.mxu0  ;;  %v2447_v22 = vpop.f32.mrf.mxu1 }
 0xe35   :  { %v2454_v33 = vadd.f32 %v2453_v49, %v2452_v43  ;;  %v2471_v52 = vadd.f32 %v2470_v50, %v2469_v45  ;;  %v2462_v39 = vrot.slane %v2461_v26, 2  ;;  %v2479_v61 = vrot.slane %v2478_v51, 2 }
 0xe37   :  { %v2455_v20 = vrot.slane %v2454_v33, 1  ;;  %v2472_v0 = vrot.slane %v2471_v52, 1  ;;  %v2463_v53 = vadd.f32 %v2462_v39, %v2461_v26  ;;  %v2480_v54 = vadd.f32 %v2479_v61, %v2478_v51 }
 0xe39   :  { %v2456_v55 = vadd.f32 %v2455_v20, %v2454_v33  ;;  %v2473_v56 = vadd.f32 %v2472_v0, %v2471_v52  ;;  %v2464_v57 = vrot.slane %v2463_v53, 1  ;;  %v2481_v58 = vrot.slane %v2480_v54, 1 }
 0xe3b   :  { %v2474_v59 = vadd.f32 %v2473_v56, %v2456_v55  ;;  %v2465_v60 = vadd.f32 %v2464_v57, %v2463_v53  ;;  %v2482_v62 = vadd.f32 %v2481_v58, %v2480_v54 }
 0xe3d   :  { %2484 = vrot.lane.b32.xlu0 %v2474_v59, %s3508_s17  ;;  %v2483_v23 = vadd.f32 %v2482_v62, %v2465_v60 }
 0xe3f   :  { %2487 = vrot.lane.b32.xlu1 %v2483_v23, %s3508_s17 }
 0xeaf   :  { %v2485_v63 = vpop.permute.xlu0 %2484 }
 0xeb0   :  { %v2486_v1 = vadd.f32 %v2485_v63, %v2474_v59 }
 0xeb1   :  { %v2488_v2 = vpop.permute.xlu1 %2487 }
 0xeb2   :  { %v2489_v4 = vadd.f32 %v2488_v2, %v2483_v23  ;;  %2490 = vrot.lane.b32.xlu2 %v2486_v1, %s3499_s0 }
 0xeb4   :  { %2493 = vrot.lane.b32.xlu0 %v2489_v4, %s3499_s0 }
 0xf0c   :  { %v2491_v5 = vpop.permute.xlu2 %2490 }
 0xf0d   :  { %v2492_v6 = vadd.f32 %v2491_v5, %v2486_v1 }
 0xf0f   :  { %v2496_v7 = vmul.f32 0.03125, %v2492_v6 }
 0xf11   :  { %v2498_v10 = vmul.f32 %v2496_v7, %v2496_v7 }
 0xf26   :  { %v2494_v8 = vpop.permute.xlu0 %2493 }
 0xf27   :  { %v2495_v9 = vadd.f32 %v2494_v8, %v2489_v4 }
 0xf29   :  { %v2497_v12 = vmul.f32 0.03125, %v2495_v9 }
 0xf2b   :  { %v2499_v13 = vsub.f32 %v2497_v12, %v2498_v10 }
 0xf2d   :  { %v2500_v15 = vmax.f32 %v2499_v13, 0.0 }
 0xf2f   :  { %v2502_v16 = vadd.f32 1e-05, %v2500_v15 }
 0xf31   :  { %3341 = vrsqrt.f32 %v2502_v16  ;;  %vm2509_vm3 = vweird.f32 %v2502_v16 }
 0xf37   :  { %v3342_v18 = vpop.eup %3341 }
 0xf38   :  { %v2504_v19 = vmul.f32 %v3342_v18, %v2502_v16  ;;  %vm2510_vm2 = vweird.f32 %v3342_v18 }
 0xf39   :  { %vm2511_vm4 = vmor %vm2509_vm3, %vm2510_vm2 }
 0xf3a   :  { %v2505_v21 = vmul.f32 %v3342_v18, %v2504_v19 }
 0xf3c   :  { %v2506_v24 = vmul.f32 0.5, %v2505_v21 }
 0xf3e   :  { %v2507_v25 = vsub.f32 1.5, %v2506_v24 }
 0xf40   :  { %v2508_v14 = vmul.f32 %v3342_v18, %v2507_v25 }
 0xf42   :  { %v2512_v48 = vsel %vm2511_vm4, %v3342_v18, %v2508_v14 }
 0xf43   :  { %v2513_v36 = vmul.f32 %v2512_v48, %v2501_v47 }
 0xf45   :  { %v2515_v28 = vmul.f32 %v2513_v36, %v2496_v7  ;;  %v2518_v3 = vperm.slane %v2513_v36, 0 }
 0xf47   :  { %v2516_v29 = vsub.f32 %v2514_v27, %v2515_v28  ;;  %v2520_v30 = vmul.f32 %v2518_v3, %v3957_v31  ;;  %v2526_v34 = vmul.f32 %v2518_v3, %v3959_v32 }
 0xf49   :  { %v2522_v11 = vperm.slane %v2516_v29, 0 }
 0xf4b   :  { %v2524_v35 = vadd.f32 %v2522_v11, %v2520_v30  ;;  %v2527_v37 = vadd.f32 %v2526_v34, %v2522_v11 }
 0xf4d   :  { %v2525_v38 = vmax.f32 %v2524_v35, 0.0  ;;  %v2528_v40 = vmax.f32 %v2527_v37, 0.0 }
 0xf4f   :  { %2529 = vst [vmem:[%s3664_s4] sm:$0xf] %v2525_v38 }
 0xf50   :  { %3147 = vst [vmem:[%s3664_s4 + $0x4] sm:$0xf] %v2528_v40 }
 0xf51   :  { %2544 = vsyncpa [#allocation10], 1 }
 0xf52   :  { %2545 = vsyncpa [#allocation12], 1 }
 0xf53   :  { %2546 = vsyncpa [#allocation15], 1 }

</bundles_post_ra>
